<compile_context>
chip_gen: v7x
topology: tpu7x:2x2x1
jax: 0.10.0
libtpu: 0.0.40
codegen_flags: <defaults>
</compile_context>

<pallas_src>
import functools

import jax
import jax.numpy as jnp
from jax.experimental import pallas as pl
from jax.experimental.pallas import tpu as pltpu


def _round_up(x, m):
    return (x + m - 1) // m * m


def conv3d_bn_relu(x, weight, bias, gamma, beta, *, stride, padding, eps=1e-5):
    """Fused Conv3d + BatchNorm3d(training batch stats) + ReLU, single pallas_call."""
    N, Cin, D, H, W = x.shape
    Cout, Cin_w, kd, kh, kw = weight.shape
    assert Cin == Cin_w and kd == kh == kw, "cubic kernels only"
    k, s, p = kd, stride, padding
    assert s >= 1 and p >= 0

    Dp, Hp, Wp = D + 2 * p, H + 2 * p, W + 2 * p
    Do = (D + 2 * p - k) // s + 1
    Ho = (H + 2 * p - k) // s + 1
    Wo = (W + 2 * p - k) // s + 1

    # Flat (lane) geometry over the zero-padded input volume.
    Lp = Dp * Hp * Wp                         # real padded-volume length
    Lout = _round_up(Lp, 128)                 # lanes computed per batch (lane-dense)
    ntaps = k ** 3
    offsets = [dz * Hp * Wp + dy * Wp + dx
               for dz in range(k) for dy in range(k) for dx in range(k)]
    max_off = offsets[-1]
    Lin = _round_up(Lout + max_off, 128)      # input slab length (covers every tap shift)

    # Fused path keeps the whole pre-BN activation + input slab resident in VMEM.
    vmem_resident = N * Cout * Lout * 4 + 2 * Cin * Lin * 4 + ntaps * Cout * 128 * 2
    assert vmem_resident < 24 * 1024 * 1024, (
        "activation does not fit the fused single-kernel path; "
        "TODO(synk): two-pass tiled fallback for large shapes")

    # ---- host-side prep: all O(input)/O(Cout) bytes (no k^3-inflated array) ---------
    # x values pre-rounded to bf16 (exact bf16 MXU operands) but STORED f32 so the
    # unaligned tap-shift loads stay on the mature 32-bit layout path.
    xp = jnp.pad(x, ((0, 0), (0, 0), (p, p), (p, p), (p, p)))
    xflat = xp.reshape(N, Cin, Lp).astype(jnp.bfloat16).astype(jnp.float32)
    xflat = jnp.pad(xflat, ((0, 0), (0, 0), (0, Lin - Lp)))

    # Per-tap (Cout, Cin) weights; tap index matches `offsets` ordering.
    w_taps = (weight.transpose(2, 3, 4, 0, 1)
              .reshape(ntaps, Cout, Cin).astype(jnp.bfloat16))

    # Validity mask over the flat padded grid: lane m is a real strided-conv anchor iff
    # m = ((do*s)*Hp + ho*s)*Wp + wo*s with do<Do, ho<Ho, wo<Wo.
    idx = jnp.arange(Lout, dtype=jnp.int32)
    di = idx // (Hp * Wp)
    rem = idx % (Hp * Wp)
    hi = rem // Wp
    wi = rem % Wp
    valid = ((idx < Lp)
             & (di % s == 0) & (di // s < Do)
             & (hi % s == 0) & (hi // s < Ho)
             & (wi % s == 0) & (wi // s < Wo))
    mask = valid.astype(jnp.float32).reshape(1, Lout)

    inv_count = 1.0 / float(N * Do * Ho * Wo)

    # Conv bias dropped on purpose: training-mode BN subtracts the batch mean right
    # after, so a per-channel bias cancels exactly (shifts the mean, not the variance).
    del bias

    gamma2 = gamma.astype(jnp.float32).reshape(Cout, 1)
    beta2 = beta.astype(jnp.float32).reshape(Cout, 1)

    def kernel(x_ref, w_ref, mask_ref, gamma_ref, beta_ref, o_ref):
        n = pl.program_id(0)

        # ---- in-kernel im2col: k^3 tap-shifted matmuls, f32 accumulation ------------
        acc = jnp.zeros((Cout, Lout), jnp.float32)
        for t, off in enumerate(offsets):                     # static unroll over taps
            x_t = x_ref[0, :, pl.ds(off, Lout)].astype(jnp.bfloat16)   # (Cin, Lout)
            acc = acc + jnp.dot(w_ref[t], x_t,
                                preferred_element_type=jnp.float32)
        o_ref[n] = acc                                        # stays resident in VMEM

        # ---- last grid step: batch stats + BN + ReLU applied in place ---------------
        @pl.when(n == pl.num_programs(0) - 1)
        def _():
            y = o_ref[...]                                    # (N, Cout, Lout), all n
            m = mask_ref[...].reshape(1, 1, Lout)
            ym = y * m
            ssum = ym.sum(axis=2, keepdims=True).sum(axis=0, keepdims=True)
            ssq = (ym * y).sum(axis=2, keepdims=True).sum(axis=0, keepdims=True)
            mean = ssum * inv_count
            var = jnp.maximum(ssq * inv_count - mean * mean, 0.0)
            r = jax.lax.rsqrt(var + eps)
            r = r * (1.5 - 0.5 * (var + eps) * r * r)         # one Newton step
            scale = gamma_ref[...].reshape(1, Cout, 1) * r
            shift = beta_ref[...].reshape(1, Cout, 1) - mean * scale
            o_ref[...] = jnp.maximum(y * scale + shift, 0.0)

    out_flat = pl.pallas_call(
        kernel,
        out_shape=jax.ShapeDtypeStruct((N, Cout, Lout), jnp.float32),
        grid_spec=pltpu.PrefetchScalarGridSpec(
            num_scalar_prefetch=0,
            grid=(N,),
            in_specs=[
                pl.BlockSpec((1, Cin, Lin), lambda n: (n, 0, 0)),       # per-batch input
                pl.BlockSpec((ntaps, Cout, Cin), lambda n: (0, 0, 0)),  # weights, resident
                pl.BlockSpec((1, Lout), lambda n: (0, 0)),              # validity mask
                pl.BlockSpec((Cout, 1), lambda n: (0, 0)),              # gamma
                pl.BlockSpec((Cout, 1), lambda n: (0, 0)),              # beta
            ],
            out_specs=pl.BlockSpec((N, Cout, Lout), lambda n: (0, 0, 0)),
        ),
        compiler_params=pltpu.CompilerParams(
            # stats need every batch's conv output before BN can be applied.
            dimension_semantics=("arbitrary",),
            vmem_limit_bytes=32 * 1024 * 1024),
    )(xflat, w_taps, mask, gamma2, beta2)

    # Flat padded grid -> NCDHW (strided subsample also handles stride > 1).
    y = out_flat[:, :, :Lp].reshape(N, Cout, Dp, Hp, Wp)
    y = y[:, :, :(Do - 1) * s + 1:s, :(Ho - 1) * s + 1:s, :(Wo - 1) * s + 1:s]
    return y


def _reference(x, weight, bias, gamma, beta, *, stride, padding, eps=1e-5):
    y = jax.lax.conv_general_dilated(
        x, weight, window_strides=(stride,) * 3,
        padding=[(padding, padding)] * 3,
        dimension_numbers=("NCDHW", "OIDHW", "NCDHW"),
        precision=jax.lax.Precision.HIGHEST)
    y = y + bias.reshape(1, -1, 1, 1, 1)
    mean = y.mean(axis=(0, 2, 3, 4), keepdims=True)
    var = ((y - mean) ** 2).mean(axis=(0, 2, 3, 4), keepdims=True)
    y = (gamma.reshape(1, -1, 1, 1, 1) * (y - mean) * jax.lax.rsqrt(var + eps)
         + beta.reshape(1, -1, 1, 1, 1))
    return jnp.maximum(y, 0.0)


if __name__ == "__main__":
    key = jax.random.PRNGKey(0)
    k_x, k_w, k_b = jax.random.split(key, 3)

    # Module config: Conv3d(in_channels=4, out_channels=8, k=3, s, p=1, batch_norm=True)
    N, Cin, D, H, W = 2, 4, 8, 8, 8
    Cout, k = 8, 3

    x = jax.random.normal(k_x, (N, Cin, D, H, W), jnp.float32)
    fan_in = Cin * k ** 3
    bound = 1.0 / (fan_in ** 0.5)
    weight = jax.random.uniform(k_w, (Cout, Cin, k, k, k), jnp.float32, -bound, bound)
    bias = jax.random.uniform(k_b, (Cout,), jnp.float32, -bound, bound)
    gamma = jnp.ones((Cout,), jnp.float32)   # BatchNorm3d default weight
    beta = jnp.zeros((Cout,), jnp.float32)   # BatchNorm3d default bias

    # Kernel uses bf16-rounded conv operands with f32 accumulation: tight check against
    # a reference on the same bf16-rounded inputs, loose check against full f32.
    xr = x.astype(jnp.bfloat16).astype(jnp.float32)
    wr = weight.astype(jnp.bfloat16).astype(jnp.float32)

    for (s, p) in [(1, 1), (2, 1)]:           # stride-1 and strided variants
        run = jax.jit(functools.partial(conv3d_bn_relu, stride=s, padding=p))
        out = jax.block_until_ready(run(x, weight, bias, gamma, beta))

        ref_tight = _reference(xr, wr, bias, gamma, beta, stride=s, padding=p)
        ref_f32 = _reference(x, weight, bias, gamma, beta, stride=s, padding=p)

        Do = (D + 2 * p - k) // s + 1
        assert out.shape == ref_f32.shape == (N, Cout, Do, Do, Do), out.shape
        err_tight = float(jnp.max(jnp.abs(out - ref_tight)))
        err_loose = float(jnp.max(jnp.abs(out - ref_f32)))
        assert jnp.allclose(out, ref_tight, atol=2e-3, rtol=2e-3), (s, p, err_tight)
        assert jnp.allclose(out, ref_f32, atol=5e-2, rtol=5e-2), (s, p, err_loose)

    print("KERNEL_OK")
</pallas_src>

<mosaic_0001>
module attributes {stable_mosaic.version = 11 : i64} {
  func.func @kernel(%arg0: i32, %arg1: memref<1x4x1280xf32, #tpu.memory_space<vmem>>, %arg2: memref<27x8x4xbf16, #tpu.memory_space<vmem>>, %arg3: memref<1x1024xf32, #tpu.memory_space<vmem>>, %arg4: memref<8x1xf32, #tpu.memory_space<vmem>>, %arg5: memref<8x1xf32, #tpu.memory_space<vmem>>, %arg6: memref<2x8x1024xf32, #tpu.memory_space<vmem>>) attributes {dimension_semantics = [#tpu.dimension_semantics<arbitrary>], iteration_bounds = array<i64: 2>, scalar_prefetch = 0 : i64, scratch_operands = 0 : i64, tpu.core_type = #tpu.core_type<tc>, window_params = [{transform_indices = @transform_0, window_bounds = array<i64: 1, 4, 1280>}, {pipeline_mode = #tpu.pipeline_mode<synchronous>, transform_indices = @transform_1, window_bounds = array<i64: 27, 8, 4>}, {pipeline_mode = #tpu.pipeline_mode<synchronous>, transform_indices = @transform_2, window_bounds = array<i64: 1, 1024>}, {pipeline_mode = #tpu.pipeline_mode<synchronous>, transform_indices = @transform_3, window_bounds = array<i64: 8, 1>}, {pipeline_mode = #tpu.pipeline_mode<synchronous>, transform_indices = @transform_4, window_bounds = array<i64: 8, 1>}, {pipeline_mode = #tpu.pipeline_mode<synchronous>, transform_indices = @transform_5, window_bounds = array<i64: 2, 8, 1024>}]} {
    %cst = arith.constant 0.000000e+00 : f32
    %0 = vector.broadcast %cst : f32 to vector<8x1024xf32>
    %c0 = arith.constant 0 : index
    %c0_0 = arith.constant 0 : index
    %c0_1 = arith.constant 0 : index
    %1 = vector.load %arg1[%c0, %c0_0, %c0_1] : memref<1x4x1280xf32, #tpu.memory_space<vmem>>, vector<1x4x1024xf32>
    %2 = vector.shape_cast %1 : vector<1x4x1024xf32> to vector<4x1024xf32>
    %3 = arith.truncf %2 : vector<4x1024xf32> to vector<4x1024xbf16>
    %c0_2 = arith.constant 0 : index
    %c0_3 = arith.constant 0 : index
    %c0_4 = arith.constant 0 : index
    %4 = vector.load %arg2[%c0_2, %c0_3, %c0_4] : memref<27x8x4xbf16, #tpu.memory_space<vmem>>, vector<1x8x4xbf16>
    %5 = vector.shape_cast %4 : vector<1x8x4xbf16> to vector<8x4xbf16>
    %cst_5 = arith.constant dense<0.000000e+00> : vector<8x1024xf32>
    %6 = tpu.matmul %5, %3, %cst_5 {dimension_numbers = #tpu.dot_dimension_numbers<[1], [0], [0], [1], [0, 0, 1, 1], [], []>} : vector<8x4xbf16>, vector<4x1024xbf16>, vector<8x1024xf32> -> vector<8x1024xf32>
    %7 = arith.addf %0, %6 : vector<8x1024xf32>
    %c0_6 = arith.constant 0 : index
    %c0_7 = arith.constant 0 : index
    %c1 = arith.constant 1 : index
    %8 = vector.load %arg1[%c0_6, %c0_7, %c1] : memref<1x4x1280xf32, #tpu.memory_space<vmem>>, vector<1x4x1024xf32>
    %9 = vector.shape_cast %8 : vector<1x4x1024xf32> to vector<4x1024xf32>
    %10 = arith.truncf %9 : vector<4x1024xf32> to vector<4x1024xbf16>
    %c1_8 = arith.constant 1 : index
    %c0_9 = arith.constant 0 : index
    %c0_10 = arith.constant 0 : index
    %11 = vector.load %arg2[%c1_8, %c0_9, %c0_10] : memref<27x8x4xbf16, #tpu.memory_space<vmem>>, vector<1x8x4xbf16>
    %12 = vector.shape_cast %11 : vector<1x8x4xbf16> to vector<8x4xbf16>
    %cst_11 = arith.constant dense<0.000000e+00> : vector<8x1024xf32>
    %13 = tpu.matmul %12, %10, %cst_11 {dimension_numbers = #tpu.dot_dimension_numbers<[1], [0], [0], [1], [0, 0, 1, 1], [], []>} : vector<8x4xbf16>, vector<4x1024xbf16>, vector<8x1024xf32> -> vector<8x1024xf32>
    %14 = arith.addf %7, %13 : vector<8x1024xf32>
    %c0_12 = arith.constant 0 : index
    %c0_13 = arith.constant 0 : index
    %c2 = arith.constant 2 : index
    %15 = vector.load %arg1[%c0_12, %c0_13, %c2] : memref<1x4x1280xf32, #tpu.memory_space<vmem>>, vector<1x4x1024xf32>
    %16 = vector.shape_cast %15 : vector<1x4x1024xf32> to vector<4x1024xf32>
    %17 = arith.truncf %16 : vector<4x1024xf32> to vector<4x1024xbf16>
    %c2_14 = arith.constant 2 : index
    %c0_15 = arith.constant 0 : index
    %c0_16 = arith.constant 0 : index
    %18 = vector.load %arg2[%c2_14, %c0_15, %c0_16] : memref<27x8x4xbf16, #tpu.memory_space<vmem>>, vector<1x8x4xbf16>
    %19 = vector.shape_cast %18 : vector<1x8x4xbf16> to vector<8x4xbf16>
    %cst_17 = arith.constant dense<0.000000e+00> : vector<8x1024xf32>
    %20 = tpu.matmul %19, %17, %cst_17 {dimension_numbers = #tpu.dot_dimension_numbers<[1], [0], [0], [1], [0, 0, 1, 1], [], []>} : vector<8x4xbf16>, vector<4x1024xbf16>, vector<8x1024xf32> -> vector<8x1024xf32>
    %21 = arith.addf %14, %20 : vector<8x1024xf32>
    %c0_18 = arith.constant 0 : index
    %c0_19 = arith.constant 0 : index
    %c10 = arith.constant 10 : index
    %22 = vector.load %arg1[%c0_18, %c0_19, %c10] : memref<1x4x1280xf32, #tpu.memory_space<vmem>>, vector<1x4x1024xf32>
    %23 = vector.shape_cast %22 : vector<1x4x1024xf32> to vector<4x1024xf32>
    %24 = arith.truncf %23 : vector<4x1024xf32> to vector<4x1024xbf16>
    %c3 = arith.constant 3 : index
    %c0_20 = arith.constant 0 : index
    %c0_21 = arith.constant 0 : index
    %25 = vector.load %arg2[%c3, %c0_20, %c0_21] : memref<27x8x4xbf16, #tpu.memory_space<vmem>>, vector<1x8x4xbf16>
    %26 = vector.shape_cast %25 : vector<1x8x4xbf16> to vector<8x4xbf16>
    %cst_22 = arith.constant dense<0.000000e+00> : vector<8x1024xf32>
    %27 = tpu.matmul %26, %24, %cst_22 {dimension_numbers = #tpu.dot_dimension_numbers<[1], [0], [0], [1], [0, 0, 1, 1], [], []>} : vector<8x4xbf16>, vector<4x1024xbf16>, vector<8x1024xf32> -> vector<8x1024xf32>
    %28 = arith.addf %21, %27 : vector<8x1024xf32>
    %c0_23 = arith.constant 0 : index
    %c0_24 = arith.constant 0 : index
    %c11 = arith.constant 11 : index
    %29 = vector.load %arg1[%c0_23, %c0_24, %c11] : memref<1x4x1280xf32, #tpu.memory_space<vmem>>, vector<1x4x1024xf32>
    %30 = vector.shape_cast %29 : vector<1x4x1024xf32> to vector<4x1024xf32>
    %31 = arith.truncf %30 : vector<4x1024xf32> to vector<4x1024xbf16>
    %c4 = arith.constant 4 : index
    %c0_25 = arith.constant 0 : index
    %c0_26 = arith.constant 0 : index
    %32 = vector.load %arg2[%c4, %c0_25, %c0_26] : memref<27x8x4xbf16, #tpu.memory_space<vmem>>, vector<1x8x4xbf16>
    %33 = vector.shape_cast %32 : vector<1x8x4xbf16> to vector<8x4xbf16>
    %cst_27 = arith.constant dense<0.000000e+00> : vector<8x1024xf32>
    %34 = tpu.matmul %33, %31, %cst_27 {dimension_numbers = #tpu.dot_dimension_numbers<[1], [0], [0], [1], [0, 0, 1, 1], [], []>} : vector<8x4xbf16>, vector<4x1024xbf16>, vector<8x1024xf32> -> vector<8x1024xf32>
    %35 = arith.addf %28, %34 : vector<8x1024xf32>
    %c0_28 = arith.constant 0 : index
    %c0_29 = arith.constant 0 : index
    %c12 = arith.constant 12 : index
    %36 = vector.load %arg1[%c0_28, %c0_29, %c12] : memref<1x4x1280xf32, #tpu.memory_space<vmem>>, vector<1x4x1024xf32>
    %37 = vector.shape_cast %36 : vector<1x4x1024xf32> to vector<4x1024xf32>
    %38 = arith.truncf %37 : vector<4x1024xf32> to vector<4x1024xbf16>
    %c5 = arith.constant 5 : index
    %c0_30 = arith.constant 0 : index
    %c0_31 = arith.constant 0 : index
    %39 = vector.load %arg2[%c5, %c0_30, %c0_31] : memref<27x8x4xbf16, #tpu.memory_space<vmem>>, vector<1x8x4xbf16>
    %40 = vector.shape_cast %39 : vector<1x8x4xbf16> to vector<8x4xbf16>
    %cst_32 = arith.constant dense<0.000000e+00> : vector<8x1024xf32>
    %41 = tpu.matmul %40, %38, %cst_32 {dimension_numbers = #tpu.dot_dimension_numbers<[1], [0], [0], [1], [0, 0, 1, 1], [], []>} : vector<8x4xbf16>, vector<4x1024xbf16>, vector<8x1024xf32> -> vector<8x1024xf32>
    %42 = arith.addf %35, %41 : vector<8x1024xf32>
    %c0_33 = arith.constant 0 : index
    %c0_34 = arith.constant 0 : index
    %c20 = arith.constant 20 : index
    %43 = vector.load %arg1[%c0_33, %c0_34, %c20] : memref<1x4x1280xf32, #tpu.memory_space<vmem>>, vector<1x4x1024xf32>
    %44 = vector.shape_cast %43 : vector<1x4x1024xf32> to vector<4x1024xf32>
    %45 = arith.truncf %44 : vector<4x1024xf32> to vector<4x1024xbf16>
    %c6 = arith.constant 6 : index
    %c0_35 = arith.constant 0 : index
    %c0_36 = arith.constant 0 : index
    %46 = vector.load %arg2[%c6, %c0_35, %c0_36] : memref<27x8x4xbf16, #tpu.memory_space<vmem>>, vector<1x8x4xbf16>
    %47 = vector.shape_cast %46 : vector<1x8x4xbf16> to vector<8x4xbf16>
    %cst_37 = arith.constant dense<0.000000e+00> : vector<8x1024xf32>
    %48 = tpu.matmul %47, %45, %cst_37 {dimension_numbers = #tpu.dot_dimension_numbers<[1], [0], [0], [1], [0, 0, 1, 1], [], []>} : vector<8x4xbf16>, vector<4x1024xbf16>, vector<8x1024xf32> -> vector<8x1024xf32>
    %49 = arith.addf %42, %48 : vector<8x1024xf32>
    %c0_38 = arith.constant 0 : index
    %c0_39 = arith.constant 0 : index
    %c21 = arith.constant 21 : index
    %50 = vector.load %arg1[%c0_38, %c0_39, %c21] : memref<1x4x1280xf32, #tpu.memory_space<vmem>>, vector<1x4x1024xf32>
    %51 = vector.shape_cast %50 : vector<1x4x1024xf32> to vector<4x1024xf32>
    %52 = arith.truncf %51 : vector<4x1024xf32> to vector<4x1024xbf16>
    %c7 = arith.constant 7 : index
    %c0_40 = arith.constant 0 : index
    %c0_41 = arith.constant 0 : index
    %53 = vector.load %arg2[%c7, %c0_40, %c0_41] : memref<27x8x4xbf16, #tpu.memory_space<vmem>>, vector<1x8x4xbf16>
    %54 = vector.shape_cast %53 : vector<1x8x4xbf16> to vector<8x4xbf16>
    %cst_42 = arith.constant dense<0.000000e+00> : vector<8x1024xf32>
    %55 = tpu.matmul %54, %52, %cst_42 {dimension_numbers = #tpu.dot_dimension_numbers<[1], [0], [0], [1], [0, 0, 1, 1], [], []>} : vector<8x4xbf16>, vector<4x1024xbf16>, vector<8x1024xf32> -> vector<8x1024xf32>
    %56 = arith.addf %49, %55 : vector<8x1024xf32>
    %c0_43 = arith.constant 0 : index
    %c0_44 = arith.constant 0 : index
    %c22 = arith.constant 22 : index
    %57 = vector.load %arg1[%c0_43, %c0_44, %c22] : memref<1x4x1280xf32, #tpu.memory_space<vmem>>, vector<1x4x1024xf32>
    %58 = vector.shape_cast %57 : vector<1x4x1024xf32> to vector<4x1024xf32>
    %59 = arith.truncf %58 : vector<4x1024xf32> to vector<4x1024xbf16>
    %c8 = arith.constant 8 : index
    %c0_45 = arith.constant 0 : index
    %c0_46 = arith.constant 0 : index
    %60 = vector.load %arg2[%c8, %c0_45, %c0_46] : memref<27x8x4xbf16, #tpu.memory_space<vmem>>, vector<1x8x4xbf16>
    %61 = vector.shape_cast %60 : vector<1x8x4xbf16> to vector<8x4xbf16>
    %cst_47 = arith.constant dense<0.000000e+00> : vector<8x1024xf32>
    %62 = tpu.matmul %61, %59, %cst_47 {dimension_numbers = #tpu.dot_dimension_numbers<[1], [0], [0], [1], [0, 0, 1, 1], [], []>} : vector<8x4xbf16>, vector<4x1024xbf16>, vector<8x1024xf32> -> vector<8x1024xf32>
    %63 = arith.addf %56, %62 : vector<8x1024xf32>
    %c0_48 = arith.constant 0 : index
    %c0_49 = arith.constant 0 : index
    %c100 = arith.constant 100 : index
    %64 = vector.load %arg1[%c0_48, %c0_49, %c100] : memref<1x4x1280xf32, #tpu.memory_space<vmem>>, vector<1x4x1024xf32>
    %65 = vector.shape_cast %64 : vector<1x4x1024xf32> to vector<4x1024xf32>
    %66 = arith.truncf %65 : vector<4x1024xf32> to vector<4x1024xbf16>
    %c9 = arith.constant 9 : index
    %c0_50 = arith.constant 0 : index
    %c0_51 = arith.constant 0 : index
    %67 = vector.load %arg2[%c9, %c0_50, %c0_51] : memref<27x8x4xbf16, #tpu.memory_space<vmem>>, vector<1x8x4xbf16>
    %68 = vector.shape_cast %67 : vector<1x8x4xbf16> to vector<8x4xbf16>
    %cst_52 = arith.constant dense<0.000000e+00> : vector<8x1024xf32>
    %69 = tpu.matmul %68, %66, %cst_52 {dimension_numbers = #tpu.dot_dimension_numbers<[1], [0], [0], [1], [0, 0, 1, 1], [], []>} : vector<8x4xbf16>, vector<4x1024xbf16>, vector<8x1024xf32> -> vector<8x1024xf32>
    %70 = arith.addf %63, %69 : vector<8x1024xf32>
    %c0_53 = arith.constant 0 : index
    %c0_54 = arith.constant 0 : index
    %c101 = arith.constant 101 : index
    %71 = vector.load %arg1[%c0_53, %c0_54, %c101] : memref<1x4x1280xf32, #tpu.memory_space<vmem>>, vector<1x4x1024xf32>
    %72 = vector.shape_cast %71 : vector<1x4x1024xf32> to vector<4x1024xf32>
    %73 = arith.truncf %72 : vector<4x1024xf32> to vector<4x1024xbf16>
    %c10_55 = arith.constant 10 : index
    %c0_56 = arith.constant 0 : index
    %c0_57 = arith.constant 0 : index
    %74 = vector.load %arg2[%c10_55, %c0_56, %c0_57] : memref<27x8x4xbf16, #tpu.memory_space<vmem>>, vector<1x8x4xbf16>
    %75 = vector.shape_cast %74 : vector<1x8x4xbf16> to vector<8x4xbf16>
    %cst_58 = arith.constant dense<0.000000e+00> : vector<8x1024xf32>
    %76 = tpu.matmul %75, %73, %cst_58 {dimension_numbers = #tpu.dot_dimension_numbers<[1], [0], [0], [1], [0, 0, 1, 1], [], []>} : vector<8x4xbf16>, vector<4x1024xbf16>, vector<8x1024xf32> -> vector<8x1024xf32>
    %77 = arith.addf %70, %76 : vector<8x1024xf32>
    %c0_59 = arith.constant 0 : index
    %c0_60 = arith.constant 0 : index
    %c102 = arith.constant 102 : index
    %78 = vector.load %arg1[%c0_59, %c0_60, %c102] : memref<1x4x1280xf32, #tpu.memory_space<vmem>>, vector<1x4x1024xf32>
    %79 = vector.shape_cast %78 : vector<1x4x1024xf32> to vector<4x1024xf32>
    %80 = arith.truncf %79 : vector<4x1024xf32> to vector<4x1024xbf16>
    %c11_61 = arith.constant 11 : index
    %c0_62 = arith.constant 0 : index
    %c0_63 = arith.constant 0 : index
    %81 = vector.load %arg2[%c11_61, %c0_62, %c0_63] : memref<27x8x4xbf16, #tpu.memory_space<vmem>>, vector<1x8x4xbf16>
    %82 = vector.shape_cast %81 : vector<1x8x4xbf16> to vector<8x4xbf16>
    %cst_64 = arith.constant dense<0.000000e+00> : vector<8x1024xf32>
    %83 = tpu.matmul %82, %80, %cst_64 {dimension_numbers = #tpu.dot_dimension_numbers<[1], [0], [0], [1], [0, 0, 1, 1], [], []>} : vector<8x4xbf16>, vector<4x1024xbf16>, vector<8x1024xf32> -> vector<8x1024xf32>
    %84 = arith.addf %77, %83 : vector<8x1024xf32>
    %c0_65 = arith.constant 0 : index
    %c0_66 = arith.constant 0 : index
    %c110 = arith.constant 110 : index
    %85 = vector.load %arg1[%c0_65, %c0_66, %c110] : memref<1x4x1280xf32, #tpu.memory_space<vmem>>, vector<1x4x1024xf32>
    %86 = vector.shape_cast %85 : vector<1x4x1024xf32> to vector<4x1024xf32>
    %87 = arith.truncf %86 : vector<4x1024xf32> to vector<4x1024xbf16>
    %c12_67 = arith.constant 12 : index
    %c0_68 = arith.constant 0 : index
    %c0_69 = arith.constant 0 : index
    %88 = vector.load %arg2[%c12_67, %c0_68, %c0_69] : memref<27x8x4xbf16, #tpu.memory_space<vmem>>, vector<1x8x4xbf16>
    %89 = vector.shape_cast %88 : vector<1x8x4xbf16> to vector<8x4xbf16>
    %cst_70 = arith.constant dense<0.000000e+00> : vector<8x1024xf32>
    %90 = tpu.matmul %89, %87, %cst_70 {dimension_numbers = #tpu.dot_dimension_numbers<[1], [0], [0], [1], [0, 0, 1, 1], [], []>} : vector<8x4xbf16>, vector<4x1024xbf16>, vector<8x1024xf32> -> vector<8x1024xf32>
    %91 = arith.addf %84, %90 : vector<8x1024xf32>
    %c0_71 = arith.constant 0 : index
    %c0_72 = arith.constant 0 : index
    %c111 = arith.constant 111 : index
    %92 = vector.load %arg1[%c0_71, %c0_72, %c111] : memref<1x4x1280xf32, #tpu.memory_space<vmem>>, vector<1x4x1024xf32>
    %93 = vector.shape_cast %92 : vector<1x4x1024xf32> to vector<4x1024xf32>
    %94 = arith.truncf %93 : vector<4x1024xf32> to vector<4x1024xbf16>
    %c13 = arith.constant 13 : index
    %c0_73 = arith.constant 0 : index
    %c0_74 = arith.constant 0 : index
    %95 = vector.load %arg2[%c13, %c0_73, %c0_74] : memref<27x8x4xbf16, #tpu.memory_space<vmem>>, vector<1x8x4xbf16>
    %96 = vector.shape_cast %95 : vector<1x8x4xbf16> to vector<8x4xbf16>
    %cst_75 = arith.constant dense<0.000000e+00> : vector<8x1024xf32>
    %97 = tpu.matmul %96, %94, %cst_75 {dimension_numbers = #tpu.dot_dimension_numbers<[1], [0], [0], [1], [0, 0, 1, 1], [], []>} : vector<8x4xbf16>, vector<4x1024xbf16>, vector<8x1024xf32> -> vector<8x1024xf32>
    %98 = arith.addf %91, %97 : vector<8x1024xf32>
    %c0_76 = arith.constant 0 : index
    %c0_77 = arith.constant 0 : index
    %c112 = arith.constant 112 : index
    %99 = vector.load %arg1[%c0_76, %c0_77, %c112] : memref<1x4x1280xf32, #tpu.memory_space<vmem>>, vector<1x4x1024xf32>
    %100 = vector.shape_cast %99 : vector<1x4x1024xf32> to vector<4x1024xf32>
    %101 = arith.truncf %100 : vector<4x1024xf32> to vector<4x1024xbf16>
    %c14 = arith.constant 14 : index
    %c0_78 = arith.constant 0 : index
    %c0_79 = arith.constant 0 : index
    %102 = vector.load %arg2[%c14, %c0_78, %c0_79] : memref<27x8x4xbf16, #tpu.memory_space<vmem>>, vector<1x8x4xbf16>
    %103 = vector.shape_cast %102 : vector<1x8x4xbf16> to vector<8x4xbf16>
    %cst_80 = arith.constant dense<0.000000e+00> : vector<8x1024xf32>
    %104 = tpu.matmul %103, %101, %cst_80 {dimension_numbers = #tpu.dot_dimension_numbers<[1], [0], [0], [1], [0, 0, 1, 1], [], []>} : vector<8x4xbf16>, vector<4x1024xbf16>, vector<8x1024xf32> -> vector<8x1024xf32>
    %105 = arith.addf %98, %104 : vector<8x1024xf32>
    %c0_81 = arith.constant 0 : index
    %c0_82 = arith.constant 0 : index
    %c120 = arith.constant 120 : index
    %106 = vector.load %arg1[%c0_81, %c0_82, %c120] : memref<1x4x1280xf32, #tpu.memory_space<vmem>>, vector<1x4x1024xf32>
    %107 = vector.shape_cast %106 : vector<1x4x1024xf32> to vector<4x1024xf32>
    %108 = arith.truncf %107 : vector<4x1024xf32> to vector<4x1024xbf16>
    %c15 = arith.constant 15 : index
    %c0_83 = arith.constant 0 : index
    %c0_84 = arith.constant 0 : index
    %109 = vector.load %arg2[%c15, %c0_83, %c0_84] : memref<27x8x4xbf16, #tpu.memory_space<vmem>>, vector<1x8x4xbf16>
    %110 = vector.shape_cast %109 : vector<1x8x4xbf16> to vector<8x4xbf16>
    %cst_85 = arith.constant dense<0.000000e+00> : vector<8x1024xf32>
    %111 = tpu.matmul %110, %108, %cst_85 {dimension_numbers = #tpu.dot_dimension_numbers<[1], [0], [0], [1], [0, 0, 1, 1], [], []>} : vector<8x4xbf16>, vector<4x1024xbf16>, vector<8x1024xf32> -> vector<8x1024xf32>
    %112 = arith.addf %105, %111 : vector<8x1024xf32>
    %c0_86 = arith.constant 0 : index
    %c0_87 = arith.constant 0 : index
    %c121 = arith.constant 121 : index
    %113 = vector.load %arg1[%c0_86, %c0_87, %c121] : memref<1x4x1280xf32, #tpu.memory_space<vmem>>, vector<1x4x1024xf32>
    %114 = vector.shape_cast %113 : vector<1x4x1024xf32> to vector<4x1024xf32>
    %115 = arith.truncf %114 : vector<4x1024xf32> to vector<4x1024xbf16>
    %c16 = arith.constant 16 : index
    %c0_88 = arith.constant 0 : index
    %c0_89 = arith.constant 0 : index
    %116 = vector.load %arg2[%c16, %c0_88, %c0_89] : memref<27x8x4xbf16, #tpu.memory_space<vmem>>, vector<1x8x4xbf16>
    %117 = vector.shape_cast %116 : vector<1x8x4xbf16> to vector<8x4xbf16>
    %cst_90 = arith.constant dense<0.000000e+00> : vector<8x1024xf32>
    %118 = tpu.matmul %117, %115, %cst_90 {dimension_numbers = #tpu.dot_dimension_numbers<[1], [0], [0], [1], [0, 0, 1, 1], [], []>} : vector<8x4xbf16>, vector<4x1024xbf16>, vector<8x1024xf32> -> vector<8x1024xf32>
    %119 = arith.addf %112, %118 : vector<8x1024xf32>
    %c0_91 = arith.constant 0 : index
    %c0_92 = arith.constant 0 : index
    %c122 = arith.constant 122 : index
    %120 = vector.load %arg1[%c0_91, %c0_92, %c122] : memref<1x4x1280xf32, #tpu.memory_space<vmem>>, vector<1x4x1024xf32>
    %121 = vector.shape_cast %120 : vector<1x4x1024xf32> to vector<4x1024xf32>
    %122 = arith.truncf %121 : vector<4x1024xf32> to vector<4x1024xbf16>
    %c17 = arith.constant 17 : index
    %c0_93 = arith.constant 0 : index
    %c0_94 = arith.constant 0 : index
    %123 = vector.load %arg2[%c17, %c0_93, %c0_94] : memref<27x8x4xbf16, #tpu.memory_space<vmem>>, vector<1x8x4xbf16>
    %124 = vector.shape_cast %123 : vector<1x8x4xbf16> to vector<8x4xbf16>
    %cst_95 = arith.constant dense<0.000000e+00> : vector<8x1024xf32>
    %125 = tpu.matmul %124, %122, %cst_95 {dimension_numbers = #tpu.dot_dimension_numbers<[1], [0], [0], [1], [0, 0, 1, 1], [], []>} : vector<8x4xbf16>, vector<4x1024xbf16>, vector<8x1024xf32> -> vector<8x1024xf32>
    %126 = arith.addf %119, %125 : vector<8x1024xf32>
    %c0_96 = arith.constant 0 : index
    %c0_97 = arith.constant 0 : index
    %c200 = arith.constant 200 : index
    %127 = vector.load %arg1[%c0_96, %c0_97, %c200] : memref<1x4x1280xf32, #tpu.memory_space<vmem>>, vector<1x4x1024xf32>
    %128 = vector.shape_cast %127 : vector<1x4x1024xf32> to vector<4x1024xf32>
    %129 = arith.truncf %128 : vector<4x1024xf32> to vector<4x1024xbf16>
    %c18 = arith.constant 18 : index
    %c0_98 = arith.constant 0 : index
    %c0_99 = arith.constant 0 : index
    %130 = vector.load %arg2[%c18, %c0_98, %c0_99] : memref<27x8x4xbf16, #tpu.memory_space<vmem>>, vector<1x8x4xbf16>
    %131 = vector.shape_cast %130 : vector<1x8x4xbf16> to vector<8x4xbf16>
    %cst_100 = arith.constant dense<0.000000e+00> : vector<8x1024xf32>
    %132 = tpu.matmul %131, %129, %cst_100 {dimension_numbers = #tpu.dot_dimension_numbers<[1], [0], [0], [1], [0, 0, 1, 1], [], []>} : vector<8x4xbf16>, vector<4x1024xbf16>, vector<8x1024xf32> -> vector<8x1024xf32>
    %133 = arith.addf %126, %132 : vector<8x1024xf32>
    %c0_101 = arith.constant 0 : index
    %c0_102 = arith.constant 0 : index
    %c201 = arith.constant 201 : index
    %134 = vector.load %arg1[%c0_101, %c0_102, %c201] : memref<1x4x1280xf32, #tpu.memory_space<vmem>>, vector<1x4x1024xf32>
    %135 = vector.shape_cast %134 : vector<1x4x1024xf32> to vector<4x1024xf32>
    %136 = arith.truncf %135 : vector<4x1024xf32> to vector<4x1024xbf16>
    %c19 = arith.constant 19 : index
    %c0_103 = arith.constant 0 : index
    %c0_104 = arith.constant 0 : index
    %137 = vector.load %arg2[%c19, %c0_103, %c0_104] : memref<27x8x4xbf16, #tpu.memory_space<vmem>>, vector<1x8x4xbf16>
    %138 = vector.shape_cast %137 : vector<1x8x4xbf16> to vector<8x4xbf16>
    %cst_105 = arith.constant dense<0.000000e+00> : vector<8x1024xf32>
    %139 = tpu.matmul %138, %136, %cst_105 {dimension_numbers = #tpu.dot_dimension_numbers<[1], [0], [0], [1], [0, 0, 1, 1], [], []>} : vector<8x4xbf16>, vector<4x1024xbf16>, vector<8x1024xf32> -> vector<8x1024xf32>
    %140 = arith.addf %133, %139 : vector<8x1024xf32>
    %c0_106 = arith.constant 0 : index
    %c0_107 = arith.constant 0 : index
    %c202 = arith.constant 202 : index
    %141 = vector.load %arg1[%c0_106, %c0_107, %c202] : memref<1x4x1280xf32, #tpu.memory_space<vmem>>, vector<1x4x1024xf32>
    %142 = vector.shape_cast %141 : vector<1x4x1024xf32> to vector<4x1024xf32>
    %143 = arith.truncf %142 : vector<4x1024xf32> to vector<4x1024xbf16>
    %c20_108 = arith.constant 20 : index
    %c0_109 = arith.constant 0 : index
    %c0_110 = arith.constant 0 : index
    %144 = vector.load %arg2[%c20_108, %c0_109, %c0_110] : memref<27x8x4xbf16, #tpu.memory_space<vmem>>, vector<1x8x4xbf16>
    %145 = vector.shape_cast %144 : vector<1x8x4xbf16> to vector<8x4xbf16>
    %cst_111 = arith.constant dense<0.000000e+00> : vector<8x1024xf32>
    %146 = tpu.matmul %145, %143, %cst_111 {dimension_numbers = #tpu.dot_dimension_numbers<[1], [0], [0], [1], [0, 0, 1, 1], [], []>} : vector<8x4xbf16>, vector<4x1024xbf16>, vector<8x1024xf32> -> vector<8x1024xf32>
    %147 = arith.addf %140, %146 : vector<8x1024xf32>
    %c0_112 = arith.constant 0 : index
    %c0_113 = arith.constant 0 : index
    %c210 = arith.constant 210 : index
    %148 = vector.load %arg1[%c0_112, %c0_113, %c210] : memref<1x4x1280xf32, #tpu.memory_space<vmem>>, vector<1x4x1024xf32>
    %149 = vector.shape_cast %148 : vector<1x4x1024xf32> to vector<4x1024xf32>
    %150 = arith.truncf %149 : vector<4x1024xf32> to vector<4x1024xbf16>
    %c21_114 = arith.constant 21 : index
    %c0_115 = arith.constant 0 : index
    %c0_116 = arith.constant 0 : index
    %151 = vector.load %arg2[%c21_114, %c0_115, %c0_116] : memref<27x8x4xbf16, #tpu.memory_space<vmem>>, vector<1x8x4xbf16>
    %152 = vector.shape_cast %151 : vector<1x8x4xbf16> to vector<8x4xbf16>
    %cst_117 = arith.constant dense<0.000000e+00> : vector<8x1024xf32>
    %153 = tpu.matmul %152, %150, %cst_117 {dimension_numbers = #tpu.dot_dimension_numbers<[1], [0], [0], [1], [0, 0, 1, 1], [], []>} : vector<8x4xbf16>, vector<4x1024xbf16>, vector<8x1024xf32> -> vector<8x1024xf32>
    %154 = arith.addf %147, %153 : vector<8x1024xf32>
    %c0_118 = arith.constant 0 : index
    %c0_119 = arith.constant 0 : index
    %c211 = arith.constant 211 : index
    %155 = vector.load %arg1[%c0_118, %c0_119, %c211] : memref<1x4x1280xf32, #tpu.memory_space<vmem>>, vector<1x4x1024xf32>
    %156 = vector.shape_cast %155 : vector<1x4x1024xf32> to vector<4x1024xf32>
    %157 = arith.truncf %156 : vector<4x1024xf32> to vector<4x1024xbf16>
    %c22_120 = arith.constant 22 : index
    %c0_121 = arith.constant 0 : index
    %c0_122 = arith.constant 0 : index
    %158 = vector.load %arg2[%c22_120, %c0_121, %c0_122] : memref<27x8x4xbf16, #tpu.memory_space<vmem>>, vector<1x8x4xbf16>
    %159 = vector.shape_cast %158 : vector<1x8x4xbf16> to vector<8x4xbf16>
    %cst_123 = arith.constant dense<0.000000e+00> : vector<8x1024xf32>
    %160 = tpu.matmul %159, %157, %cst_123 {dimension_numbers = #tpu.dot_dimension_numbers<[1], [0], [0], [1], [0, 0, 1, 1], [], []>} : vector<8x4xbf16>, vector<4x1024xbf16>, vector<8x1024xf32> -> vector<8x1024xf32>
    %161 = arith.addf %154, %160 : vector<8x1024xf32>
    %c0_124 = arith.constant 0 : index
    %c0_125 = arith.constant 0 : index
    %c212 = arith.constant 212 : index
    %162 = vector.load %arg1[%c0_124, %c0_125, %c212] : memref<1x4x1280xf32, #tpu.memory_space<vmem>>, vector<1x4x1024xf32>
    %163 = vector.shape_cast %162 : vector<1x4x1024xf32> to vector<4x1024xf32>
    %164 = arith.truncf %163 : vector<4x1024xf32> to vector<4x1024xbf16>
    %c23 = arith.constant 23 : index
    %c0_126 = arith.constant 0 : index
    %c0_127 = arith.constant 0 : index
    %165 = vector.load %arg2[%c23, %c0_126, %c0_127] : memref<27x8x4xbf16, #tpu.memory_space<vmem>>, vector<1x8x4xbf16>
    %166 = vector.shape_cast %165 : vector<1x8x4xbf16> to vector<8x4xbf16>
    %cst_128 = arith.constant dense<0.000000e+00> : vector<8x1024xf32>
    %167 = tpu.matmul %166, %164, %cst_128 {dimension_numbers = #tpu.dot_dimension_numbers<[1], [0], [0], [1], [0, 0, 1, 1], [], []>} : vector<8x4xbf16>, vector<4x1024xbf16>, vector<8x1024xf32> -> vector<8x1024xf32>
    %168 = arith.addf %161, %167 : vector<8x1024xf32>
    %c0_129 = arith.constant 0 : index
    %c0_130 = arith.constant 0 : index
    %c220 = arith.constant 220 : index
    %169 = vector.load %arg1[%c0_129, %c0_130, %c220] : memref<1x4x1280xf32, #tpu.memory_space<vmem>>, vector<1x4x1024xf32>
    %170 = vector.shape_cast %169 : vector<1x4x1024xf32> to vector<4x1024xf32>
    %171 = arith.truncf %170 : vector<4x1024xf32> to vector<4x1024xbf16>
    %c24 = arith.constant 24 : index
    %c0_131 = arith.constant 0 : index
    %c0_132 = arith.constant 0 : index
    %172 = vector.load %arg2[%c24, %c0_131, %c0_132] : memref<27x8x4xbf16, #tpu.memory_space<vmem>>, vector<1x8x4xbf16>
    %173 = vector.shape_cast %172 : vector<1x8x4xbf16> to vector<8x4xbf16>
    %cst_133 = arith.constant dense<0.000000e+00> : vector<8x1024xf32>
    %174 = tpu.matmul %173, %171, %cst_133 {dimension_numbers = #tpu.dot_dimension_numbers<[1], [0], [0], [1], [0, 0, 1, 1], [], []>} : vector<8x4xbf16>, vector<4x1024xbf16>, vector<8x1024xf32> -> vector<8x1024xf32>
    %175 = arith.addf %168, %174 : vector<8x1024xf32>
    %c0_134 = arith.constant 0 : index
    %c0_135 = arith.constant 0 : index
    %c221 = arith.constant 221 : index
    %176 = vector.load %arg1[%c0_134, %c0_135, %c221] : memref<1x4x1280xf32, #tpu.memory_space<vmem>>, vector<1x4x1024xf32>
    %177 = vector.shape_cast %176 : vector<1x4x1024xf32> to vector<4x1024xf32>
    %178 = arith.truncf %177 : vector<4x1024xf32> to vector<4x1024xbf16>
    %c25 = arith.constant 25 : index
    %c0_136 = arith.constant 0 : index
    %c0_137 = arith.constant 0 : index
    %179 = vector.load %arg2[%c25, %c0_136, %c0_137] : memref<27x8x4xbf16, #tpu.memory_space<vmem>>, vector<1x8x4xbf16>
    %180 = vector.shape_cast %179 : vector<1x8x4xbf16> to vector<8x4xbf16>
    %cst_138 = arith.constant dense<0.000000e+00> : vector<8x1024xf32>
    %181 = tpu.matmul %180, %178, %cst_138 {dimension_numbers = #tpu.dot_dimension_numbers<[1], [0], [0], [1], [0, 0, 1, 1], [], []>} : vector<8x4xbf16>, vector<4x1024xbf16>, vector<8x1024xf32> -> vector<8x1024xf32>
    %182 = arith.addf %175, %181 : vector<8x1024xf32>
    %c0_139 = arith.constant 0 : index
    %c0_140 = arith.constant 0 : index
    %c222 = arith.constant 222 : index
    %183 = vector.load %arg1[%c0_139, %c0_140, %c222] : memref<1x4x1280xf32, #tpu.memory_space<vmem>>, vector<1x4x1024xf32>
    %184 = vector.shape_cast %183 : vector<1x4x1024xf32> to vector<4x1024xf32>
    %185 = arith.truncf %184 : vector<4x1024xf32> to vector<4x1024xbf16>
    %c26 = arith.constant 26 : index
    %c0_141 = arith.constant 0 : index
    %c0_142 = arith.constant 0 : index
    %186 = vector.load %arg2[%c26, %c0_141, %c0_142] : memref<27x8x4xbf16, #tpu.memory_space<vmem>>, vector<1x8x4xbf16>
    %187 = vector.shape_cast %186 : vector<1x8x4xbf16> to vector<8x4xbf16>
    %cst_143 = arith.constant dense<0.000000e+00> : vector<8x1024xf32>
    %188 = tpu.matmul %187, %185, %cst_143 {dimension_numbers = #tpu.dot_dimension_numbers<[1], [0], [0], [1], [0, 0, 1, 1], [], []>} : vector<8x4xbf16>, vector<4x1024xbf16>, vector<8x1024xf32> -> vector<8x1024xf32>
    %189 = arith.addf %182, %188 : vector<8x1024xf32>
    %190 = arith.index_cast %arg0 : i32 to index
    %c0_144 = arith.constant 0 : index
    %c0_145 = arith.constant 0 : index
    %191 = vector.load %arg6[%190, %c0_144, %c0_145] : memref<2x8x1024xf32, #tpu.memory_space<vmem>>, vector<1x8x1024xf32>
    %192 = vector.shape_cast %191 : vector<1x8x1024xf32> to vector<8x1024xf32>
    %193 = vector.shape_cast %189 : vector<8x1024xf32> to vector<1x8x1024xf32>
    tpu.vector_store %arg6[%190, %c0_144, %c0_145], %193 {strides = array<i32>} : memref<2x8x1024xf32, #tpu.memory_space<vmem>>, vector<1x8x1024xf32>,
    %c1_i32 = arith.constant 1 : i32
    %194 = arith.cmpi eq, %arg0, %c1_i32 : i32
    %195 = arith.extui %194 : i1 to i32
    %c0_i32 = arith.constant 0 : i32
    %196 = arith.cmpi ne, %195, %c0_i32 : i32
    scf.if %196 {
      %c0_146 = arith.constant 0 : index
      %c0_147 = arith.constant 0 : index
      %c0_148 = arith.constant 0 : index
      %197 = vector.load %arg6[%c0_146, %c0_147, %c0_148] : memref<2x8x1024xf32, #tpu.memory_space<vmem>>, vector<2x8x1024xf32>
      %c0_149 = arith.constant 0 : index
      %c0_150 = arith.constant 0 : index
      %198 = vector.load %arg3[%c0_149, %c0_150] : memref<1x1024xf32, #tpu.memory_space<vmem>>, vector<1x1024xf32>
      %199 = vector.shape_cast %198 : vector<1x1024xf32> to vector<1x1x1024xf32>
      %200 = vector.broadcast %199 : vector<1x1x1024xf32> to vector<2x8x1024xf32>
      %201 = arith.mulf %197, %200 : vector<2x8x1024xf32>
      %cst_151 = arith.constant dense<0.000000e+00> : vector<2x8xf32>
      %202 = vector.multi_reduction <add>, %201, %cst_151 [2] : vector<2x8x1024xf32> to vector<2x8xf32>
      %203 = vector.shape_cast %202 : vector<2x8xf32> to vector<2x8x1xf32>
      %cst_152 = arith.constant dense<0.000000e+00> : vector<8x1xf32>
      %204 = vector.multi_reduction <add>, %203, %cst_152 [0] : vector<2x8x1xf32> to vector<8x1xf32>
      %205 = vector.shape_cast %204 : vector<8x1xf32> to vector<1x8x1xf32>
      %206 = arith.mulf %201, %197 : vector<2x8x1024xf32>
      %cst_153 = arith.constant dense<0.000000e+00> : vector<2x8xf32>
      %207 = vector.multi_reduction <add>, %206, %cst_153 [2] : vector<2x8x1024xf32> to vector<2x8xf32>
      %208 = vector.shape_cast %207 : vector<2x8xf32> to vector<2x8x1xf32>
      %cst_154 = arith.constant dense<0.000000e+00> : vector<8x1xf32>
      %209 = vector.multi_reduction <add>, %208, %cst_154 [0] : vector<2x8x1xf32> to vector<8x1xf32>
      %210 = vector.shape_cast %209 : vector<8x1xf32> to vector<1x8x1xf32>
      %cst_155 = arith.constant 9.765625E-4 : f32
      %211 = vector.broadcast %cst_155 : f32 to vector<1x8x1xf32>
      %212 = arith.mulf %205, %211 : vector<1x8x1xf32>
      %cst_156 = arith.constant 9.765625E-4 : f32
      %213 = vector.broadcast %cst_156 : f32 to vector<1x8x1xf32>
      %214 = arith.mulf %210, %213 : vector<1x8x1xf32>
      %215 = arith.mulf %212, %212 : vector<1x8x1xf32>
      %216 = arith.subf %214, %215 : vector<1x8x1xf32>
      %cst_157 = arith.constant 0.000000e+00 : f32
      %217 = vector.broadcast %cst_157 : f32 to vector<1x8x1xf32>
      %218 = arith.maximumf %216, %217 : vector<1x8x1xf32>
      %cst_158 = arith.constant 9.99999974E-6 : f32
      %219 = vector.broadcast %cst_158 : f32 to vector<1x8x1xf32>
      %220 = arith.addf %218, %219 : vector<1x8x1xf32>
      %221 = math.rsqrt %220 : vector<1x8x1xf32>
      %cst_159 = arith.constant 9.99999974E-6 : f32
      %222 = vector.broadcast %cst_159 : f32 to vector<1x8x1xf32>
      %223 = arith.addf %218, %222 : vector<1x8x1xf32>
      %cst_160 = arith.constant 5.000000e-01 : f32
      %224 = vector.broadcast %cst_160 : f32 to vector<1x8x1xf32>
      %225 = arith.mulf %224, %223 : vector<1x8x1xf32>
      %226 = arith.mulf %225, %221 : vector<1x8x1xf32>
      %227 = arith.mulf %226, %221 : vector<1x8x1xf32>
      %cst_161 = arith.constant 1.500000e+00 : f32
      %228 = vector.broadcast %cst_161 : f32 to vector<1x8x1xf32>
      %229 = arith.subf %228, %227 : vector<1x8x1xf32>
      %230 = arith.mulf %221, %229 : vector<1x8x1xf32>
      %c0_162 = arith.constant 0 : index
      %c0_163 = arith.constant 0 : index
      %231 = vector.load %arg4[%c0_162, %c0_163] : memref<8x1xf32, #tpu.memory_space<vmem>>, vector<8x1xf32>
      %232 = vector.shape_cast %231 : vector<8x1xf32> to vector<1x8x1xf32>
      %233 = arith.mulf %232, %230 : vector<1x8x1xf32>
      %c0_164 = arith.constant 0 : index
      %c0_165 = arith.constant 0 : index
      %234 = vector.load %arg5[%c0_164, %c0_165] : memref<8x1xf32, #tpu.memory_space<vmem>>, vector<8x1xf32>
      %235 = vector.shape_cast %234 : vector<8x1xf32> to vector<1x8x1xf32>
      %236 = arith.mulf %212, %233 : vector<1x8x1xf32>
      %237 = arith.subf %235, %236 : vector<1x8x1xf32>
      %238 = vector.broadcast %233 : vector<1x8x1xf32> to vector<2x8x1024xf32>
      %239 = arith.mulf %197, %238 : vector<2x8x1024xf32>
      %240 = vector.broadcast %237 : vector<1x8x1xf32> to vector<2x8x1024xf32>
      %241 = arith.addf %239, %240 : vector<2x8x1024xf32>
      %cst_166 = arith.constant 0.000000e+00 : f32
      %242 = vector.broadcast %cst_166 : f32 to vector<2x8x1024xf32>
      %243 = arith.maximumf %241, %242 : vector<2x8x1024xf32>
      %c0_167 = arith.constant 0 : index
      %c0_168 = arith.constant 0 : index
      %c0_169 = arith.constant 0 : index
      %244 = vector.load %arg6[%c0_167, %c0_168, %c0_169] : memref<2x8x1024xf32, #tpu.memory_space<vmem>>, vector<2x8x1024xf32>
      tpu.vector_store %arg6[%c0_167, %c0_168, %c0_169], %243 {strides = array<i32>} : memref<2x8x1024xf32, #tpu.memory_space<vmem>>, vector<2x8x1024xf32>,
    } else {
    }
    return
  }
  func.func @transform_0(%arg0: i32) -> (i32, i32, i32) {
    %c0_i32 = arith.constant 0 : i32
    %c0_i32_0 = arith.constant 0 : i32
    %c0_i32_1 = arith.constant 0 : i32
    return %arg0, %c0_i32, %c0_i32_0 : i32, i32, i32
  }
  func.func @transform_1(%arg0: i32) -> (i32, i32, i32) {
    %c0_i32 = arith.constant 0 : i32
    %c0_i32_0 = arith.constant 0 : i32
    %c0_i32_1 = arith.constant 0 : i32
    %c0_i32_2 = arith.constant 0 : i32
    return %c0_i32, %c0_i32_0, %c0_i32_1 : i32, i32, i32
  }
  func.func @transform_2(%arg0: i32) -> (i32, i32) {
    %c0_i32 = arith.constant 0 : i32
    %c0_i32_0 = arith.constant 0 : i32
    %c0_i32_1 = arith.constant 0 : i32
    return %c0_i32, %c0_i32_0 : i32, i32
  }
  func.func @transform_3(%arg0: i32) -> (i32, i32) {
    %c0_i32 = arith.constant 0 : i32
    %c0_i32_0 = arith.constant 0 : i32
    %c0_i32_1 = arith.constant 0 : i32
    return %c0_i32, %c0_i32_0 : i32, i32
  }
  func.func @transform_4(%arg0: i32) -> (i32, i32) {
    %c0_i32 = arith.constant 0 : i32
    %c0_i32_0 = arith.constant 0 : i32
    %c0_i32_1 = arith.constant 0 : i32
    return %c0_i32, %c0_i32_0 : i32, i32
  }
  func.func @transform_5(%arg0: i32) -> (i32, i32, i32) {
    %c0_i32 = arith.constant 0 : i32
    %c0_i32_0 = arith.constant 0 : i32
    %c0_i32_1 = arith.constant 0 : i32
    %c0_i32_2 = arith.constant 0 : i32
    return %c0_i32, %c0_i32_0, %c0_i32_1 : i32, i32, i32
  }
}

</mosaic_0001>

<bundles_post_ra>
// kernel: conv3d_bn_relu.1
= control target key start
LH: loop header
LB: loop body
LE: loop exit
PB: predicated region body
PF: predicated region fallthrough
CT: control target
= control target key end

     0   :  { %s8293_s18 = smov 0   ;;  %s9700_s0 = inlined_call_operand.vmem [shape: f32[2,4,1280], index: 0, kind: input, shape index: {}]   ;;  %s9701_s1 = inlined_call_operand.vmem [shape: bf16[27,8,4], index: 1, kind: input, shape index: {}]   ;;  %s9702_s2 = inlined_call_operand.vmem [shape: f32[1,1024], index: 2, kind: input, shape index: {}]   ;;  %s9703_s3 = inlined_call_operand.vmem [shape: f32[8,1], index: 3, kind: input, shape index: {}]   ;;  %s9704_s4 = inlined_call_operand.vmem [shape: f32[8,1], index: 4, kind: input, shape index: {}]   ;;  %s9705_s5 = inlined_call_operand.vmem [shape: f32[2,8,1024], index: 5, kind: output, shape index: {}]  }
   0x1 LB: > { %s8299_s19 = sadd.s32 4294967295, %s8233_s18   ;;  %p7502_p0 = scmp.ge.s32.totalorder %s8233_s18, 1  ;;  %s8233_s18 = sphi %s8293_s18, %s15_s18  }
   0x2   : > { %p182_p1 = scmp.lt.s32.totalorder %s8233_s18, 3 }
   0x4   : > { %p183_p2 = pnand %p7502_p0, %p182_p1 }
   0x5   : > { %p205_p3 = scmp.lt.s32.totalorder (!%p183_p2), %s8299_s19, 1  ;;  %s8235_s25 = smov (!%p183_p2), 127   ;;  %v8236_v10 = vmov (!%p183_p2), 0   ;;  %vm267_vm0 = vcmask (!%p183_p2), 1039360   ;;  %vm280_vm1 = vcmask (!%p183_p2), 1041408   ;;  %vm276_vm2 = vcmask (!%p183_p2), 31744  }
   0x6   : > { %186 = sbr.rel (%p183_p2) target bundleno = 1169 (0x491), region = 40  ;;  %378 = vmatprep.mubr.bf16.mxu1 (!%p183_p2), %v8236_v10  ;;  %337 = vmatprep.mubr.bf16.mxu0 (!%p183_p2), %v8236_v10  ;;  %s8237_s26 = smov (!%p183_p2), 126   ;;  %v7504_v38 = vld [vmem:[%s9701_s1 + $0x4] sm:$0xf] (!%p183_p2)  ;;  %vm715_vm3 = vcmask (!%p183_p2), 1031168   ;;  %vm978_vm4 = vcmask (!%p183_p2), 965632  }
   0x7   : > { %s8238_s27 = smov (!%p183_p2), 118   ;;  %s8239_s28 = smov (!%p183_p2), 117   ;;  %vm1241_vm5 = vcmask (!%p183_p2), 957440   ;;  %vm1504_vm6 = vcmask (!%p183_p2), 949248   ;;  %vm1767_vm7 = vcmask (!%p183_p2), 883712   ;;  %vm2030_vm8 = vcmask (!%p183_p2), 875520  }
   0x8   : > { %s8240_s29 = smov (!%p183_p2), 116   ;;  %s8241_s30 = smov (!%p183_p2), 108   ;;  %vm2293_vm9 = vcmask (!%p183_p2), 867328   ;;  %vm2556_vm10 = vcmask (!%p183_p2), 228352   ;;  %vm2819_vm11 = vcmask (!%p183_p2), 220160   ;;  %vm3082_vm12 = vcmask (!%p183_p2), 211968  }
   0x9   : > { %s8242_s6 = smov (!%p183_p2), 107   ;;  %s8243_s9 = smov (!%p183_p2), 106   ;;  %vm3345_vm13 = vcmask (!%p183_p2), 146432   ;;  %vm3608_vm14 = vcmask (!%p183_p2), 138240   ;;  %vm3871_vm15 = vcmask (!%p183_p2), 130048  }
   0xa   : > { %s8244_s12 = smov (!%p183_p2), 28   ;;  %s8245_s15 = smov (!%p183_p2), 27  }
   0xb   : > { %s8247_s23 = smov (!%p183_p2), 18   ;;  %s8250_s8 = smov (!%p183_p2), 8  }
   0xc   : > { %s8251_s11 = smov (!%p183_p2), 7   ;;  %s8252_s16 = smov (!%p183_p2), 6  }
   0xd   : > { %s206_s20 = scalar_select %p205_p3, %s8299_s19, 1 }
   0xe   : > { %s8253_s17 = smov 56   ;;  %s7751_s13 = sshll.u32 %s8299_s19, 6 }
   0xf   : > { %s8168_s21 = smul.u32 40, %s206_s20  ;;  %s8246_s20 = smov 26  }
  0x10   : > { %p7748_p4 = scmp.ne.s32.totalorder %s8299_s19, 1 }
  0x11   : > { %s8308_s24 = scalar_lea.vmem %s9700_s0, %s8168_s21 }
  0x12   : > { %v212_v0 = vld [vmem:[%s8308_s24 + $0x8] sm:$0xff]  ;;  %v211_v1 = vld [vmem:[%s8308_s24] sm:$0xff]  ;;  %v213_v2 = vld [vmem:[%s8308_s24 + $0x10] sm:$0xff] }
  0x13   : > { %v8313_v3 = vpack.c.bf16 %v212_v0, %v212_v0  ;;  %v220_v4 = vcombine.high %v212_v0, %v212_v0  ;;  %v8315_v5 = vpack.c.bf16 %v211_v1, %v211_v1  ;;  %v8321_v7 = vpack.c.bf16 %v213_v2, %v213_v2  ;;  %v214_v9 = vld [vmem:[%s8308_s24 + $0x18] sm:$0xff]  ;;  %v236_v17 = vld [vmem:[%s8308_s24 + $0x20] sm:$0xf] }
  0x14   : > { %v221_v8 = vcombine.high %v213_v2, %v213_v2  ;;  %v219_v11 = vcombine.high %v211_v1, %v211_v1  ;;  %v8330_v13 = vpack.c.bf16 %v214_v9, %v214_v9  ;;  %v222_v14 = vcombine.high %v214_v9, %v214_v9  ;;  %v664_v19 = vld [vmem:[%s8308_s24 + $0x20] sm:$0xf] }
  0x15   : > { %253 = vrot.lane.b32.xlu1 %v8313_v3, %s8235_s25  ;;  %249 = vrot.lane.b32.xlu0 %v8315_v5, %s8235_s25  ;;  %v8319_v6 = vpack.c.bf16 %v220_v4, %v220_v4  ;;  %v237_v18 = vpack.c.bf16 %v236_v17, %v236_v17  ;;  %v685_v20 = vpack.c.bf16 %v664_v19, %v664_v19  ;;  %v927_v21 = vld [vmem:[%s8308_s24 + $0x20] sm:$0xf]  ;;  %v479_v57 = vsel %vm280_vm1, %v8313_v3, 0 }
  0x16   : > { %v8328_v12 = vpack.c.bf16 %v221_v8, %v221_v8  ;;  %v8334_v15 = vpack.c.bf16 %v222_v14, %v222_v14  ;;  %v8336_v16 = vpack.c.bf16 %v219_v11, %v219_v11  ;;  %v948_v22 = vpack.c.bf16 %v927_v21, %v927_v21  ;;  %v1190_v23 = vld [vmem:[%s8308_s24 + $0x20] sm:$0xf] }
  0x17   : > { %v1211_v24 = vpack.c.bf16 %v1190_v23, %v1190_v23  ;;  %v1453_v25 = vld [vmem:[%s8308_s24 + $0x20] sm:$0xf]  ;;  %v473_v61 = vsel %vm280_vm1, %v8315_v5, 0  ;;  %v491_v1 = vsel %vm280_vm1, %v8330_v13, 0  ;;  %v485_v9 = vsel %vm280_vm1, %v8321_v7, 0 }
  0x18   : > { %v1474_v26 = vpack.c.bf16 %v1453_v25, %v1453_v25  ;;  %v1716_v27 = vld [vmem:[%s8308_s24 + $0x20] sm:$0xf] }
  0x19   : > { %255 = vrot.lane.b32.xlu1 %v8319_v6, %s8235_s25  ;;  %257 = vrot.lane.b32.xlu0 %v8321_v7, %s8235_s25  ;;  %v1737_v28 = vpack.c.bf16 %v1716_v27, %v1716_v27  ;;  %v1979_v33 = vld [vmem:[%s8308_s24 + $0x20] sm:$0xf] }
  0x1a   : > { %v2000_v37 = vpack.c.bf16 %v1979_v33, %v1979_v33  ;;  %v2242_v54 = vld [vmem:[%s8308_s24 + $0x20] sm:$0xf] }
  0x1b   : > { %v2263_v58 = vpack.c.bf16 %v2242_v54, %v2242_v54  ;;  %v235_v0 = vld [vmem:[%s9701_s1] sm:$0xf]  ;;  %v7530_v54 = vld [vmem:[%s9701_s1 + $0xc] sm:$0xf] }
  0x1d   : > { %259 = vrot.lane.b32.xlu1 %v8328_v12, %s8235_s25  ;;  %261 = vrot.lane.b32.xlu0 %v8330_v13, %s8235_s25 }
  0x21   : > { %263 = vrot.lane.b32.xlu1 %v8334_v15, %s8235_s25  ;;  %251 = vrot.lane.b32.xlu0 %v8336_v16, %s8235_s25 }
  0x25   : > { %697 = vrot.lane.b32.xlu1 %v8315_v5, %s8237_s26  ;;  %265 = vrot.lane.b32.xlu0 %v237_v18, %s8235_s25  ;;  %s8254_s25 = smov 55  }
  0x29   : > { %701 = vrot.lane.b32.xlu1 %v8313_v3, %s8237_s26  ;;  %699 = vrot.lane.b32.xlu0 %v8336_v16, %s8237_s26 }
  0x2d   : > { %705 = vrot.lane.b32.xlu1 %v8321_v7, %s8237_s26  ;;  %703 = vrot.lane.b32.xlu0 %v8319_v6, %s8237_s26 }
  0x31   : > { %709 = vrot.lane.b32.xlu1 %v8330_v13, %s8237_s26  ;;  %707 = vrot.lane.b32.xlu0 %v8328_v12, %s8237_s26 }
  0x35   : > { %713 = vrot.lane.b32.xlu1 %v685_v20, %s8237_s26  ;;  %711 = vrot.lane.b32.xlu0 %v8334_v15, %s8237_s26 }
  0x39   : > { %962 = vrot.lane.b32.xlu1 %v8336_v16, %s8238_s27  ;;  %960 = vrot.lane.b32.xlu0 %v8315_v5, %s8238_s27 }
  0x3d   : > { %966 = vrot.lane.b32.xlu1 %v8319_v6, %s8238_s27  ;;  %964 = vrot.lane.b32.xlu0 %v8313_v3, %s8238_s27 }
  0x41   : > { %970 = vrot.lane.b32.xlu1 %v8328_v12, %s8238_s27  ;;  %968 = vrot.lane.b32.xlu0 %v8321_v7, %s8238_s27 }
  0x45   : > { %974 = vrot.lane.b32.xlu1 %v8334_v15, %s8238_s27  ;;  %972 = vrot.lane.b32.xlu0 %v8330_v13, %s8238_s27 }
  0x49   : > { %1223 = vrot.lane.b32.xlu1 %v8315_v5, %s8239_s28  ;;  %976 = vrot.lane.b32.xlu0 %v948_v22, %s8238_s27  ;;  %s8248_s27 = smov 17  }
  0x4d   : > { %1227 = vrot.lane.b32.xlu1 %v8313_v3, %s8239_s28  ;;  %1225 = vrot.lane.b32.xlu0 %v8336_v16, %s8239_s28 }
  0x51   : > { %1231 = vrot.lane.b32.xlu1 %v8321_v7, %s8239_s28  ;;  %1229 = vrot.lane.b32.xlu0 %v8319_v6, %s8239_s28 }
  0x55   : > { %1235 = vrot.lane.b32.xlu1 %v8330_v13, %s8239_s28  ;;  %1233 = vrot.lane.b32.xlu0 %v8328_v12, %s8239_s28 }
  0x59   : > { %1239 = vrot.lane.b32.xlu1 %v1211_v24, %s8239_s28  ;;  %1237 = vrot.lane.b32.xlu0 %v8334_v15, %s8239_s28  ;;  %v2505_v24 = vld [vmem:[%s8308_s24 + $0x20] sm:$0xf]  ;;  %s8255_s28 = smov 54  }
  0x5a   : > { %v2526_v27 = vpack.c.bf16 %v2505_v24, %v2505_v24 }
  0x5d   : > { %1488 = vrot.lane.b32.xlu1 %v8336_v16, %s8240_s29  ;;  %1486 = vrot.lane.b32.xlu0 %v8315_v5, %s8240_s29 }
  0x61   : > { %1492 = vrot.lane.b32.xlu1 %v8319_v6, %s8240_s29  ;;  %1490 = vrot.lane.b32.xlu0 %v8313_v3, %s8240_s29 }
  0x65   : > { %1496 = vrot.lane.b32.xlu1 %v8328_v12, %s8240_s29  ;;  %1494 = vrot.lane.b32.xlu0 %v8321_v7, %s8240_s29 }
  0x69   : > { %1500 = vrot.lane.b32.xlu1 %v8334_v15, %s8240_s29  ;;  %1498 = vrot.lane.b32.xlu0 %v8330_v13, %s8240_s29 }
  0x6d   : > { %1749 = vrot.lane.b32.xlu1 %v8315_v5, %s8241_s30  ;;  %1502 = vrot.lane.b32.xlu0 %v1474_v26, %s8240_s29 }
  0x71   : > { %1753 = vrot.lane.b32.xlu1 %v8313_v3, %s8241_s30  ;;  %1751 = vrot.lane.b32.xlu0 %v8336_v16, %s8241_s30 }
  0x75   : > { %1757 = vrot.lane.b32.xlu1 %v8321_v7, %s8241_s30  ;;  %1755 = vrot.lane.b32.xlu0 %v8319_v6, %s8241_s30 }
  0x79   : > { %1761 = vrot.lane.b32.xlu1 %v8330_v13, %s8241_s30  ;;  %1759 = vrot.lane.b32.xlu0 %v8328_v12, %s8241_s30 }
  0x7d   : > { %1765 = vrot.lane.b32.xlu1 %v1737_v28, %s8241_s30  ;;  %1763 = vrot.lane.b32.xlu0 %v8334_v15, %s8241_s30  ;;  %s8249_s30 = smov 16  }
  0x81   : > { %2014 = vrot.lane.b32.xlu1 %v8336_v16, %s8242_s6  ;;  %2012 = vrot.lane.b32.xlu0 %v8315_v5, %s8242_s6 }
  0x85   : > { %2018 = vrot.lane.b32.xlu1 %v8319_v6, %s8242_s6  ;;  %2016 = vrot.lane.b32.xlu0 %v8313_v3, %s8242_s6 }
  0x87   : > { %v254_v29 = vpop.permute.xlu1 %253  ;;  %v250_v30 = vpop.permute.xlu0 %249 }
  0x89   : > { %2022 = vrot.lane.b32.xlu1 %v8328_v12, %s8242_s6  ;;  %2020 = vrot.lane.b32.xlu0 %v8321_v7, %s8242_s6 }
  0x8b   : > { %v256_v31 = vpop.permute.xlu1 %255  ;;  %v258_v32 = vpop.permute.xlu0 %257 }
  0x8c   : > { %v271_v34 = vsel %vm267_vm0, %v256_v31, %v258_v32  ;;  %v270_v35 = vsel %vm267_vm0, %v254_v29, %v256_v31  ;;  %v7521_v31 = vld [vmem:[%s9701_s1 + $0x8] sm:$0xf] }
  0x8d   : > { %2026 = vrot.lane.b32.xlu1 %v8334_v15, %s8242_s6  ;;  %7507 = vmatprep.subr.msk.bf16.mxu1 %vm280_vm1, %v271_v34  ;;  %v288_v36 = vsel %vm280_vm1, %v270_v35, 0 }
  0x8e   : > { %2024 = vrot.lane.b32.xlu0 %v8330_v13, %s8242_s6  ;;  %347 = vmatpush1.bf16.msra.mxu1 %v288_v36 }
  0x8f   : > { %v260_v39 = vpop.permute.xlu1 %259  ;;  %v262_v40 = vpop.permute.xlu0 %261 }
  0x90   : > { %v273_v46 = vsel %vm267_vm0, %v260_v39, %v262_v40  ;;  %v272_v47 = vsel %vm267_vm0, %v258_v32, %v260_v39 }
  0x91   : > { %2275 = vrot.lane.b32.xlu1 %v8315_v5, %s8243_s9  ;;  %7508 = vmatmul.mubr.msk.bf16.vlgmr.msra.gmra.mrb[0].mxu1 %vm276_vm2, %v7504_v38  ;;  %v294_v52 = vsel %vm280_vm1, %v272_v47, 0 }
  0x92   : > { %2028 = vrot.lane.b32.xlu0 %v2000_v37, %s8242_s6  ;;  %460 = vmatprep.mubr.bf16.mxu1 %v8236_v10  ;;  %s8256_s6 = smov 46  }
  0x93   : > { %v264_v41 = vpop.permute.xlu1 %263  ;;  %v252_v42 = vpop.permute.xlu0 %251 }
  0x94   : > { %v269_v43 = vsel %vm267_vm0, %v252_v42, %v254_v29  ;;  %v268_v44 = vsel %vm267_vm0, %v250_v30, %v252_v42  ;;  %v274_v48 = vsel %vm267_vm0, %v262_v40, %v264_v41 }
  0x95   : > { %2279 = vrot.lane.b32.xlu1 %v8313_v3, %s8243_s9  ;;  %7505 = vmatprep.subr.msk.bf16.mxu0 %vm280_vm1, %v269_v43  ;;  %v282_v45 = vsel %vm280_vm1, %v268_v44, 0  ;;  %v300_v53 = vsel %vm280_vm1, %v274_v48, 0 }
  0x96   : > { %2277 = vrot.lane.b32.xlu0 %v8336_v16, %s8243_s9  ;;  %306 = vmatpush1.bf16.msra.mxu0 %v282_v45  ;;  %v2768_v45 = vld [vmem:[%s8308_s24 + $0x20] sm:$0xf] }
  0x97   : > { %v8417_v49 = vpop.permute.xlu1 %697  ;;  %7509 = vmatprep.subr.msk.bf16.mxu0 %vm280_vm1, %v273_v46  ;;  %v266_v50 = vpop.permute.xlu0 %265 }
  0x98   : > { %v275_v51 = vsel %vm267_vm0, %v264_v41, %v266_v50  ;;  %vm4134_vm0 = vcmask 64512  }
  0x99   : > { %2283 = vrot.lane.b32.xlu1 %v8321_v7, %s8243_s9  ;;  %7506 = vmatmul.mubr.msk.bf16.vlgmr.msra.gmra.mrb[0].mxu0 %vm276_vm2, %v7504_v38 }
  0x9a   : > { %2281 = vrot.lane.b32.xlu0 %v8319_v6, %s8243_s9  ;;  %7511 = vmatprep.subr.msk.bf16.mxu1 %vm280_vm1, %v275_v51 }
  0x9b   : > { %388 = vmatpush1.bf16.msra.mxu0 %v294_v52  ;;  %429 = vmatpush1.bf16.msra.mxu1 %v300_v53  ;;  %v702_v55 = vpop.permute.xlu1 %701  ;;  %v700_v56 = vpop.permute.xlu0 %699 }
  0x9c   : > { %419 = vmatprep.mubr.bf16.mxu0 %v8236_v10  ;;  %7515 = vmatprep.subr.msk.bf16.mxu1 %vm280_vm1, %v8319_v6  ;;  %v717_v11 = vsel %vm715_vm3, %v700_v56, %v702_v55  ;;  %v716_v19 = vsel %vm715_vm3, %v8417_v49, %v700_v56  ;;  %v2789_v49 = vpack.c.bf16 %v2768_v45, %v2768_v45 }
  0x9d   : > { %2287 = vrot.lane.b32.xlu1 %v8330_v13, %s8243_s9  ;;  %7513 = vmatprep.subr.msk.bf16.mxu0 %vm280_vm1, %v8336_v16  ;;  %v728_v25 = vsel %vm280_vm1, %v716_v19, 0 }
  0x9e   : > { %2285 = vrot.lane.b32.xlu0 %v8328_v12, %s8243_s9  ;;  %7512 = vmatmul.mubr.msk.bf16.vlgmr.msra.gmra.mrb[4].mxu1 %vm276_vm2, %v7504_v38 }
  0x9f   : > { %v8442_v59 = vpop.permute.xlu1 %705  ;;  %v704_v60 = vpop.permute.xlu0 %703  ;;  %538 = vmatpush1.bf16.msra.mxu1 %v479_v57  ;;  %569 = vmatprep.mubr.bf16.mxu1 %v8236_v10 }
  0xa0   : > { %7519 = vmatprep.subr.msk.bf16.mxu1 %vm280_vm1, %v8334_v15  ;;  %v719_v2 = vsel %vm715_vm3, %v704_v60, %v8442_v59  ;;  %v718_v14 = vsel %vm715_vm3, %v702_v55, %v704_v60 }
  0xa1   : > { %2291 = vrot.lane.b32.xlu1 %v2263_v58, %s8243_s9  ;;  %7510 = vmatmul.mubr.msk.bf16.vlgmr.msra.gmra.mrb[4].mxu0 %vm276_vm2, %v7504_v38  ;;  %v734_v20 = vsel %vm280_vm1, %v718_v14, 0 }
  0xa2   : > { %2289 = vrot.lane.b32.xlu0 %v8334_v15, %s8243_s9  ;;  %497 = vmatpush1.bf16.msra.mxu0 %v473_v61  ;;  %s8257_s9 = smov 45  }
  0xa3   : > { %v710_v62 = vpop.permute.xlu1 %709  ;;  %v708_v63 = vpop.permute.xlu0 %707  ;;  %528 = vmatprep.mubr.bf16.mxu0 %v8236_v10  ;;  %7517 = vmatprep.subr.msk.bf16.mxu0 %vm280_vm1, %v8328_v12 }
  0xa4   : > { %v721_v26 = vsel %vm715_vm3, %v708_v63, %v710_v62  ;;  %v720_v33 = vsel %vm715_vm3, %v8442_v59, %v708_v63 }
  0xa5   : > { %2540 = vrot.lane.b32.xlu1 %v8336_v16, %s8244_s12  ;;  %v740_v37 = vsel %vm280_vm1, %v720_v33, 0 }
  0xa6   : > { %2538 = vrot.lane.b32.xlu0 %v8315_v5, %s8244_s12  ;;  %7516 = vmatmul.mubr.msk.bf16.vlgmr.msra.gmra.mrb[0].mxu1 %vm276_vm2, %v235_v0 }
  0xa7   : > { %620 = vmatpush1.bf16.msra.mxu1 %v491_v1  ;;  %v714_v4 = vpop.permute.xlu1 %713  ;;  %v712_v8 = vpop.permute.xlu0 %711  ;;  %651 = vmatprep.mubr.bf16.mxu1 %v8236_v10 }
  0xa8   : > { %7524 = vmatprep.subr.msk.bf16.mxu1 %vm280_vm1, %v719_v2  ;;  %v723_v21 = vsel %vm715_vm3, %v712_v8, %v714_v4  ;;  %v722_v28 = vsel %vm715_vm3, %v710_v62, %v712_v8  ;;  %vm4397_vm3 = vcmask 56320  }
  0xa9   : > { %2544 = vrot.lane.b32.xlu1 %v8319_v6, %s8244_s12  ;;  %7514 = vmatmul.mubr.msk.bf16.vlgmr.msra.gmra.mrb[0].mxu0 %vm276_vm2, %v235_v0  ;;  %v746_v34 = vsel %vm280_vm1, %v722_v28, 0 }
  0xaa   : > { %2542 = vrot.lane.b32.xlu0 %v8313_v3, %s8244_s12  ;;  %579 = vmatpush1.bf16.msra.mxu0 %v485_v9 }
  0xab   : > { %7522 = vmatprep.subr.msk.bf16.mxu0 %vm280_vm1, %v717_v11  ;;  %v963_v17 = vpop.permute.xlu1 %962  ;;  %v961_v18 = vpop.permute.xlu0 %960  ;;  %610 = vmatprep.mubr.bf16.mxu0 %v8236_v10 }
  0xac   : > { %v979_v43 = vsel %vm978_vm4, %v961_v18, %v963_v17 }
  0xad   : > { %2548 = vrot.lane.b32.xlu1 %v8328_v12, %s8244_s12  ;;  %v991_v48 = vsel %vm280_vm1, %v979_v43, 0 }
  0xae   : > { %2546 = vrot.lane.b32.xlu0 %v8321_v7, %s8244_s12  ;;  %7520 = vmatmul.mubr.msk.bf16.vlgmr.msra.gmra.mrb[4].mxu1 %vm276_vm2, %v235_v0 }
  0xaf   : > { %793 = vmatpush1.bf16.msra.mxu1 %v734_v20  ;;  %v967_v22 = vpop.permute.xlu1 %966  ;;  %v965_v23 = vpop.permute.xlu0 %964  ;;  %824 = vmatprep.mubr.bf16.mxu1 %v8236_v10  ;;  %v7539_v20 = vld [vmem:[%s9701_s1 + $0x10] sm:$0xf] }
  0xb0   : > { %7528 = vmatprep.subr.msk.bf16.mxu1 %vm280_vm1, %v723_v21  ;;  %v980_v38 = vsel %vm978_vm4, %v963_v17, %v965_v23  ;;  %v981_v39 = vsel %vm978_vm4, %v965_v23, %v967_v22  ;;  %v3031_v21 = vld [vmem:[%s8308_s24 + $0x20] sm:$0xf] }
  0xb1   : > { %2552 = vrot.lane.b32.xlu1 %v8334_v15, %s8244_s12  ;;  %7518 = vmatmul.mubr.msk.bf16.vlgmr.msra.gmra.mrb[4].mxu0 %vm276_vm2, %v235_v0  ;;  %v997_v44 = vsel %vm280_vm1, %v981_v39, 0  ;;  %v3052_v24 = vpack.c.bf16 %v3031_v21, %v3031_v21  ;;  %v3553_v39 = vld [vmem:[%s8308_s24] sm:$0xff] }
  0xb2   : > { %2550 = vrot.lane.b32.xlu0 %v8330_v13, %s8244_s12  ;;  %752 = vmatpush1.bf16.msra.mxu0 %v728_v25  ;;  %v3562_v43 = vcombine.high %v3553_v39, %v3553_v39 }
  0xb3   : > { %7526 = vmatprep.subr.msk.bf16.mxu0 %vm280_vm1, %v721_v26  ;;  %v971_v29 = vpop.permute.xlu1 %970  ;;  %v969_v30 = vpop.permute.xlu0 %968  ;;  %783 = vmatprep.mubr.bf16.mxu0 %v8236_v10 }
  0xb4   : > { %v982_v32 = vsel %vm978_vm4, %v967_v22, %v969_v30  ;;  %v983_v56 = vsel %vm978_vm4, %v969_v30, %v971_v29 }
  0xb5   : > { %2801 = vrot.lane.b32.xlu1 %v8315_v5, %s8245_s15  ;;  %v1003_v60 = vsel %vm280_vm1, %v983_v56, 0 }
  0xb6   : > { %2554 = vrot.lane.b32.xlu0 %v2526_v27, %s8244_s12  ;;  %7525 = vmatmul.mubr.msk.bf16.vlgmr.msra.gmra.mrb[0].mxu1 %vm276_vm2, %v7521_v31  ;;  %s8258_s12 = smov 44  }
  0xb7   : > { %875 = vmatpush1.bf16.msra.mxu1 %v746_v34  ;;  %v975_v35 = vpop.permute.xlu1 %974  ;;  %v973_v36 = vpop.permute.xlu0 %972  ;;  %906 = vmatprep.mubr.bf16.mxu1 %v8236_v10 }
  0xb8   : > { %7533 = vmatprep.subr.msk.bf16.mxu1 %vm280_vm1, %v982_v32  ;;  %v984_v50 = vsel %vm978_vm4, %v971_v29, %v973_v36  ;;  %v985_v51 = vsel %vm978_vm4, %v973_v36, %v975_v35  ;;  %v3293_v32 = vld [vmem:[%s8308_s24 + $0x18] sm:$0xff] }
  0xb9   : > { %2805 = vrot.lane.b32.xlu1 %v8313_v3, %s8245_s15  ;;  %7523 = vmatmul.mubr.msk.bf16.vlgmr.msra.gmra.mrb[0].mxu0 %vm276_vm2, %v7521_v31  ;;  %v1009_v57 = vsel %vm280_vm1, %v985_v51, 0  ;;  %v8655_v51 = vpack.c.bf16 %v3562_v43, %v3562_v43 }
  0xba   : > { %2803 = vrot.lane.b32.xlu0 %v8336_v16, %s8245_s15  ;;  %834 = vmatpush1.bf16.msra.mxu0 %v740_v37  ;;  %v3294_v37 = vld [vmem:[%s8308_s24 + $0x20] sm:$0xf] }
  0xbb   : > { %7531 = vmatprep.subr.msk.bf16.mxu0 %vm280_vm1, %v980_v38  ;;  %v1224_v40 = vpop.permute.xlu1 %1223  ;;  %v977_v41 = vpop.permute.xlu0 %976  ;;  %865 = vmatprep.mubr.bf16.mxu0 %v8236_v10  ;;  %v3302_v38 = vcombine.high %v3293_v32, %v3293_v32 }
  0xbc   : > { %v986_v42 = vsel %vm978_vm4, %v975_v35, %v977_v41  ;;  %vm4660_vm4 = vcmask 48128  }
  0xbd   : > { %2809 = vrot.lane.b32.xlu1 %v8321_v7, %s8245_s15 }
  0xbe   : > { %2807 = vrot.lane.b32.xlu0 %v8319_v6, %s8245_s15  ;;  %7529 = vmatmul.mubr.msk.bf16.vlgmr.msra.gmra.mrb[4].mxu1 %vm276_vm2, %v7521_v31 }
  0xbf   : > { %1056 = vmatpush1.bf16.msra.mxu1 %v997_v44  ;;  %v1228_v46 = vpop.permute.xlu1 %1227  ;;  %v1226_v47 = vpop.permute.xlu0 %1225  ;;  %1087 = vmatprep.mubr.bf16.mxu1 %v8236_v10 }
  0xc0   : > { %7537 = vmatprep.subr.msk.bf16.mxu1 %vm280_vm1, %v986_v42  ;;  %v1243_v61 = vsel %vm1241_vm5, %v1226_v47, %v1228_v46  ;;  %v1242_v2 = vsel %vm1241_vm5, %v1224_v40, %v1226_v47  ;;  %v7548_v42 = vld [vmem:[%s9701_s1 + $0x14] sm:$0xf]  ;;  %v3554_v47 = vld [vmem:[%s8308_s24 + $0x8] sm:$0xff] }
  0xc1   : > { %2813 = vrot.lane.b32.xlu1 %v8330_v13, %s8245_s15  ;;  %7527 = vmatmul.mubr.msk.bf16.vlgmr.msra.gmra.mrb[4].mxu0 %vm276_vm2, %v7521_v31  ;;  %v1254_v11 = vsel %vm280_vm1, %v1242_v2, 0 }
  0xc2   : > { %2811 = vrot.lane.b32.xlu0 %v8328_v12, %s8245_s15  ;;  %1015 = vmatpush1.bf16.msra.mxu0 %v991_v48 }
  0xc3   : > { %7535 = vmatprep.subr.msk.bf16.mxu0 %vm280_vm1, %v984_v50  ;;  %v1232_v52 = vpop.permute.xlu1 %1231  ;;  %v1230_v53 = vpop.permute.xlu0 %1229  ;;  %1046 = vmatprep.mubr.bf16.mxu0 %v8236_v10 }
  0xc4   : > { %v1245_v55 = vsel %vm1241_vm5, %v1230_v53, %v1232_v52  ;;  %v1244_v62 = vsel %vm1241_vm5, %v1228_v46, %v1230_v53  ;;  %v8647_v46 = vpack.c.bf16 %v3302_v38, %v3302_v38 }
  0xc5   : > { %2817 = vrot.lane.b32.xlu1 %v2789_v49, %s8245_s15  ;;  %v1260_v4 = vsel %vm280_vm1, %v1244_v62, 0 }
  0xc6   : > { %2815 = vrot.lane.b32.xlu0 %v8334_v15, %s8245_s15  ;;  %7534 = vmatmul.mubr.msk.bf16.vlgmr.msra.gmra.mrb[0].mxu1 %vm276_vm2, %v7530_v54  ;;  %s8259_s15 = smov 36  }
  0xc7   : > { %1138 = vmatpush1.bf16.msra.mxu1 %v1009_v57  ;;  %v1236_v58 = vpop.permute.xlu1 %1235  ;;  %v1234_v59 = vpop.permute.xlu0 %1233  ;;  %1169 = vmatprep.mubr.bf16.mxu1 %v8236_v10 }
  0xc8   : > { %7542 = vmatprep.subr.msk.bf16.mxu1 %vm280_vm1, %v1245_v55  ;;  %v1247_v14 = vsel %vm1241_vm5, %v1234_v59, %v1236_v58  ;;  %v1246_v22 = vsel %vm1241_vm5, %v1232_v52, %v1234_v59  ;;  %v3563_v52 = vcombine.high %v3554_v47, %v3554_v47  ;;  %v3555_v55 = vld [vmem:[%s8308_s24 + $0x10] sm:$0xff] }
  0xc9   : > { %3066 = vrot.lane.b32.xlu1 %v8336_v16, %s8246_s20  ;;  %7532 = vmatmul.mubr.msk.bf16.vlgmr.msra.gmra.mrb[0].mxu0 %vm276_vm2, %v7530_v54 }
  0xca   : > { %3064 = vrot.lane.b32.xlu0 %v8315_v5, %s8246_s20  ;;  %1097 = vmatpush1.bf16.msra.mxu0 %v1003_v60  ;;  %v8669_v59 = vpack.c.bf16 %v3563_v52, %v3563_v52  ;;  %v3564_v60 = vcombine.high %v3555_v55, %v3555_v55 }
  0xcb   : > { %7540 = vmatprep.subr.msk.bf16.mxu0 %vm280_vm1, %v1243_v61  ;;  %v1240_v63 = vpop.permute.xlu1 %1239  ;;  %v1238_v0 = vpop.permute.xlu0 %1237  ;;  %1128 = vmatprep.mubr.bf16.mxu0 %v8236_v10 }
  0xcc   : > { %v1249_v1 = vsel %vm1241_vm5, %v1238_v0, %v1240_v63  ;;  %v1248_v17 = vsel %vm1241_vm5, %v1236_v58, %v1238_v0  ;;  %v8676_v63 = vpack.c.bf16 %v3554_v47, %v3554_v47  ;;  %vm4923_vm5 = vcmask 457728  }
  0xcd   : > { %3070 = vrot.lane.b32.xlu1 %v8319_v6, %s8246_s20  ;;  %v1272_v23 = vsel %vm280_vm1, %v1248_v17, 0 }
  0xce   : > { %3068 = vrot.lane.b32.xlu0 %v8313_v3, %s8246_s20  ;;  %7538 = vmatmul.mubr.msk.bf16.vlgmr.msra.gmra.mrb[4].mxu1 %vm276_vm2, %v7530_v54 }
  0xcf   : > { %1319 = vmatpush1.bf16.msra.mxu1 %v1260_v4  ;;  %v1489_v8 = vpop.permute.xlu1 %1488  ;;  %v1487_v9 = vpop.permute.xlu0 %1486  ;;  %1350 = vmatprep.mubr.bf16.mxu1 %v8236_v10 }
  0xd0   : > { %7546 = vmatprep.subr.msk.bf16.mxu1 %vm280_vm1, %v1249_v1 }
  0xd1   : > { %3074 = vrot.lane.b32.xlu1 %v8328_v12, %s8246_s20  ;;  %7536 = vmatmul.mubr.msk.bf16.vlgmr.msra.gmra.mrb[4].mxu0 %vm276_vm2, %v7530_v54  ;;  %v8660_v54 = vpack.c.bf16 %v3553_v39, %v3553_v39 }
  0xd2   : > { %3072 = vrot.lane.b32.xlu0 %v8321_v7, %s8246_s20  ;;  %1278 = vmatpush1.bf16.msra.mxu0 %v1254_v11  ;;  %v8689_v11 = vpack.c.bf16 %v3555_v55, %v3555_v55 }
  0xd3   : > { %7544 = vmatprep.subr.msk.bf16.mxu0 %vm280_vm1, %v1247_v14  ;;  %v1493_v18 = vpop.permute.xlu1 %1492  ;;  %v1491_v19 = vpop.permute.xlu0 %1490  ;;  %1309 = vmatprep.mubr.bf16.mxu0 %v8236_v10 }
  0xd4   : > { %v1507_v28 = vsel %vm1504_vm6, %v1491_v19, %v1493_v18 }
  0xd5   : > { %3078 = vrot.lane.b32.xlu1 %v8334_v15, %s8246_s20  ;;  %v1506_v15 = vsel %vm1504_vm6, %v1489_v8, %v1491_v19  ;;  %v1523_v31 = vsel %vm280_vm1, %v1507_v28, 0  ;;  %v7557_v19 = vld [vmem:[%s9701_s1 + $0x18] sm:$0xf] }
  0xd6   : > { %3076 = vrot.lane.b32.xlu0 %v8330_v13, %s8246_s20  ;;  %7543 = vmatmul.mubr.msk.bf16.vlgmr.msra.gmra.mrb[0].mxu1 %vm276_vm2, %v7539_v20  ;;  %v1266_v13 = vsel %vm280_vm1, %v1246_v22, 0 }
  0xd7   : > { %1401 = vmatpush1.bf16.msra.mxu1 %v1272_v23  ;;  %v1497_v25 = vpop.permute.xlu1 %1496  ;;  %v1495_v26 = vpop.permute.xlu0 %1494  ;;  %1432 = vmatprep.mubr.bf16.mxu1 %v8236_v10 }
  0xd8   : > { %v1508_v27 = vsel %vm1504_vm6, %v1493_v18, %v1495_v26  ;;  %v1509_v44 = vsel %vm1504_vm6, %v1495_v26, %v1497_v25 }
  0xd9   : > { %3327 = vrot.lane.b32.xlu1 %v8315_v5, %s8247_s23  ;;  %7541 = vmatmul.mubr.msk.bf16.vlgmr.msra.gmra.mrb[0].mxu0 %vm276_vm2, %v7539_v20  ;;  %v1505_v5 = vsel %vm1504_vm6, %v1487_v9, %v1489_v8  ;;  %v8684_v8 = vpack.c.bf16 %v3564_v60, %v3564_v60  ;;  %v7575_v60 = vld [vmem:[%s9701_s1 + $0x20] sm:$0xf] }
  0xda   : > { %3080 = vrot.lane.b32.xlu0 %v3052_v24, %s8246_s20  ;;  %1360 = vmatpush1.bf16.msra.mxu0 %v1266_v13  ;;  %v3557_v24 = vld [vmem:[%s8308_s24 + $0x20] sm:$0xf]  ;;  %s8260_s20 = smov 35  }
  0xdb   : > { %7551 = vmatprep.subr.msk.bf16.mxu1 %vm280_vm1, %v1508_v27  ;;  %7549 = vmatprep.subr.msk.bf16.mxu0 %vm280_vm1, %v1506_v15  ;;  %v1501_v29 = vpop.permute.xlu1 %1500  ;;  %v1499_v30 = vpop.permute.xlu0 %1498  ;;  %v3578_v27 = vpack.c.bf16 %v3557_v24, %v3557_v24 }
  0xdc   : > { %1391 = vmatprep.mubr.bf16.mxu0 %v8236_v10  ;;  %v1510_v36 = vsel %vm1504_vm6, %v1497_v25, %v1499_v30  ;;  %v1511_v40 = vsel %vm1504_vm6, %v1499_v30, %v1501_v29 }
  0xdd   : > { %3331 = vrot.lane.b32.xlu1 %v8313_v3, %s8247_s23  ;;  %v1517_v3 = vsel %vm280_vm1, %v1505_v5, 0  ;;  %v1535_v45 = vsel %vm280_vm1, %v1511_v40, 0  ;;  %v3820_v40 = vld [vmem:[%s8308_s24 + $0x20] sm:$0xf] }
  0xde   : > { %3329 = vrot.lane.b32.xlu0 %v8336_v16, %s8247_s23  ;;  %7547 = vmatmul.mubr.msk.bf16.vlgmr.msra.gmra.mrb[4].mxu1 %vm276_vm2, %v7539_v20  ;;  %v8626_v16 = vpack.c.bf16 %v3293_v32, %v3293_v32 }
  0xdf   : > { %1582 = vmatpush1.bf16.msra.mxu1 %v1523_v31  ;;  %v1750_v33 = vpop.permute.xlu1 %1749  ;;  %v1503_v34 = vpop.permute.xlu0 %1502  ;;  %1613 = vmatprep.mubr.bf16.mxu1 %v8236_v10 }
  0xe0   : > { %v1512_v35 = vsel %vm1504_vm6, %v1501_v29, %v1503_v34  ;;  %vm5186_vm6 = vcmask 449536  }
  0xe1   : > { %3335 = vrot.lane.b32.xlu1 %v8321_v7, %s8247_s23  ;;  %7545 = vmatmul.mubr.msk.bf16.vlgmr.msra.gmra.mrb[4].mxu0 %vm276_vm2, %v7539_v20 }
  0xe2   : > { %3333 = vrot.lane.b32.xlu0 %v8319_v6, %s8247_s23  ;;  %1541 = vmatpush1.bf16.msra.mxu0 %v1517_v3  ;;  %v3315_v6 = vpack.c.bf16 %v3294_v37, %v3294_v37  ;;  %v7566_v37 = vld [vmem:[%s9701_s1 + $0x1c] sm:$0xf] }
  0xe3   : > { %7555 = vmatprep.subr.msk.bf16.mxu1 %vm280_vm1, %v1512_v35  ;;  %7553 = vmatprep.subr.msk.bf16.mxu0 %vm280_vm1, %v1510_v36  ;;  %v1754_v7 = vpop.permute.xlu1 %1753  ;;  %v1752_v41 = vpop.permute.xlu0 %1751 }
  0xe4   : > { %1572 = vmatprep.mubr.bf16.mxu0 %v8236_v10  ;;  %v1769_v53 = vsel %vm1767_vm7, %v1752_v41, %v1754_v7  ;;  %v1768_v61 = vsel %vm1767_vm7, %v1750_v33, %v1752_v41 }
  0xe5   : > { %3339 = vrot.lane.b32.xlu1 %v8626_v16, %s8247_s23  ;;  %v1780_v4 = vsel %vm280_vm1, %v1768_v61, 0 }
  0xe6   : > { %3337 = vrot.lane.b32.xlu0 %v8328_v12, %s8247_s23  ;;  %7552 = vmatmul.mubr.msk.bf16.vlgmr.msra.gmra.mrb[0].mxu1 %vm276_vm2, %v7548_v42  ;;  %v1529_v12 = vsel %vm280_vm1, %v1509_v44, 0  ;;  %v3841_v44 = vpack.c.bf16 %v3820_v40, %v3820_v40 }
  0xe7   : > { %1664 = vmatpush1.bf16.msra.mxu1 %v1535_v45  ;;  %v1758_v48 = vpop.permute.xlu1 %1757  ;;  %v1756_v49 = vpop.permute.xlu0 %1755  ;;  %1695 = vmatprep.mubr.bf16.mxu1 %v8236_v10 }
  0xe8   : > { %v1771_v50 = vsel %vm1767_vm7, %v1756_v49, %v1758_v48  ;;  %v1770_v56 = vsel %vm1767_vm7, %v1754_v7, %v1756_v49 }
  0xe9   : > { %3343 = vrot.lane.b32.xlu1 %v3315_v6, %s8247_s23  ;;  %7550 = vmatmul.mubr.msk.bf16.vlgmr.msra.gmra.mrb[0].mxu0 %vm276_vm2, %v7548_v42  ;;  %v1786_v62 = vsel %vm280_vm1, %v1770_v56, 0 }
  0xea   : > { %3341 = vrot.lane.b32.xlu0 %v8647_v46, %s8247_s23  ;;  %1623 = vmatpush1.bf16.msra.mxu0 %v1529_v12  ;;  %s8261_s23 = smov 34  }
  0xeb   : > { %7560 = vmatprep.subr.msk.bf16.mxu1 %vm280_vm1, %v1771_v50  ;;  %7558 = vmatprep.subr.msk.bf16.mxu0 %vm280_vm1, %v1769_v53  ;;  %v1762_v57 = vpop.permute.xlu1 %1761  ;;  %v1760_v58 = vpop.permute.xlu0 %1759 }
  0xec   : > { %1654 = vmatprep.mubr.bf16.mxu0 %v8236_v10  ;;  %v1773_v9 = vsel %vm1767_vm7, %v1760_v58, %v1762_v57  ;;  %v1772_v20 = vsel %vm1767_vm7, %v1758_v48, %v1760_v58 }
  0xed   : > { %3592 = vrot.lane.b32.xlu1 %v8655_v51, %s8248_s27  ;;  %v1792_v26 = vsel %vm280_vm1, %v1772_v20, 0 }
  0xee   : > { %3590 = vrot.lane.b32.xlu0 %v8660_v54, %s8248_s27  ;;  %7556 = vmatmul.mubr.msk.bf16.vlgmr.msra.gmra.mrb[4].mxu1 %vm276_vm2, %v7548_v42 }
  0xef   : > { %1845 = vmatpush1.bf16.msra.mxu1 %v1786_v62  ;;  %v1766_v0 = vpop.permute.xlu1 %1765  ;;  %v1764_v1 = vpop.permute.xlu0 %1763  ;;  %1876 = vmatprep.mubr.bf16.mxu1 %v8236_v10 }
  0xf0   : > { %v1775_v2 = vsel %vm1767_vm7, %v1764_v1, %v1766_v0  ;;  %v1774_v14 = vsel %vm1767_vm7, %v1762_v57, %v1764_v1  ;;  %vm5449_vm7 = vcmask 441344  }
  0xf1   : > { %3596 = vrot.lane.b32.xlu1 %v8669_v59, %s8248_s27  ;;  %7554 = vmatmul.mubr.msk.bf16.vlgmr.msra.gmra.mrb[4].mxu0 %vm276_vm2, %v7548_v42  ;;  %v1798_v21 = vsel %vm280_vm1, %v1774_v14, 0 }
  0xf2   : > { %3594 = vrot.lane.b32.xlu0 %v8676_v63, %s8248_s27  ;;  %1804 = vmatpush1.bf16.msra.mxu0 %v1780_v4 }
  0xf3   : > { %7564 = vmatprep.subr.msk.bf16.mxu1 %vm280_vm1, %v1775_v2  ;;  %7562 = vmatprep.subr.msk.bf16.mxu0 %vm280_vm1, %v1773_v9  ;;  %v2015_v17 = vpop.permute.xlu1 %2014  ;;  %v2013_v18 = vpop.permute.xlu0 %2012 }
  0xf4   : > { %1835 = vmatprep.mubr.bf16.mxu0 %v8236_v10  ;;  %v2031_v30 = vsel %vm2030_vm8, %v2013_v18, %v2015_v17 }
  0xf5   : > { %3600 = vrot.lane.b32.xlu1 %v8684_v8, %s8248_s27  ;;  %v2043_v33 = vsel %vm280_vm1, %v2031_v30, 0 }
  0xf6   : > { %3598 = vrot.lane.b32.xlu0 %v8689_v11, %s8248_s27  ;;  %7561 = vmatmul.mubr.msk.bf16.vlgmr.msra.gmra.mrb[0].mxu1 %vm276_vm2, %v7557_v19 }
  0xf7   : > { %1927 = vmatpush1.bf16.msra.mxu1 %v1798_v21  ;;  %v2019_v22 = vpop.permute.xlu1 %2018  ;;  %v2017_v23 = vpop.permute.xlu0 %2016  ;;  %1958 = vmatprep.mubr.bf16.mxu1 %v8236_v10 }
  0xf8   : > { %v2032_v25 = vsel %vm2030_vm8, %v2015_v17, %v2017_v23  ;;  %v2033_v13 = vsel %vm2030_vm8, %v2017_v23, %v2019_v22  ;;  %v4083_v17 = vld [vmem:[%s8308_s24 + $0x20] sm:$0xf] }
  0xf9   : > { %3604 = vrot.lane.b32.xlu1 %v8647_v46, %s8248_s27  ;;  %7559 = vmatmul.mubr.msk.bf16.vlgmr.msra.gmra.mrb[0].mxu0 %vm276_vm2, %v7557_v19  ;;  %v2049_v5 = vsel %vm280_vm1, %v2033_v13, 0  ;;  %v4104_v21 = vpack.c.bf16 %v4083_v17, %v4083_v17 }
  0xfa   : > { %3602 = vrot.lane.b32.xlu0 %v8626_v16, %s8248_s27  ;;  %1886 = vmatpush1.bf16.msra.mxu0 %v1792_v26 }
  0xfb   : > { %7567 = vmatprep.subr.msk.bf16.mxu0 %vm280_vm1, %v2032_v25  ;;  %v2023_v15 = vpop.permute.xlu1 %2022  ;;  %v2021_v28 = vpop.permute.xlu0 %2020  ;;  %1917 = vmatprep.mubr.bf16.mxu0 %v8236_v10 }
  0xfc   : > { %v2034_v29 = vsel %vm2030_vm8, %v2019_v22, %v2021_v28  ;;  %v2035_v39 = vsel %vm2030_vm8, %v2021_v28, %v2023_v15  ;;  %v7584_v28 = vld [vmem:[%s9701_s1 + $0x24] sm:$0xf] }
  0xfd   : > { %3853 = vrot.lane.b32.xlu1 %v8660_v54, %s8249_s30  ;;  %7569 = vmatprep.subr.msk.bf16.mxu1 %vm280_vm1, %v2034_v29  ;;  %v2055_v6 = vsel %vm280_vm1, %v2035_v39, 0 }
  0xfe   : > { %3606 = vrot.lane.b32.xlu0 %v3578_v27, %s8248_s27  ;;  %7565 = vmatmul.mubr.msk.bf16.vlgmr.msra.gmra.mrb[4].mxu1 %vm276_vm2, %v7557_v19 }
  0xff   : > { %2108 = vmatpush1.bf16.msra.mxu1 %v2049_v5  ;;  %v2027_v31 = vpop.permute.xlu1 %2026  ;;  %2139 = vmatprep.mubr.bf16.mxu1 %v8236_v10 }
 0x100   : > { %v2025_v32 = vpop.permute.xlu0 %2024 }
 0x101   : > { %3857 = vrot.lane.b32.xlu1 %v8676_v63, %s8249_s30  ;;  %7563 = vmatmul.mubr.msk.bf16.vlgmr.msra.gmra.mrb[4].mxu0 %vm276_vm2, %v7557_v19  ;;  %v2036_v34 = vsel %vm2030_vm8, %v2023_v15, %v2025_v32  ;;  %v2037_v3 = vsel %vm2030_vm8, %v2025_v32, %v2027_v31 }
 0x102   : > { %3855 = vrot.lane.b32.xlu0 %v8655_v51, %s8249_s30  ;;  %2067 = vmatpush1.bf16.msra.mxu0 %v2043_v33  ;;  %v2061_v7 = vsel %vm280_vm1, %v2037_v3, 0 }
 0x103   : > { %7571 = vmatprep.subr.msk.bf16.mxu0 %vm280_vm1, %v2036_v34  ;;  %v2276_v35 = vpop.permute.xlu1 %2275  ;;  %2098 = vmatprep.mubr.bf16.mxu0 %v8236_v10 }
 0x104   : > { %v2029_v36 = vpop.permute.xlu0 %2028 }
 0x105   : > { %v2038_v38 = vsel %vm2030_vm8, %v2027_v31, %v2029_v36  ;;  %3861 = vrot.lane.b32.xlu1 %v8689_v11, %s8249_s30  ;;  %vm5712_vm8 = vcmask 375808  }
 0x106   : > { %3859 = vrot.lane.b32.xlu0 %v8669_v59, %s8249_s30  ;;  %7573 = vmatprep.subr.msk.bf16.mxu1 %vm280_vm1, %v2038_v38 }
 0x107   : > { %7570 = vmatmul.mubr.msk.bf16.vlgmr.msra.gmra.mrb[0].mxu1 %vm276_vm2, %v7566_v37  ;;  %v2280_v41 = vpop.permute.xlu1 %2279 }
 0x108   : > { %2190 = vmatpush1.bf16.msra.mxu1 %v2061_v7  ;;  %v2278_v42 = vpop.permute.xlu0 %2277  ;;  %2221 = vmatprep.mubr.bf16.mxu1 %v8236_v10 }
 0x109   : > { %3865 = vrot.lane.b32.xlu1 %v8626_v16, %s8249_s30  ;;  %7568 = vmatmul.mubr.msk.bf16.vlgmr.msra.gmra.mrb[0].mxu0 %vm276_vm2, %v7566_v37  ;;  %v2295_v43 = vsel %vm2293_vm9, %v2278_v42, %v2280_v41  ;;  %v2294_v50 = vsel %vm2293_vm9, %v2276_v35, %v2278_v42  ;;  %v4346_v35 = vld [vmem:[%s8308_s24 + $0x20] sm:$0xf] }
 0x10a   : > { %3863 = vrot.lane.b32.xlu0 %v8684_v8, %s8249_s30  ;;  %2149 = vmatpush1.bf16.msra.mxu0 %v2055_v6  ;;  %v2306_v55 = vsel %vm280_vm1, %v2294_v50, 0  ;;  %v4367_v39 = vpack.c.bf16 %v4346_v35, %v4346_v35  ;;  %v4872_v35 = vld [vmem:[%s8308_s24 + $0x24] sm:$0xf] }
 0x10b   : > { %7576 = vmatprep.subr.msk.bf16.mxu0 %vm280_vm1, %v2295_v43  ;;  %v2284_v45 = vpop.permute.xlu1 %2283  ;;  %2180 = vmatprep.mubr.bf16.mxu0 %v8236_v10 }
 0x10c   : > { %v2282_v47 = vpop.permute.xlu0 %2281 }
 0x10d   : > { %v2296_v48 = vsel %vm2293_vm9, %v2280_v41, %v2282_v47  ;;  %3869 = vrot.lane.b32.xlu1 %v3841_v44, %s8249_s30  ;;  %v2297_v49 = vsel %vm2293_vm9, %v2282_v47, %v2284_v45 }
 0x10e   : > { %3867 = vrot.lane.b32.xlu0 %v8647_v46, %s8249_s30  ;;  %7578 = vmatprep.subr.msk.bf16.mxu1 %vm280_vm1, %v2297_v49  ;;  %v2312_v12 = vsel %vm280_vm1, %v2296_v48, 0  ;;  %v7593_v48 = vld [vmem:[%s9701_s1 + $0x28] sm:$0xf] }
 0x10f   : > { %7574 = vmatmul.mubr.msk.bf16.vlgmr.msra.gmra.mrb[4].mxu1 %vm276_vm2, %v7566_v37  ;;  %v2288_v52 = vpop.permute.xlu1 %2287 }
 0x110   : > { %2371 = vmatpush1.bf16.msra.mxu1 %v2312_v12  ;;  %v2286_v53 = vpop.permute.xlu0 %2285  ;;  %2402 = vmatprep.mubr.bf16.mxu1 %v8236_v10 }
 0x111   : > { %4118 = vrot.lane.b32.xlu1 %v8655_v51, %s8250_s8  ;;  %7572 = vmatmul.mubr.msk.bf16.vlgmr.msra.gmra.mrb[4].mxu0 %vm276_vm2, %v7566_v37  ;;  %v2299_v56 = vsel %vm2293_vm9, %v2286_v53, %v2288_v52  ;;  %v2298_v0 = vsel %vm2293_vm9, %v2284_v45, %v2286_v53 }
 0x112   : > { %4116 = vrot.lane.b32.xlu0 %v8660_v54, %s8250_s8  ;;  %2330 = vmatpush1.bf16.msra.mxu0 %v2306_v55  ;;  %v2318_v9 = vsel %vm280_vm1, %v2298_v0, 0 }
 0x113   : > { %7580 = vmatprep.subr.msk.bf16.mxu0 %vm280_vm1, %v2299_v56  ;;  %v2292_v57 = vpop.permute.xlu1 %2291  ;;  %2361 = vmatprep.mubr.bf16.mxu0 %v8236_v10 }
 0x114   : > { %v2290_v58 = vpop.permute.xlu0 %2289 }
 0x115   : > { %v2300_v61 = vsel %vm2293_vm9, %v2288_v52, %v2290_v58  ;;  %4122 = vrot.lane.b32.xlu1 %v8669_v59, %s8250_s8  ;;  %v2301_v62 = vsel %vm2293_vm9, %v2290_v58, %v2292_v57  ;;  %v4868_v57 = vld [vmem:[%s8308_s24 + $0x4] sm:$0xff]  ;;  %vm5975_vm9 = vcmask 367616  }
 0x116   : > { %4120 = vrot.lane.b32.xlu0 %v8676_v63, %s8250_s8  ;;  %7582 = vmatprep.subr.msk.bf16.mxu1 %vm280_vm1, %v2301_v62  ;;  %v2324_v1 = vsel %vm280_vm1, %v2300_v61, 0 }
 0x117   : > { %7579 = vmatmul.mubr.msk.bf16.vlgmr.msra.gmra.mrb[0].mxu1 %vm276_vm2, %v7575_v60  ;;  %v2541_v2 = vpop.permute.xlu1 %2540 }
 0x118   : > { %2453 = vmatpush1.bf16.msra.mxu1 %v2324_v1  ;;  %v2539_v4 = vpop.permute.xlu0 %2538  ;;  %2484 = vmatprep.mubr.bf16.mxu1 %v8236_v10  ;;  %v4869_v1 = vld [vmem:[%s8308_s24 + $0xc] sm:$0xff] }
 0x119   : > { %4126 = vrot.lane.b32.xlu1 %v8684_v8, %s8250_s8  ;;  %7577 = vmatmul.mubr.msk.bf16.vlgmr.msra.gmra.mrb[0].mxu0 %vm276_vm2, %v7575_v60  ;;  %v2557_v20 = vsel %vm2556_vm10, %v2539_v4, %v2541_v2 }
 0x11a   : > { %4124 = vrot.lane.b32.xlu0 %v8689_v11, %s8250_s8  ;;  %2412 = vmatpush1.bf16.msra.mxu0 %v2318_v9  ;;  %v2569_v25 = vsel %vm280_vm1, %v2557_v20, 0  ;;  %v4870_v20 = vld [vmem:[%s8308_s24 + $0x14] sm:$0xff] }
 0x11b   : > { %v2545_v14 = vpop.permute.xlu1 %2544  ;;  %2443 = vmatprep.mubr.bf16.mxu0 %v8236_v10 }
 0x11c   : > { %v2543_v18 = vpop.permute.xlu0 %2542 }
 0x11d   : > { %4130 = vrot.lane.b32.xlu1 %v8647_v46, %s8250_s8  ;;  %v2558_v19 = vsel %vm2556_vm10, %v2541_v2, %v2543_v18  ;;  %v2559_v23 = vsel %vm2556_vm10, %v2543_v18, %v2545_v14  ;;  %v4877_v2 = vcombine.high %v4868_v57, %v4868_v57 }
 0x11e   : > { %4128 = vrot.lane.b32.xlu0 %v8626_v16, %s8250_s8  ;;  %7585 = vmatprep.subr.msk.bf16.mxu0 %vm280_vm1, %v2558_v19  ;;  %v2575_v27 = vsel %vm280_vm1, %v2559_v23, 0  ;;  %v7602_v19 = vld [vmem:[%s9701_s1 + $0x2c] sm:$0xf] }
 0x11f   : > { %v2549_v22 = vpop.permute.xlu1 %2548  ;;  %7583 = vmatmul.mubr.msk.bf16.vlgmr.msra.gmra.mrb[4].mxu1 %vm276_vm2, %v7575_v60  ;;  %v8915_v18 = vpack.c.bf16 %v4877_v2, %v4877_v2 }
 0x120   : > { %v2547_v24 = vpop.permute.xlu0 %2546  ;;  %2665 = vmatprep.mubr.bf16.mxu1 %v8236_v10 }
 0x121   : > { %4379 = vrot.lane.b32.xlu1 %v8660_v54, %s8251_s11  ;;  %7581 = vmatmul.mubr.msk.bf16.vlgmr.msra.gmra.mrb[4].mxu0 %vm276_vm2, %v7575_v60  ;;  %v2560_v26 = vsel %vm2556_vm10, %v2545_v14, %v2547_v24  ;;  %v2561_v30 = vsel %vm2556_vm10, %v2547_v24, %v2549_v22  ;;  %v4609_v60 = vld [vmem:[%s8308_s24 + $0x20] sm:$0xf] }
 0x122   : > { %4132 = vrot.lane.b32.xlu0 %v4104_v21, %s8250_s8  ;;  %2593 = vmatpush1.bf16.msra.mxu0 %v2569_v25  ;;  %v2581_v34 = vsel %vm280_vm1, %v2561_v30, 0  ;;  %v4630_v0 = vpack.c.bf16 %v4609_v60, %v4609_v60  ;;  %v4878_v21 = vcombine.high %v4869_v1, %v4869_v1  ;;  %v5135_v60 = vld [vmem:[%s8308_s24 + $0x24] sm:$0xf] }
 0x123   : > { %7587 = vmatprep.subr.msk.bf16.mxu1 %vm280_vm1, %v2560_v26  ;;  %v2553_v13 = vpop.permute.xlu1 %2552  ;;  %2624 = vmatprep.mubr.bf16.mxu0 %v8236_v10  ;;  %v8926_v26 = vpack.c.bf16 %v4870_v20, %v4870_v20 }
 0x124   : > { %2634 = vmatpush1.bf16.msra.mxu1 %v2575_v27  ;;  %v2551_v15 = vpop.permute.xlu0 %2550 }
 0x125   : > { %4383 = vrot.lane.b32.xlu1 %v8676_v63, %s8251_s11  ;;  %v2562_v29 = vsel %vm2556_vm10, %v2549_v22, %v2551_v15  ;;  %v2563_v31 = vsel %vm2556_vm10, %v2551_v15, %v2553_v13  ;;  %v4871_v15 = vld [vmem:[%s8308_s24 + $0x1c] sm:$0xff] }
 0x126   : > { %4381 = vrot.lane.b32.xlu0 %v8655_v51, %s8251_s11  ;;  %7589 = vmatprep.subr.msk.bf16.mxu0 %vm280_vm1, %v2562_v29  ;;  %v2587_v3 = vsel %vm280_vm1, %v2563_v31, 0 }
 0x127   : > { %v2802_v5 = vpop.permute.xlu1 %2801  ;;  %7588 = vmatmul.mubr.msk.bf16.vlgmr.msra.gmra.mrb[0].mxu1 %vm276_vm2, %v7584_v28 }
 0x128   : > { %v2555_v32 = vpop.permute.xlu0 %2554  ;;  %2747 = vmatprep.mubr.bf16.mxu1 %v8236_v10 }
 0x129   : > { %v2564_v33 = vsel %vm2556_vm10, %v2553_v13, %v2555_v32  ;;  %4387 = vrot.lane.b32.xlu1 %v8689_v11, %s8251_s11  ;;  %7586 = vmatmul.mubr.msk.bf16.vlgmr.msra.gmra.mrb[0].mxu0 %vm276_vm2, %v7584_v28  ;;  %v8932_v13 = vpack.c.bf16 %v4878_v21, %v4878_v21  ;;  %v8942_v32 = vpack.c.bf16 %v4871_v15, %v4871_v15  ;;  %vm6238_vm10 = vcmask 359424  }
 0x12a   : > { %4385 = vrot.lane.b32.xlu0 %v8669_v59, %s8251_s11  ;;  %2675 = vmatpush1.bf16.msra.mxu0 %v2581_v34 }
 0x12b   : > { %7591 = vmatprep.subr.msk.bf16.mxu1 %vm280_vm1, %v2564_v33  ;;  %v2806_v36 = vpop.permute.xlu1 %2805  ;;  %2706 = vmatprep.mubr.bf16.mxu0 %v8236_v10 }
 0x12c   : > { %2716 = vmatpush1.bf16.msra.mxu1 %v2587_v3  ;;  %v2804_v37 = vpop.permute.xlu0 %2803  ;;  %v4880_v3 = vcombine.high %v4871_v15, %v4871_v15 }
 0x12d   : > { %4391 = vrot.lane.b32.xlu1 %v8626_v16, %s8251_s11  ;;  %v2821_v38 = vsel %vm2819_vm11, %v2804_v37, %v2806_v36  ;;  %v2820_v40 = vsel %vm2819_vm11, %v2802_v5, %v2804_v37 }
 0x12e   : > { %4389 = vrot.lane.b32.xlu0 %v8684_v8, %s8251_s11  ;;  %7594 = vmatprep.subr.msk.bf16.mxu0 %vm280_vm1, %v2821_v38  ;;  %v2832_v6 = vsel %vm280_vm1, %v2820_v40, 0  ;;  %v4893_v40 = vpack.c.bf16 %v4872_v35, %v4872_v35 }
 0x12f   : > { %v2810_v7 = vpop.permute.xlu1 %2809  ;;  %7592 = vmatmul.mubr.msk.bf16.vlgmr.msra.gmra.mrb[4].mxu1 %vm276_vm2, %v7584_v28 }
 0x130   : > { %v2808_v41 = vpop.permute.xlu0 %2807  ;;  %2928 = vmatprep.mubr.bf16.mxu1 %v8236_v10 }
 0x131   : > { %v2822_v42 = vsel %vm2819_vm11, %v2806_v36, %v2808_v41  ;;  %4395 = vrot.lane.b32.xlu1 %v4367_v39, %s8251_s11  ;;  %7590 = vmatmul.mubr.msk.bf16.vlgmr.msra.gmra.mrb[4].mxu0 %vm276_vm2, %v7584_v28  ;;  %v2823_v43 = vsel %vm2819_vm11, %v2808_v41, %v2810_v7  ;;  %v4879_v28 = vcombine.high %v4870_v20, %v4870_v20 }
 0x132   : > { %4393 = vrot.lane.b32.xlu0 %v8647_v46, %s8251_s11  ;;  %2856 = vmatpush1.bf16.msra.mxu0 %v2832_v6  ;;  %v2838_v44 = vsel %vm280_vm1, %v2822_v42, 0  ;;  %v8960_v41 = vpack.c.bf16 %v4880_v3, %v4880_v3 }
 0x133   : > { %7596 = vmatprep.subr.msk.bf16.mxu1 %vm280_vm1, %v2823_v43  ;;  %v2814_v45 = vpop.permute.xlu1 %2813  ;;  %2887 = vmatprep.mubr.bf16.mxu0 %v8236_v10  ;;  %v8948_v34 = vpack.c.bf16 %v4879_v28, %v4879_v28  ;;  %v5398_v28 = vld [vmem:[%s8308_s24 + $0x24] sm:$0xf] }
 0x134   : > { %2897 = vmatpush1.bf16.msra.mxu1 %v2838_v44  ;;  %v2812_v47 = vpop.permute.xlu0 %2811 }
 0x135   : > { %4644 = vrot.lane.b32.xlu1 %v8655_v51, %s8252_s16  ;;  %v2825_v49 = vsel %vm2819_vm11, %v2812_v47, %v2814_v45  ;;  %v2824_v50 = vsel %vm2819_vm11, %v2810_v7, %v2812_v47  ;;  %v7611_v47 = vld [vmem:[%s9701_s1 + $0x30] sm:$0xf] }
 0x136   : > { %4642 = vrot.lane.b32.xlu0 %v8660_v54, %s8252_s16  ;;  %7598 = vmatprep.subr.msk.bf16.mxu0 %vm280_vm1, %v2825_v49  ;;  %v2844_v51 = vsel %vm280_vm1, %v2824_v50, 0 }
 0x137   : > { %v2818_v12 = vpop.permute.xlu1 %2817  ;;  %7597 = vmatmul.mubr.msk.bf16.vlgmr.msra.gmra.mrb[0].mxu1 %vm276_vm2, %v7593_v48 }
 0x138   : > { %v2816_v52 = vpop.permute.xlu0 %2815  ;;  %3010 = vmatprep.mubr.bf16.mxu1 %v8236_v10 }
 0x139   : > { %v2826_v53 = vsel %vm2819_vm11, %v2814_v45, %v2816_v52  ;;  %4648 = vrot.lane.b32.xlu1 %v8669_v59, %s8252_s16  ;;  %7595 = vmatmul.mubr.msk.bf16.vlgmr.msra.gmra.mrb[0].mxu0 %vm276_vm2, %v7593_v48  ;;  %v2827_v54 = vsel %vm2819_vm11, %v2816_v52, %v2818_v12  ;;  %vm6501_vm11 = vcmask 293888  }
 0x13a   : > { %4646 = vrot.lane.b32.xlu0 %v8676_v63, %s8252_s16  ;;  %2938 = vmatpush1.bf16.msra.mxu0 %v2844_v51  ;;  %v2850_v55 = vsel %vm280_vm1, %v2826_v53, 0 }
 0x13b   : > { %7600 = vmatprep.subr.msk.bf16.mxu1 %vm280_vm1, %v2827_v54  ;;  %v3067_v56 = vpop.permute.xlu1 %3066  ;;  %2969 = vmatprep.mubr.bf16.mxu0 %v8236_v10 }
 0x13c   : > { %2979 = vmatpush1.bf16.msra.mxu1 %v2850_v55  ;;  %v3065_v59 = vpop.permute.xlu0 %3064 }
 0x13d   : > { %4652 = vrot.lane.b32.xlu1 %v8684_v8, %s8252_s16  ;;  %v3083_v63 = vsel %vm3082_vm12, %v3065_v59, %v3067_v56  ;;  %v8898_v8 = vpack.c.bf16 %v4868_v57, %v4868_v57 }
 0x13e   : > { %4650 = vrot.lane.b32.xlu0 %v8689_v11, %s8252_s16  ;;  %v3095_v11 = vsel %vm280_vm1, %v3083_v63, 0 }
 0x13f   : > { %v3071_v58 = vpop.permute.xlu1 %3070  ;;  %7601 = vmatmul.mubr.msk.bf16.vlgmr.msra.gmra.mrb[4].mxu1 %vm276_vm2, %v7593_v48 }
 0x140   : > { %v3069_v61 = vpop.permute.xlu0 %3068  ;;  %3191 = vmatprep.mubr.bf16.mxu1 %v8236_v10 }
 0x141   : > { %4656 = vrot.lane.b32.xlu1 %v8647_v46, %s8252_s16  ;;  %v3084_v62 = vsel %vm3082_vm12, %v3067_v56, %v3069_v61  ;;  %7599 = vmatmul.mubr.msk.bf16.vlgmr.msra.gmra.mrb[4].mxu0 %vm276_vm2, %v7593_v48  ;;  %v3085_v4 = vsel %vm3082_vm12, %v3069_v61, %v3071_v58 }
 0x142   : > { %4654 = vrot.lane.b32.xlu0 %v8626_v16, %s8252_s16  ;;  %7603 = vmatprep.subr.msk.bf16.mxu0 %vm280_vm1, %v3084_v62  ;;  %v8910_v16 = vpack.c.bf16 %v4869_v1, %v4869_v1  ;;  %v3101_v17 = vsel %vm280_vm1, %v3085_v4, 0 }
 0x143   : > { %3119 = vmatpush1.bf16.msra.mxu0 %v3095_v11  ;;  %v3075_v46 = vpop.permute.xlu1 %3074  ;;  %3150 = vmatprep.mubr.bf16.mxu0 %v8236_v10 }
 0x144   : > { %v3073_v9 = vpop.permute.xlu0 %3072 }
 0x145   : > { %4905 = vrot.lane.b32.xlu1 %v8898_v8, %s8253_s17  ;;  %v3086_v14 = vsel %vm3082_vm12, %v3071_v58, %v3073_v9  ;;  %v3087_v22 = vsel %vm3082_vm12, %v3073_v9, %v3075_v46 }
 0x146   : > { %4658 = vrot.lane.b32.xlu0 %v4630_v0, %s8252_s16  ;;  %7605 = vmatprep.subr.msk.bf16.mxu1 %vm280_vm1, %v3086_v14  ;;  %v3107_v27 = vsel %vm280_vm1, %v3087_v22, 0  ;;  %v5156_v0 = vpack.c.bf16 %v5135_v60, %v5135_v60  ;;  %s7237_s16 = scalar_lea.vmem %s9705_s5, %s7751_s13 }
 0x147   : > { %3160 = vmatpush1.bf16.msra.mxu1 %v3101_v17  ;;  %v3079_v23 = vpop.permute.xlu1 %3078 }
 0x148   : > { %v3077_v24 = vpop.permute.xlu0 %3076 }
 0x149   : > { %4909 = vrot.lane.b32.xlu1 %v8910_v16, %s8253_s17  ;;  %v3088_v25 = vsel %vm3082_vm12, %v3075_v46, %v3077_v24  ;;  %7604 = vmatmul.mubr.msk.bf16.vlgmr.msra.gmra.mrb[0].mxu0 %vm276_vm2, %v7602_v19  ;;  %v3089_v29 = vsel %vm3082_vm12, %v3077_v24, %v3079_v23  ;;  %v7620_v46 = vld [vmem:[%s9701_s1 + $0x34] sm:$0xf] }
 0x14a   : > { %4907 = vrot.lane.b32.xlu0 %v8915_v18, %s8253_s17  ;;  %7607 = vmatprep.subr.msk.bf16.mxu0 %vm280_vm1, %v3088_v25  ;;  %v3113_v33 = vsel %vm280_vm1, %v3089_v29, 0 }
 0x14b   : > { %3201 = vmatpush1.bf16.msra.mxu0 %v3107_v27  ;;  %v3328_v30 = vpop.permute.xlu1 %3327  ;;  %7606 = vmatmul.mubr.msk.bf16.vlgmr.msra.gmra.mrb[0].mxu1 %vm276_vm2, %v7602_v19 }
 0x14c   : > { %v3081_v5 = vpop.permute.xlu0 %3080  ;;  %3232 = vmatprep.mubr.bf16.mxu0 %v8236_v10  ;;  %3273 = vmatprep.mubr.bf16.mxu1 %v8236_v10 }
 0x14d   : > { %v3090_v31 = vsel %vm3082_vm12, %v3079_v23, %v3081_v5  ;;  %4913 = vrot.lane.b32.xlu1 %v8926_v26, %s8253_s17  ;;  %vm6764_vm12 = vcmask 285696  }
 0x14e   : > { %4911 = vrot.lane.b32.xlu0 %v8932_v13, %s8253_s17  ;;  %7609 = vmatprep.subr.msk.bf16.mxu1 %vm280_vm1, %v3090_v31 }
 0x14f   : > { %3242 = vmatpush1.bf16.msra.mxu1 %v3113_v33  ;;  %v3332_v36 = vpop.permute.xlu1 %3331  ;;  %v5419_v33 = vpack.c.bf16 %v5398_v28, %v5398_v28 }
 0x150   : > { %v3330_v37 = vpop.permute.xlu0 %3329 }
 0x151   : > { %v3346_v38 = vsel %vm3345_vm13, %v3328_v30, %v3330_v37  ;;  %4917 = vrot.lane.b32.xlu1 %v8942_v32, %s8253_s17  ;;  %v3347_v39 = vsel %vm3345_vm13, %v3330_v37, %v3332_v36  ;;  %7608 = vmatmul.mubr.msk.bf16.vlgmr.msra.gmra.mrb[4].mxu0 %vm276_vm2, %v7602_v19  ;;  %v7629_v37 = vld [vmem:[%s9701_s1 + $0x38] sm:$0xf] }
 0x152   : > { %4915 = vrot.lane.b32.xlu0 %v8948_v34, %s8253_s17  ;;  %7612 = vmatprep.subr.msk.bf16.mxu0 %vm280_vm1, %v3347_v39  ;;  %v3358_v7 = vsel %vm280_vm1, %v3346_v38, 0 }
 0x153   : > { %3382 = vmatpush1.bf16.msra.mxu0 %v3358_v7  ;;  %v3336_v42 = vpop.permute.xlu1 %3335  ;;  %7610 = vmatmul.mubr.msk.bf16.vlgmr.msra.gmra.mrb[4].mxu1 %vm276_vm2, %v7602_v19 }
 0x154   : > { %v3334_v6 = vpop.permute.xlu0 %3333  ;;  %3413 = vmatprep.mubr.bf16.mxu0 %v8236_v10  ;;  %3454 = vmatprep.mubr.bf16.mxu1 %v8236_v10 }
 0x155   : > { %v3348_v43 = vsel %vm3345_vm13, %v3332_v36, %v3334_v6  ;;  %4921 = vrot.lane.b32.xlu1 %v4893_v40, %s8253_s17  ;;  %v3349_v44 = vsel %vm3345_vm13, %v3334_v6, %v3336_v42 }
 0x156   : > { %4919 = vrot.lane.b32.xlu0 %v8960_v41, %s8253_s17  ;;  %7614 = vmatprep.subr.msk.bf16.mxu1 %vm280_vm1, %v3349_v44  ;;  %v3364_v45 = vsel %vm280_vm1, %v3348_v43, 0 }
 0x157   : > { %3423 = vmatpush1.bf16.msra.mxu1 %v3364_v45  ;;  %v3340_v48 = vpop.permute.xlu1 %3339 }
 0x158   : > { %v3338_v49 = vpop.permute.xlu0 %3337 }
 0x159   : > { %v3350_v50 = vsel %vm3345_vm13, %v3336_v42, %v3338_v49  ;;  %5170 = vrot.lane.b32.xlu1 %v8915_v18, %s8254_s25  ;;  %v3351_v12 = vsel %vm3345_vm13, %v3338_v49, %v3340_v48  ;;  %7613 = vmatmul.mubr.msk.bf16.vlgmr.msra.gmra.mrb[0].mxu0 %vm276_vm2, %v7611_v47 }
 0x15a   : > { %5168 = vrot.lane.b32.xlu0 %v8898_v8, %s8254_s25  ;;  %7616 = vmatprep.subr.msk.bf16.mxu0 %vm280_vm1, %v3351_v12  ;;  %v3370_v52 = vsel %vm280_vm1, %v3350_v50, 0 }
 0x15b   : > { %3464 = vmatpush1.bf16.msra.mxu0 %v3370_v52  ;;  %v3344_v53 = vpop.permute.xlu1 %3343  ;;  %7615 = vmatmul.mubr.msk.bf16.vlgmr.msra.gmra.mrb[0].mxu1 %vm276_vm2, %v7611_v47 }
 0x15c   : > { %v3342_v51 = vpop.permute.xlu0 %3341  ;;  %3495 = vmatprep.mubr.bf16.mxu0 %v8236_v10  ;;  %3536 = vmatprep.mubr.bf16.mxu1 %v8236_v10 }
 0x15d   : > { %v3352_v54 = vsel %vm3345_vm13, %v3340_v48, %v3342_v51  ;;  %5174 = vrot.lane.b32.xlu1 %v8932_v13, %s8254_s25  ;;  %v3353_v55 = vsel %vm3345_vm13, %v3342_v51, %v3344_v53  ;;  %vm7027_vm13 = vcmask 277504  }
 0x15e   : > { %5172 = vrot.lane.b32.xlu0 %v8910_v16, %s8254_s25  ;;  %7618 = vmatprep.subr.msk.bf16.mxu1 %vm280_vm1, %v3353_v55  ;;  %v3376_v56 = vsel %vm280_vm1, %v3352_v54, 0  ;;  %v5661_v54 = vld [vmem:[%s8308_s24 + $0x24] sm:$0xf] }
 0x15f   : > { %3505 = vmatpush1.bf16.msra.mxu1 %v3376_v56  ;;  %v3593_v59 = vpop.permute.xlu1 %3592 }
 0x160   : > { %v3591_v57 = vpop.permute.xlu0 %3590 }
 0x161   : > { %5178 = vrot.lane.b32.xlu1 %v8948_v34, %s8254_s25  ;;  %7617 = vmatmul.mubr.msk.bf16.vlgmr.msra.gmra.mrb[4].mxu0 %vm276_vm2, %v7611_v47  ;;  %v3609_v63 = vsel %vm3608_vm14, %v3591_v57, %v3593_v59  ;;  %v5682_v57 = vpack.c.bf16 %v5661_v54, %v5661_v54 }
 0x162   : > { %5176 = vrot.lane.b32.xlu0 %v8926_v26, %s8254_s25  ;;  %3676 = vmatprep.mubr.bf16.mxu0 %v8236_v10  ;;  %v3621_v11 = vsel %vm280_vm1, %v3609_v63, 0 }
 0x163   : > { %v3597_v58 = vpop.permute.xlu1 %3596  ;;  %7619 = vmatmul.mubr.msk.bf16.vlgmr.msra.gmra.mrb[4].mxu1 %vm276_vm2, %v7611_v47 }
 0x164   : > { %v3595_v61 = vpop.permute.xlu0 %3594  ;;  %3717 = vmatprep.mubr.bf16.mxu1 %v8236_v10 }
 0x165   : > { %5182 = vrot.lane.b32.xlu1 %v8960_v41, %s8254_s25  ;;  %v3610_v62 = vsel %vm3608_vm14, %v3593_v59, %v3595_v61  ;;  %v3611_v1 = vsel %vm3608_vm14, %v3595_v61, %v3597_v58  ;;  %v7638_v61 = vld [vmem:[%s9701_s1 + $0x3c] sm:$0xf] }
 0x166   : > { %5180 = vrot.lane.b32.xlu0 %v8942_v32, %s8254_s25  ;;  %7621 = vmatprep.subr.msk.bf16.mxu0 %vm280_vm1, %v3610_v62  ;;  %v3627_v14 = vsel %vm280_vm1, %v3611_v1, 0 }
 0x167   : > { %3645 = vmatpush1.bf16.msra.mxu0 %v3621_v11  ;;  %v3601_v2 = vpop.permute.xlu1 %3600 }
 0x168   : > { %v3599_v4 = vpop.permute.xlu0 %3598 }
 0x169   : > { %5431 = vrot.lane.b32.xlu1 %v8898_v8, %s8255_s28  ;;  %v3612_v9 = vsel %vm3608_vm14, %v3597_v58, %v3599_v4  ;;  %v3613_v17 = vsel %vm3608_vm14, %v3599_v4, %v3601_v2 }
 0x16a   : > { %5184 = vrot.lane.b32.xlu0 %v5156_v0, %s8254_s25  ;;  %7623 = vmatprep.subr.msk.bf16.mxu1 %vm280_vm1, %v3612_v9  ;;  %v3633_v22 = vsel %vm280_vm1, %v3613_v17, 0 }
 0x16b   : > { %3686 = vmatpush1.bf16.msra.mxu1 %v3627_v14  ;;  %v3605_v19 = vpop.permute.xlu1 %3604  ;;  %7622 = vmatmul.mubr.msk.bf16.vlgmr.msra.gmra.mrb[0].mxu0 %vm276_vm2, %v7620_v46 }
 0x16c   : > { %v3603_v20 = vpop.permute.xlu0 %3602  ;;  %3758 = vmatprep.mubr.bf16.mxu0 %v8236_v10 }
 0x16d   : > { %5435 = vrot.lane.b32.xlu1 %v8910_v16, %s8255_s28  ;;  %v3614_v21 = vsel %vm3608_vm14, %v3601_v2, %v3603_v20  ;;  %v3615_v23 = vsel %vm3608_vm14, %v3603_v20, %v3605_v19 }
 0x16e   : > { %5433 = vrot.lane.b32.xlu0 %v8915_v18, %s8255_s28  ;;  %7625 = vmatprep.subr.msk.bf16.mxu0 %vm280_vm1, %v3614_v21  ;;  %v3639_v15 = vsel %vm280_vm1, %v3615_v23, 0  ;;  %v5924_v21 = vld [vmem:[%s8308_s24 + $0x24] sm:$0xf] }
 0x16f   : > { %3727 = vmatpush1.bf16.msra.mxu0 %v3633_v22  ;;  %v3854_v24 = vpop.permute.xlu1 %3853  ;;  %7624 = vmatmul.mubr.msk.bf16.vlgmr.msra.gmra.mrb[0].mxu1 %vm276_vm2, %v7620_v46 }
 0x170   : > { %v3607_v25 = vpop.permute.xlu0 %3606  ;;  %3799 = vmatprep.mubr.bf16.mxu1 %v8236_v10 }
 0x171   : > { %v3616_v27 = vsel %vm3608_vm14, %v3605_v19, %v3607_v25  ;;  %5439 = vrot.lane.b32.xlu1 %v8926_v26, %s8255_s28 }
 0x172   : > { %5437 = vrot.lane.b32.xlu0 %v8932_v13, %s8255_s28  ;;  %7627 = vmatprep.subr.msk.bf16.mxu1 %vm280_vm1, %v3616_v27  ;;  %v5945_v27 = vpack.c.bf16 %v5924_v21, %v5924_v21 }
 0x173   : > { %3768 = vmatpush1.bf16.msra.mxu1 %v3639_v15  ;;  %v3858_v29 = vpop.permute.xlu1 %3857  ;;  %7626 = vmatmul.mubr.msk.bf16.vlgmr.msra.gmra.mrb[4].mxu0 %vm276_vm2, %v7620_v46 }
 0x174   : > { %v3856_v30 = vpop.permute.xlu0 %3855  ;;  %3939 = vmatprep.mubr.bf16.mxu0 %v8236_v10 }
 0x175   : > { %v3872_v5 = vsel %vm3871_vm15, %v3854_v24, %v3856_v30  ;;  %5443 = vrot.lane.b32.xlu1 %v8942_v32, %s8255_s28  ;;  %v3873_v31 = vsel %vm3871_vm15, %v3856_v30, %v3858_v29  ;;  %v7647_v30 = vld [vmem:[%s9701_s1 + $0x40] sm:$0xf] }
 0x176   : > { %5441 = vrot.lane.b32.xlu0 %v8948_v34, %s8255_s28  ;;  %7630 = vmatprep.subr.msk.bf16.mxu0 %vm280_vm1, %v3873_v31  ;;  %v3884_v35 = vsel %vm280_vm1, %v3872_v5, 0 }
 0x177   : > { %3908 = vmatpush1.bf16.msra.mxu0 %v3884_v35  ;;  %v3862_v3 = vpop.permute.xlu1 %3861  ;;  %7628 = vmatmul.mubr.msk.bf16.vlgmr.msra.gmra.mrb[4].mxu1 %vm276_vm2, %v7620_v46 }
 0x178   : > { %v3860_v36 = vpop.permute.xlu0 %3859  ;;  %3980 = vmatprep.mubr.bf16.mxu1 %v8236_v10 }
 0x179   : > { %v3874_v38 = vsel %vm3871_vm15, %v3858_v29, %v3860_v36  ;;  %5447 = vrot.lane.b32.xlu1 %v5419_v33, %s8255_s28  ;;  %v3875_v39 = vsel %vm3871_vm15, %v3860_v36, %v3862_v3 }
 0x17a   : > { %5445 = vrot.lane.b32.xlu0 %v8960_v41, %s8255_s28  ;;  %7632 = vmatprep.subr.msk.bf16.mxu1 %vm280_vm1, %v3875_v39  ;;  %v3890_v40 = vsel %vm280_vm1, %v3874_v38, 0 }
 0x17b   : > { %3949 = vmatpush1.bf16.msra.mxu1 %v3890_v40  ;;  %v3866_v7 = vpop.permute.xlu1 %3865  ;;  %7631 = vmatmul.mubr.msk.bf16.vlgmr.msra.gmra.mrb[0].mxu0 %vm276_vm2, %v7629_v37 }
 0x17c   : > { %v3864_v42 = vpop.permute.xlu0 %3863  ;;  %4021 = vmatprep.mubr.bf16.mxu0 %v8236_v10 }
 0x17d   : > { %v3876_v6 = vsel %vm3871_vm15, %v3862_v3, %v3864_v42  ;;  %5696 = vrot.lane.b32.xlu1 %v8915_v18, %s8256_s6  ;;  %v3877_v43 = vsel %vm3871_vm15, %v3864_v42, %v3866_v7 }
 0x17e   : > { %5694 = vrot.lane.b32.xlu0 %v8898_v8, %s8256_s6  ;;  %7634 = vmatprep.subr.msk.bf16.mxu0 %vm280_vm1, %v3877_v43  ;;  %v3896_v44 = vsel %vm280_vm1, %v3876_v6, 0 }
 0x17f   : > { %3990 = vmatpush1.bf16.msra.mxu0 %v3896_v44  ;;  %v3870_v45 = vpop.permute.xlu1 %3869  ;;  %7633 = vmatmul.mubr.msk.bf16.vlgmr.msra.gmra.mrb[0].mxu1 %vm276_vm2, %v7629_v37 }
 0x180   : > { %v3868_v47 = vpop.permute.xlu0 %3867  ;;  %4062 = vmatprep.mubr.bf16.mxu1 %v8236_v10 }
 0x181   : > { %v3878_v48 = vsel %vm3871_vm15, %v3866_v7, %v3868_v47  ;;  %5700 = vrot.lane.b32.xlu1 %v8932_v13, %s8256_s6  ;;  %v3879_v49 = vsel %vm3871_vm15, %v3868_v47, %v3870_v45 }
 0x182   : > { %5698 = vrot.lane.b32.xlu0 %v8910_v16, %s8256_s6  ;;  %7636 = vmatprep.subr.msk.bf16.mxu1 %vm280_vm1, %v3879_v49  ;;  %v3902_v50 = vsel %vm280_vm1, %v3878_v48, 0  ;;  %v6187_v48 = vld [vmem:[%s8308_s24 + $0x24] sm:$0xf] }
 0x183   : > { %4031 = vmatpush1.bf16.msra.mxu1 %v3902_v50  ;;  %v4119_v12 = vpop.permute.xlu1 %4118  ;;  %7635 = vmatmul.mubr.msk.bf16.vlgmr.msra.gmra.mrb[4].mxu0 %vm276_vm2, %v7629_v37 }
 0x184   : > { %v4117_v52 = vpop.permute.xlu0 %4116  ;;  %4202 = vmatprep.mubr.bf16.mxu0 %v8236_v10 }
 0x185   : > { %5704 = vrot.lane.b32.xlu1 %v8948_v34, %s8256_s6  ;;  %v4135_v53 = vsel %vm4134_vm0, %v4117_v52, %v4119_v12  ;;  %v6208_v52 = vpack.c.bf16 %v6187_v48, %v6187_v48 }
 0x186   : > { %5702 = vrot.lane.b32.xlu0 %v8926_v26, %s8256_s6  ;;  %v4147_v59 = vsel %vm280_vm1, %v4135_v53, 0 }
 0x187   : > { %v4123_v51 = vpop.permute.xlu1 %4122  ;;  %7637 = vmatmul.mubr.msk.bf16.vlgmr.msra.gmra.mrb[4].mxu1 %vm276_vm2, %v7629_v37 }
 0x188   : > { %v4121_v55 = vpop.permute.xlu0 %4120  ;;  %4243 = vmatprep.mubr.bf16.mxu1 %v8236_v10 }
 0x189   : > { %5708 = vrot.lane.b32.xlu1 %v8960_v41, %s8256_s6  ;;  %v4136_v56 = vsel %vm4134_vm0, %v4119_v12, %v4121_v55  ;;  %v4137_v63 = vsel %vm4134_vm0, %v4121_v55, %v4123_v51  ;;  %v7656_v55 = vld [vmem:[%s9701_s1 + $0x44] sm:$0xf] }
 0x18a   : > { %5706 = vrot.lane.b32.xlu0 %v8942_v32, %s8256_s6  ;;  %7639 = vmatprep.subr.msk.bf16.mxu0 %vm280_vm1, %v4136_v56  ;;  %v4153_v11 = vsel %vm280_vm1, %v4137_v63, 0 }
 0x18b   : > { %4171 = vmatpush1.bf16.msra.mxu0 %v4147_v59  ;;  %v4127_v58 = vpop.permute.xlu1 %4126 }
 0x18c   : > { %v4125_v60 = vpop.permute.xlu0 %4124 }
 0x18d   : > { %5957 = vrot.lane.b32.xlu1 %v8898_v8, %s8257_s9  ;;  %v4138_v62 = vsel %vm4134_vm0, %v4123_v51, %v4125_v60  ;;  %v4139_v0 = vsel %vm4134_vm0, %v4125_v60, %v4127_v58 }
 0x18e   : > { %5710 = vrot.lane.b32.xlu0 %v5682_v57, %s8256_s6  ;;  %7641 = vmatprep.subr.msk.bf16.mxu1 %vm280_vm1, %v4138_v62  ;;  %v4159_v46 = vsel %vm280_vm1, %v4139_v0, 0 }
 0x18f   : > { %4212 = vmatpush1.bf16.msra.mxu1 %v4153_v11  ;;  %v4131_v1 = vpop.permute.xlu1 %4130  ;;  %7640 = vmatmul.mubr.msk.bf16.vlgmr.msra.gmra.mrb[0].mxu0 %vm276_vm2, %v7638_v61 }
 0x190   : > { %v4129_v2 = vpop.permute.xlu0 %4128  ;;  %4284 = vmatprep.mubr.bf16.mxu0 %v8236_v10 }
 0x191   : > { %5961 = vrot.lane.b32.xlu1 %v8910_v16, %s8257_s9  ;;  %v4140_v4 = vsel %vm4134_vm0, %v4127_v58, %v4129_v2  ;;  %v4141_v9 = vsel %vm4134_vm0, %v4129_v2, %v4131_v1 }
 0x192   : > { %5959 = vrot.lane.b32.xlu0 %v8915_v18, %s8257_s9  ;;  %7643 = vmatprep.subr.msk.bf16.mxu0 %vm280_vm1, %v4140_v4  ;;  %v4165_v20 = vsel %vm280_vm1, %v4141_v9, 0  ;;  %v6450_v4 = vld [vmem:[%s8308_s24 + $0x24] sm:$0xf] }
 0x193   : > { %4253 = vmatpush1.bf16.msra.mxu0 %v4159_v46  ;;  %v4380_v14 = vpop.permute.xlu1 %4379  ;;  %7642 = vmatmul.mubr.msk.bf16.vlgmr.msra.gmra.mrb[0].mxu1 %vm276_vm2, %v7638_v61 }
 0x194   : > { %v4133_v17 = vpop.permute.xlu0 %4132  ;;  %4325 = vmatprep.mubr.bf16.mxu1 %v8236_v10 }
 0x195   : > { %v4142_v19 = vsel %vm4134_vm0, %v4131_v1, %v4133_v17  ;;  %5965 = vrot.lane.b32.xlu1 %v8926_v26, %s8257_s9 }
 0x196   : > { %5963 = vrot.lane.b32.xlu0 %v8932_v13, %s8257_s9  ;;  %7645 = vmatprep.subr.msk.bf16.mxu1 %vm280_vm1, %v4142_v19  ;;  %v6471_v19 = vpack.c.bf16 %v6450_v4, %v6450_v4 }
 0x197   : > { %4294 = vmatpush1.bf16.msra.mxu1 %v4165_v20  ;;  %v4384_v22 = vpop.permute.xlu1 %4383  ;;  %7644 = vmatmul.mubr.msk.bf16.vlgmr.msra.gmra.mrb[4].mxu0 %vm276_vm2, %v7638_v61 }
 0x198   : > { %v4382_v23 = vpop.permute.xlu0 %4381  ;;  %4465 = vmatprep.mubr.bf16.mxu0 %v8236_v10 }
 0x199   : > { %v4398_v24 = vsel %vm4397_vm3, %v4380_v14, %v4382_v23  ;;  %v4399_v25 = vsel %vm4397_vm3, %v4382_v23, %v4384_v22  ;;  %5969 = vrot.lane.b32.xlu1 %v8942_v32, %s8257_s9  ;;  %v7665_v23 = vld [vmem:[%s9701_s1 + $0x48] sm:$0xf] }
 0x19a   : > { %v4410_v15 = vsel %vm280_vm1, %v4398_v24, 0  ;;  %5967 = vrot.lane.b32.xlu0 %v8948_v34, %s8257_s9  ;;  %7648 = vmatprep.subr.msk.bf16.mxu0 %vm280_vm1, %v4399_v25 }
 0x19b   : > { %4434 = vmatpush1.bf16.msra.mxu0 %v4410_v15  ;;  %v4388_v28 = vpop.permute.xlu1 %4387  ;;  %7646 = vmatmul.mubr.msk.bf16.vlgmr.msra.gmra.mrb[4].mxu1 %vm276_vm2, %v7638_v61 }
 0x19c   : > { %v4386_v29 = vpop.permute.xlu0 %4385  ;;  %4506 = vmatprep.mubr.bf16.mxu1 %v8236_v10 }
 0x19d   : > { %v4400_v5 = vsel %vm4397_vm3, %v4384_v22, %v4386_v29  ;;  %v4401_v31 = vsel %vm4397_vm3, %v4386_v29, %v4388_v28  ;;  %5973 = vrot.lane.b32.xlu1 %v5945_v27, %s8257_s9 }
 0x19e   : > { %v4416_v33 = vsel %vm280_vm1, %v4400_v5, 0  ;;  %5971 = vrot.lane.b32.xlu0 %v8960_v41, %s8257_s9  ;;  %7650 = vmatprep.subr.msk.bf16.mxu1 %vm280_vm1, %v4401_v31 }
 0x19f   : > { %4475 = vmatpush1.bf16.msra.mxu1 %v4416_v33  ;;  %v4392_v35 = vpop.permute.xlu1 %4391  ;;  %7649 = vmatmul.mubr.msk.bf16.vlgmr.msra.gmra.mrb[0].mxu0 %vm276_vm2, %v7647_v30 }
 0x1a0   : > { %v4390_v3 = vpop.permute.xlu0 %4389  ;;  %4547 = vmatprep.mubr.bf16.mxu0 %v8236_v10 }
 0x1a1   : > { %v4402_v36 = vsel %vm4397_vm3, %v4388_v28, %v4390_v3  ;;  %v4403_v37 = vsel %vm4397_vm3, %v4390_v3, %v4392_v35  ;;  %6222 = vrot.lane.b32.xlu1 %v8915_v18, %s8258_s12 }
 0x1a2   : > { %v4422_v38 = vsel %vm280_vm1, %v4402_v36, 0  ;;  %6220 = vrot.lane.b32.xlu0 %v8898_v8, %s8258_s12  ;;  %7652 = vmatprep.subr.msk.bf16.mxu0 %vm280_vm1, %v4403_v37 }
 0x1a3   : > { %4516 = vmatpush1.bf16.msra.mxu0 %v4422_v38  ;;  %v4396_v39 = vpop.permute.xlu1 %4395  ;;  %7651 = vmatmul.mubr.msk.bf16.vlgmr.msra.gmra.mrb[0].mxu1 %vm276_vm2, %v7647_v30  ;;  %v6713_v38 = vld [vmem:[%s8308_s24 + $0x24] sm:$0xf] }
 0x1a4   : > { %v4394_v40 = vpop.permute.xlu0 %4393  ;;  %4588 = vmatprep.mubr.bf16.mxu1 %v8236_v10 }
 0x1a5   : > { %v4404_v7 = vsel %vm4397_vm3, %v4392_v35, %v4394_v40  ;;  %v4405_v42 = vsel %vm4397_vm3, %v4394_v40, %v4396_v39  ;;  %6226 = vrot.lane.b32.xlu1 %v8932_v13, %s8258_s12 }
 0x1a6   : > { %v4428_v6 = vsel %vm280_vm1, %v4404_v7, 0  ;;  %6224 = vrot.lane.b32.xlu0 %v8910_v16, %s8258_s12  ;;  %7654 = vmatprep.subr.msk.bf16.mxu1 %vm280_vm1, %v4405_v42  ;;  %v6973_v42 = vld [vmem:[%s8308_s24 + $0xc] sm:$0xff] }
 0x1a7   : > { %4557 = vmatpush1.bf16.msra.mxu1 %v4428_v6  ;;  %v4645_v43 = vpop.permute.xlu1 %4644  ;;  %7653 = vmatmul.mubr.msk.bf16.vlgmr.msra.gmra.mrb[4].mxu0 %vm276_vm2, %v7647_v30 }
 0x1a8   : > { %v4643_v44 = vpop.permute.xlu0 %4642  ;;  %4728 = vmatprep.mubr.bf16.mxu0 %v8236_v10 }
 0x1a9   : > { %6230 = vrot.lane.b32.xlu1 %v8948_v34, %s8258_s12  ;;  %v4661_v45 = vsel %vm4660_vm4, %v4643_v44, %v4645_v43 }
 0x1aa   : > { %6228 = vrot.lane.b32.xlu0 %v8926_v26, %s8258_s12  ;;  %v4673_v12 = vsel %vm280_vm1, %v4661_v45, 0 }
 0x1ab   : > { %v4649_v47 = vpop.permute.xlu1 %4648  ;;  %7655 = vmatmul.mubr.msk.bf16.vlgmr.msra.gmra.mrb[4].mxu1 %vm276_vm2, %v7647_v30 }
 0x1ac   : > { %v4647_v49 = vpop.permute.xlu0 %4646  ;;  %4769 = vmatprep.mubr.bf16.mxu1 %v8236_v10 }
 0x1ad   : > { %v4662_v50 = vsel %vm4660_vm4, %v4645_v43, %v4647_v49  ;;  %6234 = vrot.lane.b32.xlu1 %v8960_v41, %s8258_s12  ;;  %v4663_v53 = vsel %vm4660_vm4, %v4647_v49, %v4649_v47 }
 0x1ae   : > { %6232 = vrot.lane.b32.xlu0 %v8942_v32, %s8258_s12  ;;  %7657 = vmatprep.subr.msk.bf16.mxu0 %vm280_vm1, %v4662_v50  ;;  %v4679_v59 = vsel %vm280_vm1, %v4663_v53, 0  ;;  %v6974_v50 = vld [vmem:[%s8308_s24 + $0x14] sm:$0xff] }
 0x1af   : > { %4697 = vmatpush1.bf16.msra.mxu0 %v4673_v12  ;;  %v4653_v51 = vpop.permute.xlu1 %4652  ;;  %v6982_v12 = vcombine.high %v6973_v42, %v6973_v42 }
 0x1b0   : > { %v4651_v54 = vpop.permute.xlu0 %4650 }
 0x1b1   : > { %v4664_v56 = vsel %vm4660_vm4, %v4649_v47, %v4651_v54  ;;  %6483 = vrot.lane.b32.xlu1 %v8898_v8, %s8259_s15  ;;  %v4665_v57 = vsel %vm4660_vm4, %v4651_v54, %v4653_v51 }
 0x1b2   : > { %6236 = vrot.lane.b32.xlu0 %v6208_v52, %s8258_s12  ;;  %7659 = vmatprep.subr.msk.bf16.mxu1 %vm280_vm1, %v4664_v56  ;;  %v4685_v61 = vsel %vm280_vm1, %v4665_v57, 0  ;;  %v6975_v57 = vld [vmem:[%s8308_s24 + $0x1c] sm:$0xff] }
 0x1b3   : > { %4738 = vmatpush1.bf16.msra.mxu1 %v4679_v59  ;;  %v4657_v63 = vpop.permute.xlu1 %4656  ;;  %7658 = vmatmul.mubr.msk.bf16.vlgmr.msra.gmra.mrb[0].mxu0 %vm276_vm2, %v7656_v55  ;;  %v6992_v59 = vpack.c.bf16 %v6982_v12, %v6982_v12  ;;  %v6984_v4 = vcombine.high %v6975_v57, %v6975_v57 }
 0x1b4   : > { %v4655_v58 = vpop.permute.xlu0 %4654  ;;  %4810 = vmatprep.mubr.bf16.mxu0 %v8236_v10 }
 0x1b5   : > { %v4666_v60 = vsel %vm4660_vm4, %v4653_v51, %v4655_v58  ;;  %6487 = vrot.lane.b32.xlu1 %v8910_v16, %s8259_s15  ;;  %v4667_v62 = vsel %vm4660_vm4, %v4655_v58, %v4657_v63 }
 0x1b6   : > { %6485 = vrot.lane.b32.xlu0 %v8915_v18, %s8259_s15  ;;  %7661 = vmatprep.subr.msk.bf16.mxu0 %vm280_vm1, %v4666_v60  ;;  %v4691_v2 = vsel %vm280_vm1, %v4667_v62, 0 }
 0x1b7   : > { %4779 = vmatpush1.bf16.msra.mxu0 %v4685_v61  ;;  %v4906_v11 = vpop.permute.xlu1 %4905  ;;  %7660 = vmatmul.mubr.msk.bf16.vlgmr.msra.gmra.mrb[0].mxu1 %vm276_vm2, %v7656_v55 }
 0x1b8   : > { %v4659_v0 = vpop.permute.xlu0 %4658  ;;  %4851 = vmatprep.mubr.bf16.mxu1 %v8236_v10 }
 0x1b9   : > { %v4668_v1 = vsel %vm4660_vm4, %v4657_v63, %v4659_v0  ;;  %6491 = vrot.lane.b32.xlu1 %v8926_v26, %s8259_s15  ;;  %v6983_v63 = vcombine.high %v6974_v50, %v6974_v50 }
 0x1ba   : > { %6489 = vrot.lane.b32.xlu0 %v8932_v13, %s8259_s15  ;;  %7663 = vmatprep.subr.msk.bf16.mxu1 %vm280_vm1, %v4668_v1 }
 0x1bb   : > { %4820 = vmatpush1.bf16.msra.mxu1 %v4691_v2  ;;  %v4910_v46 = vpop.permute.xlu1 %4909  ;;  %7662 = vmatmul.mubr.msk.bf16.vlgmr.msra.gmra.mrb[4].mxu0 %vm276_vm2, %v7656_v55  ;;  %v6994_v1 = vpack.c.bf16 %v6983_v63, %v6983_v63  ;;  %v6976_v2 = vld [vmem:[%s8308_s24 + $0x24] sm:$0xf] }
 0x1bc   : > { %v4908_v9 = vpop.permute.xlu0 %4907  ;;  %4991 = vmatprep.mubr.bf16.mxu0 %v8236_v10 }
 0x1bd   : > { %v4924_v14 = vsel %vm4923_vm5, %v4906_v11, %v4908_v9  ;;  %v4925_v17 = vsel %vm4923_vm5, %v4908_v9, %v4910_v46  ;;  %6495 = vrot.lane.b32.xlu1 %v8942_v32, %s8259_s15  ;;  %v6995_v11 = vpack.c.bf16 %v6975_v57, %v6975_v57  ;;  %v7701_v57 = vld [vmem:[%s9701_s1 + $0x58] sm:$0xf] }
 0x1be   : > { %v4936_v20 = vsel %vm280_vm1, %v4924_v14, 0  ;;  %6493 = vrot.lane.b32.xlu0 %v8948_v34, %s8259_s15  ;;  %7666 = vmatprep.subr.msk.bf16.mxu0 %vm280_vm1, %v4925_v17 }
 0x1bf   : > { %4960 = vmatpush1.bf16.msra.mxu0 %v4936_v20  ;;  %v4914_v21 = vpop.permute.xlu1 %4913  ;;  %7664 = vmatmul.mubr.msk.bf16.vlgmr.msra.gmra.mrb[4].mxu1 %vm276_vm2, %v7656_v55  ;;  %v6993_v55 = vpack.c.bf16 %v6974_v50, %v6974_v50 }
 0x1c0   : > { %v4912_v22 = vpop.permute.xlu0 %4911  ;;  %5032 = vmatprep.mubr.bf16.mxu1 %v8236_v10 }
 0x1c1   : > { %v4926_v24 = vsel %vm4923_vm5, %v4910_v46, %v4912_v22  ;;  %v4927_v25 = vsel %vm4923_vm5, %v4912_v22, %v4914_v21  ;;  %6499 = vrot.lane.b32.xlu1 %v6471_v19, %s8259_s15  ;;  %v6997_v19 = vpack.c.bf16 %v6976_v2, %v6976_v2 }
 0x1c2   : > { %v4942_v27 = vsel %vm280_vm1, %v4926_v24, 0  ;;  %6497 = vrot.lane.b32.xlu0 %v8960_v41, %s8259_s15  ;;  %7668 = vmatprep.subr.msk.bf16.mxu1 %vm280_vm1, %v4927_v25  ;;  %v7683_v24 = vld [vmem:[%s9701_s1 + $0x50] sm:$0xf] }
 0x1c3   : > { %5001 = vmatpush1.bf16.msra.mxu1 %v4942_v27  ;;  %v4918_v15 = vpop.permute.xlu1 %4917  ;;  %7667 = vmatmul.mubr.msk.bf16.vlgmr.msra.gmra.mrb[0].mxu0 %vm276_vm2, %v7665_v23 }
 0x1c4   : > { %v4916_v28 = vpop.permute.xlu0 %4915  ;;  %5073 = vmatprep.mubr.bf16.mxu0 %v8236_v10 }
 0x1c5   : > { %v4928_v29 = vsel %vm4923_vm5, %v4914_v21, %v4916_v28  ;;  %v4929_v30 = vsel %vm4923_vm5, %v4916_v28, %v4918_v15  ;;  %6748 = vrot.lane.b32.xlu1 %v8915_v18, %s8260_s20  ;;  %v6996_v21 = vpack.c.bf16 %v6984_v4, %v6984_v4 }
 0x1c6   : > { %v4948_v5 = vsel %vm280_vm1, %v4928_v29, 0  ;;  %6746 = vrot.lane.b32.xlu0 %v8898_v8, %s8260_s20  ;;  %7670 = vmatprep.subr.msk.bf16.mxu0 %vm280_vm1, %v4929_v30 }
 0x1c7   : > { %5042 = vmatpush1.bf16.msra.mxu0 %v4948_v5  ;;  %v4922_v31 = vpop.permute.xlu1 %4921  ;;  %7669 = vmatmul.mubr.msk.bf16.vlgmr.msra.gmra.mrb[0].mxu1 %vm276_vm2, %v7665_v23 }
 0x1c8   : > { %v4920_v33 = vpop.permute.xlu0 %4919  ;;  %5114 = vmatprep.mubr.bf16.mxu1 %v8236_v10 }
 0x1c9   : > { %v4930_v35 = vsel %vm4923_vm5, %v4918_v15, %v4920_v33  ;;  %v4931_v3 = vsel %vm4923_vm5, %v4920_v33, %v4922_v31  ;;  %6752 = vrot.lane.b32.xlu1 %v8932_v13, %s8260_s20  ;;  %v6972_v13 = vld [vmem:[%s8308_s24 + $0x4] sm:$0xff] }
 0x1ca   : > { %v4954_v8 = vsel %vm280_vm1, %v4930_v35, 0  ;;  %6750 = vrot.lane.b32.xlu0 %v8910_v16, %s8260_s20  ;;  %7672 = vmatprep.subr.msk.bf16.mxu1 %vm280_vm1, %v4931_v3  ;;  %v6981_v6 = vcombine.high %v6972_v13, %v6972_v13 }
 0x1cb   : > { %5083 = vmatpush1.bf16.msra.mxu1 %v4954_v8  ;;  %v5171_v18 = vpop.permute.xlu1 %5170  ;;  %7671 = vmatmul.mubr.msk.bf16.vlgmr.msra.gmra.mrb[4].mxu0 %vm276_vm2, %v7665_v23 }
 0x1cc   : > { %v5169_v36 = vpop.permute.xlu0 %5168  ;;  %5254 = vmatprep.mubr.bf16.mxu0 %v8236_v10  ;;  %v6990_v49 = vpack.c.bf16 %v6981_v6, %v6981_v6 }
 0x1cd   : > { %6756 = vrot.lane.b32.xlu1 %v8948_v34, %s8260_s20  ;;  %v5187_v16 = vsel %vm5186_vm6, %v5169_v36, %v5171_v18  ;;  %v6989_v34 = vpack.c.bf16 %v6972_v13, %v6972_v13 }
 0x1ce   : > { %6754 = vrot.lane.b32.xlu0 %v8926_v26, %s8260_s20  ;;  %v5199_v7 = vsel %vm280_vm1, %v5187_v16, 0  ;;  %v6734_v26 = vpack.c.bf16 %v6713_v38, %v6713_v38 }
 0x1cf   : > { %v5175_v37 = vpop.permute.xlu1 %5174  ;;  %7673 = vmatmul.mubr.msk.bf16.vlgmr.msra.gmra.mrb[4].mxu1 %vm276_vm2, %v7665_v23 }
 0x1d0   : > { %v5173_v39 = vpop.permute.xlu0 %5172  ;;  %5295 = vmatprep.mubr.bf16.mxu1 %v8236_v10 }
 0x1d1   : > { %v5188_v40 = vsel %vm5186_vm6, %v5171_v18, %v5173_v39  ;;  %6760 = vrot.lane.b32.xlu1 %v8960_v41, %s8260_s20  ;;  %v5189_v43 = vsel %vm5186_vm6, %v5173_v39, %v5175_v37  ;;  %v7674_v41 = vld [vmem:[%s9701_s1 + $0x4c] sm:$0xf] }
 0x1d2   : > { %6758 = vrot.lane.b32.xlu0 %v8942_v32, %s8260_s20  ;;  %7675 = vmatprep.subr.msk.bf16.mxu0 %vm280_vm1, %v5188_v40  ;;  %v6991_v32 = vpack.c.bf16 %v6973_v42, %v6973_v42  ;;  %v5205_v48 = vsel %vm280_vm1, %v5189_v43, 0 }
 0x1d3   : > { %5223 = vmatpush1.bf16.msra.mxu0 %v5199_v7  ;;  %v5179_v44 = vpop.permute.xlu1 %5178 }
 0x1d4   : > { %v5177_v45 = vpop.permute.xlu0 %5176 }
 0x1d5   : > { %v5190_v47 = vsel %vm5186_vm6, %v5175_v37, %v5177_v45  ;;  %7009 = vrot.lane.b32.xlu1 %v6989_v34, %s8261_s23  ;;  %v5191_v52 = vsel %vm5186_vm6, %v5177_v45, %v5179_v44 }
 0x1d6   : > { %6762 = vrot.lane.b32.xlu0 %v6734_v26, %s8260_s20  ;;  %7677 = vmatprep.subr.msk.bf16.mxu1 %vm280_vm1, %v5190_v47  ;;  %v5211_v56 = vsel %vm280_vm1, %v5191_v52, 0  ;;  %v7692_v26 = vld [vmem:[%s9701_s1 + $0x54] sm:$0xf] }
 0x1d7   : > { %5264 = vmatpush1.bf16.msra.mxu1 %v5205_v48  ;;  %v5183_v53 = vpop.permute.xlu1 %5182  ;;  %7676 = vmatmul.mubr.msk.bf16.vlgmr.msra.gmra.mrb[0].mxu0 %vm276_vm2, %v7674_v41 }
 0x1d8   : > { %v5181_v51 = vpop.permute.xlu0 %5180  ;;  %5336 = vmatprep.mubr.bf16.mxu0 %v8236_v10 }
 0x1d9   : > { %v5192_v54 = vsel %vm5186_vm6, %v5179_v44, %v5181_v51  ;;  %7013 = vrot.lane.b32.xlu1 %v6991_v32, %s8261_s23  ;;  %v5193_v58 = vsel %vm5186_vm6, %v5181_v51, %v5183_v53 }
 0x1da   : > { %7011 = vrot.lane.b32.xlu0 %v6990_v49, %s8261_s23  ;;  %7679 = vmatprep.subr.msk.bf16.mxu0 %vm280_vm1, %v5192_v54  ;;  %v5217_v0 = vsel %vm280_vm1, %v5193_v58, 0 }
 0x1db   : > { %5305 = vmatpush1.bf16.msra.mxu0 %v5211_v56  ;;  %v5432_v60 = vpop.permute.xlu1 %5431  ;;  %7678 = vmatmul.mubr.msk.bf16.vlgmr.msra.gmra.mrb[0].mxu1 %vm276_vm2, %v7674_v41 }
 0x1dc   : > { %v5185_v61 = vpop.permute.xlu0 %5184  ;;  %5377 = vmatprep.mubr.bf16.mxu1 %v8236_v10 }
 0x1dd   : > { %v5194_v62 = vsel %vm5186_vm6, %v5183_v53, %v5185_v61  ;;  %7017 = vrot.lane.b32.xlu1 %v6993_v55, %s8261_s23 }
 0x1de   : > { %7015 = vrot.lane.b32.xlu0 %v6992_v59, %s8261_s23  ;;  %7681 = vmatprep.subr.msk.bf16.mxu1 %vm280_vm1, %v5194_v62 }
 0x1df   : > { %5346 = vmatpush1.bf16.msra.mxu1 %v5217_v0  ;;  %v5436_v46 = vpop.permute.xlu1 %5435  ;;  %7680 = vmatmul.mubr.msk.bf16.vlgmr.msra.gmra.mrb[4].mxu0 %vm276_vm2, %v7674_v41 }
 0x1e0   : > { %v5434_v9 = vpop.permute.xlu0 %5433  ;;  %5517 = vmatprep.mubr.bf16.mxu0 %v8236_v10 }
 0x1e1   : > { %v5450_v14 = vsel %vm5449_vm7, %v5432_v60, %v5434_v9  ;;  %v5451_v17 = vsel %vm5449_vm7, %v5434_v9, %v5436_v46  ;;  %7021 = vrot.lane.b32.xlu1 %v6995_v11, %s8261_s23 }
 0x1e2   : > { %v5462_v20 = vsel %vm280_vm1, %v5450_v14, 0  ;;  %7019 = vrot.lane.b32.xlu0 %v6994_v1, %s8261_s23  ;;  %7684 = vmatprep.subr.msk.bf16.mxu0 %vm280_vm1, %v5451_v17 }
 0x1e3   : > { %5486 = vmatpush1.bf16.msra.mxu0 %v5462_v20  ;;  %v5440_v22 = vpop.permute.xlu1 %5439  ;;  %7682 = vmatmul.mubr.msk.bf16.vlgmr.msra.gmra.mrb[4].mxu1 %vm276_vm2, %v7674_v41 }
 0x1e4   : > { %v5438_v23 = vpop.permute.xlu0 %5437  ;;  %5558 = vmatprep.mubr.bf16.mxu1 %v8236_v10 }
 0x1e5   : > { %v5452_v25 = vsel %vm5449_vm7, %v5436_v46, %v5438_v23  ;;  %v5453_v27 = vsel %vm5449_vm7, %v5438_v23, %v5440_v22  ;;  %7025 = vrot.lane.b32.xlu1 %v6997_v19, %s8261_s23 }
 0x1e6   : > { %v5468_v15 = vsel %vm280_vm1, %v5452_v25, 0  ;;  %7023 = vrot.lane.b32.xlu0 %v6996_v21, %s8261_s23  ;;  %7686 = vmatprep.subr.msk.bf16.mxu1 %vm280_vm1, %v5453_v27 }
 0x1e7   : > { %5527 = vmatpush1.bf16.msra.mxu1 %v5468_v15  ;;  %v5444_v28 = vpop.permute.xlu1 %5443  ;;  %7685 = vmatmul.mubr.msk.bf16.vlgmr.msra.gmra.mrb[0].mxu0 %vm276_vm2, %v7683_v24 }
 0x1e8   : > { %v5442_v29 = vpop.permute.xlu0 %5441  ;;  %5599 = vmatprep.mubr.bf16.mxu0 %v8236_v10 }
 0x1e9   : > { %v5454_v30 = vsel %vm5449_vm7, %v5440_v22, %v5442_v29  ;;  %v5455_v5 = vsel %vm5449_vm7, %v5442_v29, %v5444_v28 }
 0x1ea   : > { %v5474_v31 = vsel %vm280_vm1, %v5454_v30, 0  ;;  %7688 = vmatprep.subr.msk.bf16.mxu0 %vm280_vm1, %v5455_v5 }
 0x1eb   : > { %5568 = vmatpush1.bf16.msra.mxu0 %v5474_v31  ;;  %v5448_v33 = vpop.permute.xlu1 %5447  ;;  %7687 = vmatmul.mubr.msk.bf16.vlgmr.msra.gmra.mrb[0].mxu1 %vm276_vm2, %v7683_v24 }
 0x1ec   : > { %v5446_v35 = vpop.permute.xlu0 %5445  ;;  %5640 = vmatprep.mubr.bf16.mxu1 %v8236_v10 }
 0x1ed   : > { %v5456_v3 = vsel %vm5449_vm7, %v5444_v28, %v5446_v35  ;;  %v5457_v8 = vsel %vm5449_vm7, %v5446_v35, %v5448_v33  ;;  %v7710_v28 = vld [vmem:[%s9701_s1 + $0x5c] sm:$0xf] }
 0x1ee   : > { %v5480_v18 = vsel %vm280_vm1, %v5456_v3, 0  ;;  %7690 = vmatprep.subr.msk.bf16.mxu1 %vm280_vm1, %v5457_v8 }
 0x1ef   : > { %5609 = vmatpush1.bf16.msra.mxu1 %v5480_v18  ;;  %v5697_v36 = vpop.permute.xlu1 %5696  ;;  %7689 = vmatmul.mubr.msk.bf16.vlgmr.msra.gmra.mrb[4].mxu0 %vm276_vm2, %v7683_v24 }
 0x1f0   : > { %v5695_v13 = vpop.permute.xlu0 %5694  ;;  %5780 = vmatprep.mubr.bf16.mxu0 %v8236_v10 }
 0x1f1   : > { %v5713_v16 = vsel %vm5712_vm8, %v5695_v13, %v5697_v36 }
 0x1f2   : > { %v5725_v40 = vsel %vm280_vm1, %v5713_v16, 0 }
 0x1f3   : > { %v5701_v37 = vpop.permute.xlu1 %5700  ;;  %7691 = vmatmul.mubr.msk.bf16.vlgmr.msra.gmra.mrb[4].mxu1 %vm276_vm2, %v7683_v24 }
 0x1f4   : > { %v5699_v38 = vpop.permute.xlu0 %5698  ;;  %5821 = vmatprep.mubr.bf16.mxu1 %v8236_v10 }
 0x1f5   : > { %v5714_v39 = vsel %vm5712_vm8, %v5697_v36, %v5699_v38  ;;  %v5715_v34 = vsel %vm5712_vm8, %v5699_v38, %v5701_v37 }
 0x1f6   : > { %7693 = vmatprep.subr.msk.bf16.mxu0 %vm280_vm1, %v5714_v39  ;;  %v5731_v43 = vsel %vm280_vm1, %v5715_v34, 0 }
 0x1f7   : > { %5749 = vmatpush1.bf16.msra.mxu0 %v5725_v40  ;;  %v5705_v7 = vpop.permute.xlu1 %5704 }
 0x1f8   : > { %v5703_v42 = vpop.permute.xlu0 %5702 }
 0x1f9   : > { %v5716_v6 = vsel %vm5712_vm8, %v5701_v37, %v5703_v42  ;;  %v5717_v44 = vsel %vm5712_vm8, %v5703_v42, %v5705_v7  ;;  %v7719_v42 = vld [vmem:[%s9701_s1 + $0x60] sm:$0xf] }
 0x1fa   : > { %7695 = vmatprep.subr.msk.bf16.mxu1 %vm280_vm1, %v5716_v6  ;;  %7694 = vmatmul.mubr.msk.bf16.vlgmr.msra.gmra.mrb[0].mxu0 %vm276_vm2, %v7692_v26  ;;  %v5737_v32 = vsel %vm280_vm1, %v5717_v44, 0 }
 0x1fb   : > { %5790 = vmatpush1.bf16.msra.mxu1 %v5731_v43  ;;  %v5709_v45 = vpop.permute.xlu1 %5708  ;;  %5862 = vmatprep.mubr.bf16.mxu0 %v8236_v10 }
 0x1fc   : > { %v5707_v41 = vpop.permute.xlu0 %5706 }
 0x1fd   : > { %v5718_v47 = vsel %vm5712_vm8, %v5705_v7, %v5707_v41  ;;  %v5719_v48 = vsel %vm5712_vm8, %v5707_v41, %v5709_v45 }
 0x1fe   : > { %7697 = vmatprep.subr.msk.bf16.mxu0 %vm280_vm1, %v5718_v47  ;;  %7696 = vmatmul.mubr.msk.bf16.vlgmr.msra.gmra.mrb[0].mxu1 %vm276_vm2, %v7692_v26  ;;  %v5743_v52 = vsel %vm280_vm1, %v5719_v48, 0 }
 0x1ff   : > { %5831 = vmatpush1.bf16.msra.mxu0 %v5737_v32  ;;  %v5958_v49 = vpop.permute.xlu1 %5957  ;;  %5903 = vmatprep.mubr.bf16.mxu1 %v8236_v10 }
 0x200   : > { %v5711_v50 = vpop.permute.xlu0 %5710 }
 0x201   : > { %v5720_v12 = vsel %vm5712_vm8, %v5709_v45, %v5711_v50 }
 0x202   : > { %7699 = vmatprep.subr.msk.bf16.mxu1 %vm280_vm1, %v5720_v12  ;;  %7698 = vmatmul.mubr.msk.bf16.vlgmr.msra.gmra.mrb[4].mxu0 %vm276_vm2, %v7692_v26 }
 0x203   : > { %5872 = vmatpush1.bf16.msra.mxu1 %v5743_v52  ;;  %v5962_v53 = vpop.permute.xlu1 %5961  ;;  %6043 = vmatprep.mubr.bf16.mxu0 %v8236_v10 }
 0x204   : > { %v5960_v51 = vpop.permute.xlu0 %5959 }
 0x205   : > { %v5976_v54 = vsel %vm5975_vm9, %v5958_v49, %v5960_v51  ;;  %v5977_v55 = vsel %vm5975_vm9, %v5960_v51, %v5962_v53 }
 0x206   : > { %v5988_v56 = vsel %vm280_vm1, %v5976_v54, 0  ;;  %7702 = vmatprep.subr.msk.bf16.mxu0 %vm280_vm1, %v5977_v55  ;;  %7700 = vmatmul.mubr.msk.bf16.vlgmr.msra.gmra.mrb[4].mxu1 %vm276_vm2, %v7692_v26 }
 0x207   : > { %6012 = vmatpush1.bf16.msra.mxu0 %v5988_v56  ;;  %v5966_v59 = vpop.permute.xlu1 %5965  ;;  %6084 = vmatprep.mubr.bf16.mxu1 %v8236_v10 }
 0x208   : > { %v5964_v63 = vpop.permute.xlu0 %5963 }
 0x209   : > { %v5978_v58 = vsel %vm5975_vm9, %v5962_v53, %v5964_v63  ;;  %v5979_v60 = vsel %vm5975_vm9, %v5964_v63, %v5966_v59 }
 0x20a   : > { %v5994_v61 = vsel %vm280_vm1, %v5978_v58, 0  ;;  %7704 = vmatprep.subr.msk.bf16.mxu1 %vm280_vm1, %v5979_v60  ;;  %7703 = vmatmul.mubr.msk.bf16.vlgmr.msra.gmra.mrb[0].mxu0 %vm276_vm2, %v7701_v57 }
 0x20b   : > { %6053 = vmatpush1.bf16.msra.mxu1 %v5994_v61  ;;  %v5970_v62 = vpop.permute.xlu1 %5969  ;;  %6125 = vmatprep.mubr.bf16.mxu0 %v8236_v10 }
 0x20c   : > { %v5968_v11 = vpop.permute.xlu0 %5967 }
 0x20d   : > { %v5980_v0 = vsel %vm5975_vm9, %v5966_v59, %v5968_v11  ;;  %v5981_v1 = vsel %vm5975_vm9, %v5968_v11, %v5970_v62 }
 0x20e   : > { %v6000_v2 = vsel %vm280_vm1, %v5980_v0, 0  ;;  %7706 = vmatprep.subr.msk.bf16.mxu0 %vm280_vm1, %v5981_v1  ;;  %7705 = vmatmul.mubr.msk.bf16.vlgmr.msra.gmra.mrb[0].mxu1 %vm276_vm2, %v7701_v57 }
 0x20f   : > { %6094 = vmatpush1.bf16.msra.mxu0 %v6000_v2  ;;  %v5974_v4 = vpop.permute.xlu1 %5973  ;;  %6166 = vmatprep.mubr.bf16.mxu1 %v8236_v10 }
 0x210   : > { %v5972_v46 = vpop.permute.xlu0 %5971 }
 0x211   : > { %v5982_v9 = vsel %vm5975_vm9, %v5970_v62, %v5972_v46  ;;  %v5983_v14 = vsel %vm5975_vm9, %v5972_v46, %v5974_v4  ;;  %v7728_v62 = vld [vmem:[%s9701_s1 + $0x64] sm:$0xf] }
 0x212   : > { %v6006_v17 = vsel %vm280_vm1, %v5982_v9, 0  ;;  %7708 = vmatprep.subr.msk.bf16.mxu1 %vm280_vm1, %v5983_v14  ;;  %7707 = vmatmul.mubr.msk.bf16.vlgmr.msra.gmra.mrb[4].mxu0 %vm276_vm2, %v7701_v57 }
 0x213   : > { %6135 = vmatpush1.bf16.msra.mxu1 %v6006_v17  ;;  %v6223_v19 = vpop.permute.xlu1 %6222  ;;  %6306 = vmatprep.mubr.bf16.mxu0 %v8236_v10 }
 0x214   : > { %v6221_v20 = vpop.permute.xlu0 %6220 }
 0x215   : > { %v6239_v21 = vsel %vm6238_vm10, %v6221_v20, %v6223_v19 }
 0x216   : > { %7709 = vmatmul.mubr.msk.bf16.vlgmr.msra.gmra.mrb[4].mxu1 %vm276_vm2, %v7701_v57  ;;  %v6251_v25 = vsel %vm280_vm1, %v6239_v21, 0 }
 0x217   : > { %v6227_v22 = vpop.permute.xlu1 %6226  ;;  %6347 = vmatprep.mubr.bf16.mxu1 %v8236_v10 }
 0x218   : > { %v6225_v23 = vpop.permute.xlu0 %6224 }
 0x219   : > { %v6240_v24 = vsel %vm6238_vm10, %v6223_v19, %v6225_v23  ;;  %v6241_v27 = vsel %vm6238_vm10, %v6225_v23, %v6227_v22 }
 0x21a   : > { %7711 = vmatprep.subr.msk.bf16.mxu0 %vm280_vm1, %v6240_v24  ;;  %v6257_v5 = vsel %vm280_vm1, %v6241_v27, 0 }
 0x21b   : > { %6275 = vmatpush1.bf16.msra.mxu0 %v6251_v25  ;;  %v6231_v15 = vpop.permute.xlu1 %6230 }
 0x21c   : > { %v6229_v29 = vpop.permute.xlu0 %6228 }
 0x21d   : > { %v6242_v30 = vsel %vm6238_vm10, %v6227_v22, %v6229_v29  ;;  %v6243_v31 = vsel %vm6238_vm10, %v6229_v29, %v6231_v15  ;;  %v7737_v29 = vld [vmem:[%s9701_s1 + $0x68] sm:$0xf] }
 0x21e   : > { %7713 = vmatprep.subr.msk.bf16.mxu1 %vm280_vm1, %v6242_v30  ;;  %7712 = vmatmul.mubr.msk.bf16.vlgmr.msra.gmra.mrb[0].mxu0 %vm276_vm2, %v7710_v28  ;;  %v6263_v8 = vsel %vm280_vm1, %v6243_v31, 0 }
 0x21f   : > { %6316 = vmatpush1.bf16.msra.mxu1 %v6257_v5  ;;  %v6235_v33 = vpop.permute.xlu1 %6234  ;;  %6388 = vmatprep.mubr.bf16.mxu0 %v8236_v10 }
 0x220   : > { %v6233_v35 = vpop.permute.xlu0 %6232 }
 0x221   : > { %v6244_v3 = vsel %vm6238_vm10, %v6231_v15, %v6233_v35  ;;  %v6245_v18 = vsel %vm6238_vm10, %v6233_v35, %v6235_v33 }
 0x222   : > { %7715 = vmatprep.subr.msk.bf16.mxu0 %vm280_vm1, %v6244_v3  ;;  %7714 = vmatmul.mubr.msk.bf16.vlgmr.msra.gmra.mrb[0].mxu1 %vm276_vm2, %v7710_v28  ;;  %v6269_v37 = vsel %vm280_vm1, %v6245_v18, 0 }
 0x223   : > { %6357 = vmatpush1.bf16.msra.mxu0 %v6263_v8  ;;  %v6484_v36 = vpop.permute.xlu1 %6483  ;;  %6429 = vmatprep.mubr.bf16.mxu1 %v8236_v10 }
 0x224   : > { %v6237_v13 = vpop.permute.xlu0 %6236 }
 0x225   : > { %v6246_v16 = vsel %vm6238_vm10, %v6235_v33, %v6237_v13 }
 0x226   : > { %7717 = vmatprep.subr.msk.bf16.mxu1 %vm280_vm1, %v6246_v16  ;;  %7716 = vmatmul.mubr.msk.bf16.vlgmr.msra.gmra.mrb[4].mxu0 %vm276_vm2, %v7710_v28 }
 0x227   : > { %6398 = vmatpush1.bf16.msra.mxu1 %v6269_v37  ;;  %v6488_v38 = vpop.permute.xlu1 %6487  ;;  %6569 = vmatprep.mubr.bf16.mxu0 %v8236_v10 }
 0x228   : > { %v6486_v39 = vpop.permute.xlu0 %6485 }
 0x229   : > { %v6502_v40 = vsel %vm6501_vm11, %v6484_v36, %v6486_v39  ;;  %v6503_v34 = vsel %vm6501_vm11, %v6486_v39, %v6488_v38 }
 0x22a   : > { %v6514_v7 = vsel %vm280_vm1, %v6502_v40, 0  ;;  %7720 = vmatprep.subr.msk.bf16.mxu0 %vm280_vm1, %v6503_v34  ;;  %7718 = vmatmul.mubr.msk.bf16.vlgmr.msra.gmra.mrb[4].mxu1 %vm276_vm2, %v7710_v28 }
 0x22b   : > { %6538 = vmatpush1.bf16.msra.mxu0 %v6514_v7  ;;  %v6492_v26 = vpop.permute.xlu1 %6491  ;;  %6610 = vmatprep.mubr.bf16.mxu1 %v8236_v10 }
 0x22c   : > { %v6490_v6 = vpop.permute.xlu0 %6489 }
 0x22d   : > { %v6504_v43 = vsel %vm6501_vm11, %v6488_v38, %v6490_v6  ;;  %v6505_v44 = vsel %vm6501_vm11, %v6490_v6, %v6492_v26 }
 0x22e   : > { %v6520_v45 = vsel %vm280_vm1, %v6504_v43, 0  ;;  %7722 = vmatprep.subr.msk.bf16.mxu1 %vm280_vm1, %v6505_v44  ;;  %7721 = vmatmul.mubr.msk.bf16.vlgmr.msra.gmra.mrb[0].mxu0 %vm276_vm2, %v7719_v42 }
 0x22f   : > { %6579 = vmatpush1.bf16.msra.mxu1 %v6520_v45  ;;  %v6496_v41 = vpop.permute.xlu1 %6495  ;;  %6651 = vmatprep.mubr.bf16.mxu0 %v8236_v10 }
 0x230   : > { %v6494_v47 = vpop.permute.xlu0 %6493 }
 0x231   : > { %v6506_v32 = vsel %vm6501_vm11, %v6492_v26, %v6494_v47  ;;  %v6507_v48 = vsel %vm6501_vm11, %v6494_v47, %v6496_v41 }
 0x232   : > { %v6526_v49 = vsel %vm280_vm1, %v6506_v32, 0  ;;  %7724 = vmatprep.subr.msk.bf16.mxu0 %vm280_vm1, %v6507_v48  ;;  %7723 = vmatmul.mubr.msk.bf16.vlgmr.msra.gmra.mrb[0].mxu1 %vm276_vm2, %v7719_v42 }
 0x233   : > { %6620 = vmatpush1.bf16.msra.mxu0 %v6526_v49  ;;  %v6500_v50 = vpop.permute.xlu1 %6499  ;;  %6692 = vmatprep.mubr.bf16.mxu1 %v8236_v10 }
 0x234   : > { %v6498_v12 = vpop.permute.xlu0 %6497 }
 0x235   : > { %v6508_v52 = vsel %vm6501_vm11, %v6496_v41, %v6498_v12  ;;  %v6509_v53 = vsel %vm6501_vm11, %v6498_v12, %v6500_v50  ;;  %v7268_v12 = vlaneseq (!%p7748_p4) }
 0x236   : > { %v6532_v51 = vsel %vm280_vm1, %v6508_v52, 0  ;;  %7726 = vmatprep.subr.msk.bf16.mxu1 %vm280_vm1, %v6509_v53  ;;  %7725 = vmatmul.mubr.msk.bf16.vlgmr.msra.gmra.mrb[4].mxu0 %vm276_vm2, %v7719_v42  ;;  %v7266_v53 = vld [vmem:[%s9702_s2] sm:$0xff] (!%p7748_p4) }
 0x237   : > { %6661 = vmatpush1.bf16.msra.mxu1 %v6532_v51  ;;  %v6749_v54 = vpop.permute.xlu1 %6748  ;;  %6832 = vmatprep.mubr.bf16.mxu0 %v8236_v10  ;;  %v7269_v52 = vshrl.u32 (!%p7748_p4), %v7268_v12, 7 }
 0x238   : > { %v6747_v55 = vpop.permute.xlu0 %6746 }
 0x239   : > { %v6765_v56 = vsel %vm6764_vm12, %v6747_v55, %v6749_v54  ;;  %v7270_v55 = vsub.s32 (!%p7748_p4), 0, %v7269_v52 }
 0x23a   : > { %7727 = vmatmul.mubr.msk.bf16.vlgmr.msra.gmra.mrb[4].mxu1 %vm276_vm2, %v7719_v42  ;;  %v6777_v58 = vsel %vm280_vm1, %v6765_v56, 0  ;;  %v7274_v56 = vsub.s32 (!%p7748_p4), 1, %v7269_v52 }
 0x23b   : > { %v6753_v59 = vpop.permute.xlu1 %6752  ;;  %6873 = vmatprep.mubr.bf16.mxu1 %v8236_v10 }
 0x23c   : > { %v6751_v57 = vpop.permute.xlu0 %6750 }
 0x23d   : > { %v6766_v63 = vsel %vm6764_vm12, %v6749_v54, %v6751_v57  ;;  %v6767_v60 = vsel %vm6764_vm12, %v6751_v57, %v6753_v59  ;;  %v7282_v57 = vsub.s32 (!%p7748_p4), 3, %v7269_v52 }
 0x23e   : > { %7729 = vmatprep.subr.msk.bf16.mxu0 %vm280_vm1, %v6766_v63  ;;  %v6783_v1 = vsel %vm280_vm1, %v6767_v60, 0  ;;  %v7286_v60 = vsub.s32 (!%p7748_p4), 4, %v7269_v52 }
 0x23f   : > { %6801 = vmatpush1.bf16.msra.mxu0 %v6777_v58  ;;  %v6757_v61 = vpop.permute.xlu1 %6756 }
 0x240   : > { %v6755_v11 = vpop.permute.xlu0 %6754 }
 0x241   : > { %v6768_v0 = vsel %vm6764_vm12, %v6753_v59, %v6755_v11  ;;  %v6769_v2 = vsel %vm6764_vm12, %v6755_v11, %v6757_v61  ;;  %v7278_v59 = vsub.s32 (!%p7748_p4), 2, %v7269_v52  ;;  %v7298_v11 = vsub.s32 (!%p7748_p4), 7, %v7269_v52 }
 0x242   : > { %7730 = vmatmul.mubr.msk.bf16.vlgmr.msra.gmra.mrb[0].mxu0 %vm276_vm2, %v7728_v62  ;;  %7731 = vmatprep.subr.msk.bf16.mxu1 %vm280_vm1, %v6768_v0  ;;  %v6789_v14 = vsel %vm280_vm1, %v6769_v2, 0  ;;  %v7275_v2 = vrot.slane (!%p7748_p4), %v7266_v53, %v7274_v56 }
 0x243   : > { %6842 = vmatpush1.bf16.msra.mxu1 %v6783_v1  ;;  %v6761_v4 = vpop.permute.xlu1 %6760  ;;  %6914 = vmatprep.mubr.bf16.mxu0 %v8236_v10  ;;  %v7271_v1 = vrot.slane (!%p7748_p4), %v7266_v53, %v7270_v55 }
 0x244   : > { %v6759_v46 = vpop.permute.xlu0 %6758 }
 0x245   : > { %v6770_v9 = vsel %vm6764_vm12, %v6757_v61, %v6759_v46  ;;  %v6771_v17 = vsel %vm6764_vm12, %v6759_v46, %v6761_v4  ;;  %v7290_v61 = vsub.s32 (!%p7748_p4), 5, %v7269_v52  ;;  %v7283_v46 = vrot.slane (!%p7748_p4), %v7266_v53, %v7282_v57 }
 0x246   : > { %7732 = vmatmul.mubr.msk.bf16.vlgmr.msra.gmra.mrb[0].mxu1 %vm276_vm2, %v7728_v62  ;;  %7733 = vmatprep.subr.msk.bf16.mxu0 %vm280_vm1, %v6770_v9  ;;  %v6795_v22 = vsel %vm280_vm1, %v6771_v17, 0  ;;  %v7287_v9 = vrot.slane (!%p7748_p4), %v7266_v53, %v7286_v60 }
 0x247   : > { %6883 = vmatpush1.bf16.msra.mxu0 %v6789_v14  ;;  %v7010_v19 = vpop.permute.xlu1 %7009  ;;  %6955 = vmatprep.mubr.bf16.mxu1 %v8236_v10  ;;  %v7291_v14 = vrot.slane (!%p7748_p4), %v7266_v53, %v7290_v61 }
 0x248   : > { %v6763_v20 = vpop.permute.xlu0 %6762 }
 0x249   : > { %v6772_v21 = vsel %vm6764_vm12, %v6761_v4, %v6763_v20  ;;  %v7279_v4 = vrot.slane (!%p7748_p4), %v7266_v53, %v7278_v59 }
 0x24a   : > { %7734 = vmatmul.mubr.msk.bf16.vlgmr.msra.gmra.mrb[4].mxu0 %vm276_vm2, %v7728_v62  ;;  %7735 = vmatprep.subr.msk.bf16.mxu1 %vm280_vm1, %v6772_v21 }
 0x24b   : > { %6924 = vmatpush1.bf16.msra.mxu1 %v6795_v22  ;;  %v7014_v23 = vpop.permute.xlu1 %7013  ;;  %7095 = vmatprep.mubr.bf16.mxu0 %v8236_v10 }
 0x24c   : > { %v7012_v24 = vpop.permute.xlu0 %7011 }
 0x24d   : > { %v7028_v25 = vsel %vm7027_vm13, %v7010_v19, %v7012_v24  ;;  %v7029_v27 = vsel %vm7027_vm13, %v7012_v24, %v7014_v23 }
 0x24e   : > { %v7040_v15 = vsel %vm280_vm1, %v7028_v25, 0  ;;  %7736 = vmatmul.mubr.msk.bf16.vlgmr.msra.gmra.mrb[4].mxu1 %vm276_vm2, %v7728_v62  ;;  %7738 = vmatprep.subr.msk.bf16.mxu0 %vm280_vm1, %v7029_v27  ;;  %v7294_v62 = vsub.s32 (!%p7748_p4), 6, %v7269_v52  ;;  %v7299_v25 = vrot.slane (!%p7748_p4), %v7266_v53, %v7298_v11 }
 0x24f   : > { %7064 = vmatpush1.bf16.msra.mxu0 %v7040_v15  ;;  %v7018_v28 = vpop.permute.xlu1 %7017  ;;  %7136 = vmatprep.mubr.bf16.mxu1 %v8236_v10 }
 0x250   : > { %v7016_v30 = vpop.permute.xlu0 %7015  ;;  %v7295_v24 = vrot.slane (!%p7748_p4), %v7266_v53, %v7294_v62 }
 0x251   : > { %v7030_v5 = vsel %vm7027_vm13, %v7014_v23, %v7016_v30  ;;  %v7031_v31 = vsel %vm7027_vm13, %v7016_v30, %v7018_v28 }
 0x252   : > { %v7046_v33 = vsel %vm280_vm1, %v7030_v5, 0  ;;  %7739 = vmatmul.mubr.msk.bf16.vlgmr.msra.gmra.mrb[0].mxu0 %vm276_vm2, %v7737_v29  ;;  %7740 = vmatprep.subr.msk.bf16.mxu1 %vm280_vm1, %v7031_v31 }
 0x253   : > { %7105 = vmatpush1.bf16.msra.mxu1 %v7046_v33  ;;  %v7022_v35 = vpop.permute.xlu1 %7021  ;;  %7177 = vmatprep.mubr.bf16.mxu0 %v8236_v10 }
 0x254   : > { %v7020_v3 = vpop.permute.xlu0 %7019 }
 0x255   : > { %v7032_v8 = vsel %vm7027_vm13, %v7018_v28, %v7020_v3  ;;  %v7033_v18 = vsel %vm7027_vm13, %v7020_v3, %v7022_v35 }
 0x256   : > { %v7052_v36 = vsel %vm280_vm1, %v7032_v8, 0  ;;  %7741 = vmatmul.mubr.msk.bf16.vlgmr.msra.gmra.mrb[0].mxu1 %vm276_vm2, %v7737_v29  ;;  %7742 = vmatprep.subr.msk.bf16.mxu0 %vm280_vm1, %v7033_v18 }
 0x257   : > { %7146 = vmatpush1.bf16.msra.mxu0 %v7052_v36  ;;  %v7026_v13 = vpop.permute.xlu1 %7025  ;;  %7218 = vmatprep.mubr.bf16.mxu1 %v8236_v10 }
 0x258   : > { %v7024_v16 = vpop.permute.xlu0 %7023 }
 0x259   : > { %v7034_v37 = vsel %vm7027_vm13, %v7022_v35, %v7024_v16  ;;  %v7035_v38 = vsel %vm7027_vm13, %v7024_v16, %v7026_v13 }
 0x25a   : > { %v7058_v39 = vsel %vm280_vm1, %v7034_v37, 0  ;;  %7743 = vmatmul.mubr.msk.bf16.vlgmr.msra.gmra.mrb[4].mxu0 %vm276_vm2, %v7737_v29  ;;  %7744 = vmatprep.subr.msk.bf16.mxu1 %vm280_vm1, %v7035_v38 }
 0x25b   : > { %7187 = vmatpush1.bf16.msra.mxu1 %v7058_v39 }
 0x25e   : > { %7745 = vmatmul.mubr.msk.bf16.vlgmr.msra.gmra.mrb[4].mxu1 %vm276_vm2, %v7737_v29 }
 0x325   : > { %v7097_v10 = vpop.f32.mrb[0].mxu0 }
 0x326   : > { %7238 = vst [vmem:[%s7237_s16] sm:$0xff] %v7097_v10  ;;  %v7099_v40 = vpop.f32.mrb[1].mxu0 }
 0x327   : > { %7239 = vst [vmem:[%s7237_s16 + $0x8] sm:$0xff] %v7099_v40  ;;  %v7101_v34 = vpop.f32.mrb[2].mxu0 }
 0x328   : > { %v7102_v7 = vpop.f32.mrb[3].mxu0 }
 0x329   : > { %v7138_v26 = vpop.f32.mrb[0].mxu1 }
 0x32a   : > { %7240 = vst [vmem:[%s7237_s16 + $0x10] sm:$0xff] %v7138_v26  ;;  %v7140_v42 = vpop.f32.mrb[1].mxu1 }
 0x32b   : > { %7241 = vst [vmem:[%s7237_s16 + $0x18] sm:$0xff] %v7140_v42  ;;  %v7142_v6 = vpop.f32.mrb[2].mxu1 }
 0x32c   : > { %v7143_v43 = vpop.f32.mrb[3].mxu1 }
 0x32d   : > { %v7179_v44 = vpop.f32.mrb[4].mxu0 }
 0x32e   : > { %7242 = vst [vmem:[%s7237_s16 + $0x20] sm:$0xff] %v7179_v44  ;;  %v7181_v45 = vpop.f32.mrb[5].mxu0  ;;  %7249 = sbr.rel (%p7748_p4) target bundleno = 1169 (0x491), region = 44 }
 0x32f   : > { %7243 = vst [vmem:[%s7237_s16 + $0x28] sm:$0xff] %v7181_v45  ;;  %v7183_v41 = vpop.f32.mrb[6].mxu0 }
 0x330   : > { %v7184_v47 = vpop.f32.mrb[7].mxu0 }
 0x331   : > { %v7220_v32 = vpop.f32.mrb[4].mxu1 }
 0x332   : > { %7244 = vst [vmem:[%s7237_s16 + $0x30] sm:$0xff] %v7220_v32  ;;  %v7222_v48 = vpop.f32.mrb[5].mxu1 }
 0x333   : > { %7245 = vst [vmem:[%s7237_s16 + $0x38] sm:$0xff] %v7222_v48  ;;  %v7224_v49 = vpop.f32.mrb[6].mxu1 }
 0x334   : > { %v7225_v50 = vpop.f32.mrb[7].mxu1 }
 0x33a   : > { %v9518_v51 = vld [vmem:[%s9705_s5] sm:$0xff]  ;;  %v9523_v54 = vld [vmem:[%s9705_s5 + $0x8] sm:$0xff]  ;;  %v9528_v63 = vld [vmem:[%s9705_s5 + $0x10] sm:$0xff] }
 0x33b   : > { %v9533_v58 = vld [vmem:[%s9705_s5 + $0x18] sm:$0xff]  ;;  %v9538_v0 = vld [vmem:[%s9705_s5 + $0x20] sm:$0xff]  ;;  %v9543_v17 = vld [vmem:[%s9705_s5 + $0x28] sm:$0xff]  ;;  %v7308_v19 = vmul.f32 %v7271_v1, %v9518_v51  ;;  %v7309_v20 = vmul.f32 %v7275_v2, %v9523_v54  ;;  %v7310_v21 = vmul.f32 %v7279_v4, %v9528_v63 }
 0x33c   : > { %v7311_v22 = vmul.f32 %v7283_v46, %v9533_v58  ;;  %v9552_v23 = vld [vmem:[%s9705_s5 + $0x30] sm:$0xff]  ;;  %v7312_v27 = vmul.f32 %v7287_v9, %v9538_v0  ;;  %v9558_v15 = vld [vmem:[%s9705_s5 + $0x40] sm:$0xff]  ;;  %v9563_v28 = vld [vmem:[%s9705_s5 + $0x38] sm:$0xff]  ;;  %v7313_v3 = vmul.f32 %v7291_v14, %v9543_v17 }
 0x33d   : > { %v7324_v29 = vadd.f32 %v7309_v20, %v7308_v19  ;;  %v7343_v30 = vmul.f32 %v7308_v19, %v9518_v51  ;;  %v7344_v5 = vmul.f32 %v7309_v20, %v9523_v54  ;;  %v7345_v31 = vmul.f32 %v7310_v21, %v9528_v63  ;;  %v9571_v33 = vld [vmem:[%s9705_s5 + $0x48] sm:$0xff]  ;;  %v9576_v35 = vld [vmem:[%s9705_s5 + $0x50] sm:$0xff]  ;;  %v9582_v8 = vld [vmem:[%s9705_s5 + $0x58] sm:$0xff] }
 0x33e   : > { %v7346_v36 = vmul.f32 %v7311_v22, %v9533_v58  ;;  %v7316_v16 = vmul.f32 %v7271_v1, %v9558_v15  ;;  %v7314_v37 = vmul.f32 %v7295_v24, %v9552_v23  ;;  %v7315_v38 = vmul.f32 %v7299_v25, %v9563_v28  ;;  %v9591_v39 = vld [vmem:[%s9705_s5 + $0x60] sm:$0xff]  ;;  %v9599_v42 = vld [vmem:[%s9705_s5 + $0x68] sm:$0xff]  ;;  %v9608_v48 = vld [vmem:[%s9705_s5 + $0x70] sm:$0xff] }
 0x33f   : > { %v7325_v18 = vadd.f32 %v7324_v29, %v7310_v21  ;;  %v7359_v13 = vadd.f32 %v7344_v5, %v7343_v30  ;;  %v7317_v10 = vmul.f32 %v7275_v2, %v9571_v33  ;;  %v7318_v40 = vmul.f32 %v7279_v4, %v9576_v35  ;;  %v9617_v59 = vld [vmem:[%s9705_s5 + $0x78] sm:$0xff] }
 0x340   : > { %v7347_v7 = vmul.f32 %v7312_v27, %v9538_v0  ;;  %v7319_v6 = vmul.f32 %v7283_v46, %v9582_v8  ;;  %v7348_v43 = vmul.f32 %v7313_v3, %v9543_v17  ;;  %v7351_v45 = vmul.f32 %v7316_v16, %v9558_v15 }
 0x341   : > { %v7326_v34 = vadd.f32 %v7325_v18, %v7311_v22  ;;  %v7360_v26 = vadd.f32 %v7359_v13, %v7345_v31  ;;  %v7333_v44 = vadd.f32 %v7317_v10, %v7316_v16  ;;  %v7352_v41 = vmul.f32 %v7317_v10, %v9571_v33 }
 0x342   : > { %v7320_v49 = vmul.f32 %v7287_v9, %v9591_v39  ;;  %v7353_v50 = vmul.f32 %v7318_v40, %v9576_v35  ;;  %v7349_v12 = vmul.f32 %v7314_v37, %v9552_v23  ;;  %v7321_v52 = vmul.f32 %v7291_v14, %v9599_v42 }
 0x343   : > { %v7327_v47 = vadd.f32 %v7326_v34, %v7312_v27  ;;  %v7361_v32 = vadd.f32 %v7360_v26, %v7346_v36  ;;  %v7334_v53 = vadd.f32 %v7333_v44, %v7318_v40  ;;  %v7354_v57 = vmul.f32 %v7319_v6, %v9582_v8 }
 0x344   : > { %v7368_v60 = vadd.f32 %v7352_v41, %v7351_v45  ;;  %v7350_v61 = vmul.f32 %v7315_v38, %v9563_v28  ;;  %v7322_v62 = vmul.f32 %v7295_v24, %v9608_v48  ;;  %v7355_v4 = vmul.f32 %v7320_v49, %v9591_v39 }
 0x345   : > { %v7328_v55 = vadd.f32 %v7327_v47, %v7313_v3  ;;  %v7362_v56 = vadd.f32 %v7361_v32, %v7347_v7  ;;  %v7335_v11 = vadd.f32 %v7334_v53, %v7319_v6  ;;  %v7323_v9 = vmul.f32 %v7299_v25, %v9617_v59 }
 0x346   : > { %v7369_v46 = vadd.f32 %v7368_v60, %v7353_v50  ;;  %v7356_v21 = vmul.f32 %v7321_v52, %v9599_v42  ;;  %v7357_v30 = vmul.f32 %v7322_v62, %v9608_v48  ;;  %v8262_v13 = vmov 0  }
 0x347   : > { %v7329_v1 = vadd.f32 %v7328_v55, %v7314_v37  ;;  %v7363_v2 = vadd.f32 %v7362_v56, %v7348_v43  ;;  %v7336_v14 = vadd.f32 %v7335_v11, %v7320_v49  ;;  %v7358_v31 = vmul.f32 %v7323_v9, %v9617_v59  ;;  %8223 = vset.pattern.permute.xlu0 %v8262_v13  ;;  %v7392_v55 = vld [vmem:[%s9704_s4] sm:$0xff] }
 0x348   : > { %v7370_v22 = vadd.f32 %v7369_v46, %v7354_v57  ;;  %8224 = vset.pattern.permute.xlu1 %v8262_v13 }
 0x349   : > { %v7330_v19 = vadd.f32 %v7329_v1, %v7315_v38  ;;  %v7364_v20 = vadd.f32 %v7363_v2, %v7349_v12  ;;  %v7337_v27 = vadd.f32 %v7336_v14, %v7321_v52  ;;  %v7390_v12 = vld [vmem:[%s9703_s3] sm:$0xff] }
 0x34a   : > { %v7371_v24 = vadd.f32 %v7370_v22, %v7355_v4 }
 0x34b   : > { %7331 = vadd.xlane.f32.xlu0 %v7330_v19  ;;  %v7365_v29 = vadd.f32 %v7364_v20, %v7350_v61  ;;  %v7338_v5 = vadd.f32 %v7337_v27, %v7322_v62 }
 0x34c   : > { %v7372_v3 = vadd.f32 %v7371_v24, %v7356_v21 }
 0x34d   : > { %7366 = vadd.xlane.f32.xlu1 %v7365_v29  ;;  %v7339_v18 = vadd.f32 %v7338_v5, %v7323_v9 }
 0x34e   : > { %v7373_v36 = vadd.f32 %v7372_v3, %v7357_v30 }
 0x34f   : > { %7340 = vadd.xlane.f32.xlu0 %v7339_v18 }
 0x350   : > { %v7374_v25 = vadd.f32 %v7373_v36, %v7358_v31 }
 0x352   : > { %7375 = vadd.xlane.f32.xlu1 %v7374_v25 }
 0x3d8   : > { %v7332_v16 = vpop.xlane.xlu0 %7331 }
 0x3da   : > { %v7367_v37 = vpop.xlane.xlu1 %7366 }
 0x3dc   : > { %v7341_v38 = vpop.xlane.xlu0 %7340 }
 0x3dd   : > { %v7342_v10 = vadd.f32 %v7341_v38, %v7332_v16 }
 0x3df   : > { %v7378_v40 = vmul.f32 0.0009765625, %v7342_v10  ;;  %v7376_v34 = vpop.xlane.xlu1 %7375 }
 0x3e0   : > { %v7377_v7 = vadd.f32 %v7376_v34, %v7367_v37 }
 0x3e1   : > { %v7380_v26 = vmul.f32 %v7378_v40, %v7378_v40 }
 0x3e2   : > { %v7379_v6 = vmul.f32 0.0009765625, %v7377_v7 }
 0x3e4   : > { %v7381_v43 = vsub.f32 %v7379_v6, %v7380_v26 }
 0x3e6   : > { %v7382_v44 = vmax.f32 %v7381_v43, 0.0 }
 0x3e8   : > { %v7383_v45 = vadd.f32 1e-05, %v7382_v44 }
 0x3ea   : > { %8225 = vrsqrt.f32 %v7383_v45  ;;  %v7385_v41 = vmul.f32 0.5, %v7383_v45 }
 0x3f4   : > { %v8226_v47 = vpop.eup %8225 }
 0x3f5   : > { %v7386_v32 = vmul.f32 %v8226_v47, %v7385_v41 }
 0x3f7   : > { %v7387_v49 = vmul.f32 %v8226_v47, %v7386_v32 }
 0x3f9   : > { %v7388_v50 = vsub.f32 1.5, %v7387_v49 }
 0x3fb   : > { %v7389_v52 = vmul.f32 %v8226_v47, %v7388_v50 }
 0x3fd   : > { %v7391_v53 = vmul.f32 %v7390_v12, %v7389_v52 }
 0x3ff   : > { %7397 = vperm.xlu0 %8223, %v7391_v53   ;;  %v7393_v56 = vmul.f32 %v7391_v53, %v7378_v40 }
 0x401   : > { %v7394_v57 = vsub.f32 %v7392_v55, %v7393_v56 }
 0x403   : > { %7418 = vperm.xlu1 %8224, %v7394_v57  }
 0x47e   : > { %v7398_v60 = vpop.permute.xlu0 %7397 }
 0x47f   : > { %v7400_v61 = vmul.f32 %v7398_v60, %v9518_v51  ;;  %v7401_v62 = vmul.f32 %v7398_v60, %v9523_v54  ;;  %v7402_v11 = vmul.f32 %v7398_v60, %v9528_v63  ;;  %v7403_v1 = vmul.f32 %v7398_v60, %v9533_v58 }
 0x480   : > { %v7404_v2 = vmul.f32 %v7398_v60, %v9538_v0  ;;  %v7405_v4 = vmul.f32 %v7398_v60, %v9543_v17  ;;  %v7406_v46 = vmul.f32 %v7398_v60, %v9552_v23  ;;  %v7407_v9 = vmul.f32 %v7398_v60, %v9563_v28 }
 0x481   : > { %v7408_v14 = vmul.f32 %v7398_v60, %v9558_v15  ;;  %v7409_v19 = vmul.f32 %v7398_v60, %v9571_v33  ;;  %v7410_v51 = vmul.f32 %v7398_v60, %v9576_v35  ;;  %v7411_v54 = vmul.f32 %v7398_v60, %v9582_v8 }
 0x482   : > { %v7412_v63 = vmul.f32 %v7398_v60, %v9591_v39  ;;  %v7413_v58 = vmul.f32 %v7398_v60, %v9599_v42  ;;  %v7414_v0 = vmul.f32 %v7398_v60, %v9608_v48  ;;  %v7415_v17 = vmul.f32 %v7398_v60, %v9617_v59  ;;  %v7419_v20 = vpop.permute.xlu1 %7418 }
 0x483   : > { %v7421_v23 = vadd.f32 %v7419_v20, %v7400_v61  ;;  %v7422_v21 = vadd.f32 %v7419_v20, %v7401_v62  ;;  %v7423_v28 = vadd.f32 %v7419_v20, %v7402_v11  ;;  %v7424_v22 = vadd.f32 %v7419_v20, %v7403_v1 }
 0x484   : > { %v7425_v15 = vadd.f32 %v7419_v20, %v7404_v2  ;;  %v7426_v27 = vadd.f32 %v7419_v20, %v7405_v4  ;;  %v7427_v33 = vadd.f32 %v7419_v20, %v7406_v46  ;;  %v7428_v29 = vadd.f32 %v7419_v20, %v7407_v9 }
 0x485   : > { %v7429_v35 = vadd.f32 %v7419_v20, %v7408_v14  ;;  %v7430_v30 = vadd.f32 %v7419_v20, %v7409_v19  ;;  %v7431_v8 = vadd.f32 %v7419_v20, %v7410_v51  ;;  %v7432_v24 = vadd.f32 %v7419_v20, %v7411_v54 }
 0x486   : > { %v7433_v39 = vadd.f32 %v7419_v20, %v7412_v63  ;;  %v7434_v5 = vadd.f32 %v7419_v20, %v7413_v58  ;;  %v7435_v42 = vadd.f32 %v7419_v20, %v7414_v0  ;;  %v7436_v31 = vadd.f32 %v7419_v20, %v7415_v17 }
 0x487   : > { %v7437_v48 = vmax.f32 %v7421_v23, 0.0  ;;  %v7438_v3 = vmax.f32 %v7422_v21, 0.0  ;;  %v7439_v59 = vmax.f32 %v7423_v28, 0.0  ;;  %v7440_v18 = vmax.f32 %v7424_v22, 0.0 }
 0x488   : > { %v7441_v36 = vmax.f32 %v7425_v15, 0.0  ;;  %v7442_v25 = vmax.f32 %v7426_v27, 0.0  ;;  %v7443_v13 = vmax.f32 %v7427_v33, 0.0  ;;  %v7444_v16 = vmax.f32 %v7428_v29, 0.0 }
 0x489   : > { %v7445_v37 = vmax.f32 %v7429_v35, 0.0  ;;  %v7446_v38 = vmax.f32 %v7430_v30, 0.0  ;;  %v7447_v10 = vmax.f32 %v7431_v8, 0.0  ;;  %v7448_v40 = vmax.f32 %v7432_v24, 0.0  ;;  %7453 = vst [vmem:[%s9705_s5] sm:$0xff] %v7437_v48  ;;  %7454 = vst [vmem:[%s9705_s5 + $0x8] sm:$0xff] %v7438_v3 }
 0x48a   : > { %7455 = vst [vmem:[%s9705_s5 + $0x10] sm:$0xff] %v7439_v59  ;;  %7456 = vst [vmem:[%s9705_s5 + $0x18] sm:$0xff] %v7440_v18  ;;  %v7449_v34 = vmax.f32 %v7433_v39, 0.0  ;;  %v7450_v7 = vmax.f32 %v7434_v5, 0.0  ;;  %v7451_v26 = vmax.f32 %v7435_v42, 0.0  ;;  %v7452_v6 = vmax.f32 %v7436_v31, 0.0 }
 0x48b   : > { %7457 = vst [vmem:[%s9705_s5 + $0x20] sm:$0xff] %v7441_v36  ;;  %7458 = vst [vmem:[%s9705_s5 + $0x28] sm:$0xff] %v7442_v25 }
 0x48c   : > { %7459 = vst [vmem:[%s9705_s5 + $0x30] sm:$0xff] %v7443_v13  ;;  %7460 = vst [vmem:[%s9705_s5 + $0x38] sm:$0xff] %v7444_v16 }
 0x48d   : > { %7461 = vst [vmem:[%s9705_s5 + $0x40] sm:$0xff] %v7445_v37  ;;  %7462 = vst [vmem:[%s9705_s5 + $0x48] sm:$0xff] %v7446_v38 }
 0x48e   : > { %7463 = vst [vmem:[%s9705_s5 + $0x50] sm:$0xff] %v7447_v10  ;;  %7464 = vst [vmem:[%s9705_s5 + $0x58] sm:$0xff] %v7448_v40 }
 0x48f   : > { %7465 = vst [vmem:[%s9705_s5 + $0x60] sm:$0xff] %v7449_v34  ;;  %7466 = vst [vmem:[%s9705_s5 + $0x68] sm:$0xff] %v7450_v7 }
 0x490   : > { %7467 = vst [vmem:[%s9705_s5 + $0x70] sm:$0xff] %v7451_v26  ;;  %7468 = vst [vmem:[%s9705_s5 + $0x78] sm:$0xff] %v7452_v6 }
 0x491 PF: > { %s15_s18 = sadd.s32 1, %s8233_s18  }
 0x492   : > { %p12_p5 = scmp.ge.s32.totalorder %s15_s18, 4  }
 0x494   :  { %14 = sbr.rel (!%p12_p5) target bundleno = 1 (0x1), region = 97 }

</bundles_post_ra>
